<compile_context>
chip_gen: v7x
topology: tpu7x:2x2x1
jax: 0.10.0
libtpu: 0.0.40
codegen_flags: <defaults>
</compile_context>

<pallas_src>
import jax
import jax.numpy as jnp
from jax import lax
from jax.experimental import pallas as pl
from jax.experimental.pallas import tpu as pltpu


def _round_up(x, m):
    return (x + m - 1) // m * m


def _vmem_config():
    """(block-sizing budget, scoped vmem limit) chosen per TPU generation."""
    try:
        kind = jax.devices()[0].device_kind.lower()
    except Exception:
        kind = ""
    if "v5" in kind or "v6" in kind:
        # 128 MiB physical VMEM: bigger rectangular DMAs, fewer grid steps.
        return 56 * 1024 * 1024, 100 * 1024 * 1024
    # v7x (64 MiB physical per TensorCore) and unknown targets: conservative.
    return 20 * 1024 * 1024, 48 * 1024 * 1024


def _choose_blocks(N, T, H, itemsize, vmem_budget_bytes):
    """Pick (block_n, block_t). block_t == T means the whole sequence stays resident."""
    per_elem = 2 * itemsize + 3 * 4          # double-buffered input + f32 intermediates
    n8 = _round_up(N, 8)

    bytes_per_row = T * H * per_elem + 4 * H * 4
    rows_fit = vmem_budget_bytes // max(bytes_per_row, 1)
    if rows_fit >= 8:
        bn = min(int(rows_fit) // 8 * 8, n8)
        # Prefer >=4 grid steps (>=2 per v7x TensorCore) for DMA/compute overlap,
        # but never shrink a block below ~1 MiB of input DMA (v5e single-TC case).
        min_rows = max(8, _round_up(pl.cdiv(1 << 20, max(T * H * itemsize, 1)), 8))
        if n8 // bn < 4:
            bn = min(bn, max(min_rows, _round_up(pl.cdiv(n8, 4), 8)))
            bn = min(bn, n8)
        return bn, T

    # Large T*H: add a sequence-axis grid dimension (online softmax in the kernel).
    bn = 8
    bytes_per_t = bn * H * per_elem
    bt_max = max(8, (vmem_budget_bytes // max(bytes_per_t, 1)) // 8 * 8)
    if bt_max >= T:
        return bn, T
    k = pl.cdiv(T, bt_max)                   # number of T blocks
    bt = _round_up(pl.cdiv(T, k), 8)         # balanced blocks -> minimal T padding
    return bn, bt


def _make_kernel(t_valid, block_t, needs_t_mask):
    def kernel(x_ref, w_ref, o_ref, m_sc, l_sc, acc_sc):
        # x_ref: (Bn, Tt, H) slab; w_ref: (1, 1, H) Linear(H, 1) weight; o_ref: (Bn, H)
        # Scratch: running max (Bn,1,1), running denom (Bn,1,1), f32 accumulator (Bn,H).
        tj = pl.program_id(1)

        @pl.when(tj == 0)
        def _():
            m_sc[...] = jnp.full(m_sc.shape, -jnp.inf, m_sc.dtype)
            l_sc[...] = jnp.zeros(l_sc.shape, l_sc.dtype)
            acc_sc[...] = jnp.zeros(acc_sc.shape, acc_sc.dtype)

        # f32 intermediates for a stable softmax / accurate accumulation
        # (no-op cast for f32 inputs).
        x = x_ref[...].astype(jnp.float32)                     # (Bn, Tt, H)
        w = w_ref[...].astype(jnp.float32)                     # (1, 1, H)

        # Attention logits: lane-broadcast multiply + lane reduction over H.
        # (Linear bias omitted: it shifts every logit equally -> softmax no-op.)
        logits = jnp.sum(x * w, axis=-1, keepdims=True)        # (Bn, Tt, 1)
        if needs_t_mask:
            t_idx = tj * block_t + lax.broadcasted_iota(jnp.int32, logits.shape, 1)
            logits = jnp.where(t_idx < t_valid, logits, -jnp.inf)

        # Flash-style online softmax over the T grid axis (exact when there is 1 block).
        m_prev = m_sc[...]                                                   # (Bn,1,1)
        m_new = jnp.maximum(m_prev, jnp.max(logits, axis=1, keepdims=True))  # (Bn,1,1)
        alpha = jnp.exp(m_prev - m_new)                                      # (Bn,1,1)
        p = jnp.exp(logits - m_new)                                          # (Bn,Tt,1)
        l_sc[...] = alpha * l_sc[...] + jnp.sum(p, axis=1, keepdims=True)
        acc_sc[...] = alpha[:, :, 0] * acc_sc[...] + jnp.sum(p * x, axis=1)  # (Bn,H)
        m_sc[...] = m_new

        @pl.when(tj == pl.num_programs(1) - 1)
        def _():
            # Exact division (matches PyTorch softmax; no approximate reciprocal).
            o_ref[...] = (acc_sc[...] / l_sc[...][:, :, 0]).astype(o_ref.dtype)

    return kernel


def self_attention_pooling(batch_rep, W, b=None, *, block_n=None, block_t=None):
    """batch_rep: (N, T, H); W: (1, H) Linear weight; b: (1,) Linear bias -> (N, H).

    The bias is accepted for API fidelity but adding one scalar to every logit is a
    softmax no-op, so it never reaches the kernel (output is mathematically identical).
    """
    del b
    N, T, H = batch_rep.shape
    itemsize = batch_rep.dtype.itemsize
    vmem_budget, vmem_limit = _vmem_config()

    auto_bn, auto_bt = _choose_blocks(N, T, H, itemsize, vmem_budget)
    block_n = auto_bn if block_n is None else max(8, block_n // 8 * 8)
    block_t = auto_bt if block_t is None else block_t
    block_t = T if block_t >= T else max(8, block_t // 8 * 8)

    n_pad = _round_up(N, block_n)
    t_pad = T if block_t == T else _round_up(T, block_t)

    x = batch_rep
    if n_pad != N or t_pad != T:
        x = jnp.pad(x, ((0, n_pad - N), (0, t_pad - T), (0, 0)))
    w3 = W.reshape(1, 1, H)                            # lane-broadcast layout (hoisted)

    kernel = _make_kernel(t_valid=T, block_t=block_t, needs_t_mask=(t_pad != T))

    out = pl.pallas_call(
        kernel,
        out_shape=jax.ShapeDtypeStruct((n_pad, H), batch_rep.dtype),
        grid_spec=pltpu.PrefetchScalarGridSpec(
            num_scalar_prefetch=0,
            grid=(n_pad // block_n, t_pad // block_t),
            in_specs=[
                pl.BlockSpec((block_n, block_t, H), lambda i, j: (i, j, 0)),
                pl.BlockSpec((1, 1, H), lambda i, j: (0, 0, 0)),
            ],
            out_specs=pl.BlockSpec((block_n, H), lambda i, j: (i, 0)),
            scratch_shapes=[
                pltpu.VMEM((block_n, 1, 1), jnp.float32),   # running max
                pltpu.VMEM((block_n, 1, 1), jnp.float32),   # running denominator
                pltpu.VMEM((block_n, H), jnp.float32),      # weighted-sum accumulator
            ],
        ),
        compiler_params=pltpu.CompilerParams(
            dimension_semantics=("parallel", "arbitrary"),
            vmem_limit_bytes=vmem_limit,
        ),
        cost_estimate=pl.CostEstimate(
            flops=4 * N * T * H,
            transcendentals=N * T,
            bytes_accessed=N * T * H * itemsize + N * H * itemsize + H * itemsize,
        ),
    )(x, w3)
    return out[:N]


def _reference(batch_rep, W, b):
    # Pure-JAX reference replicating the PyTorch forward exactly; HIGHEST precision
    # keeps the TPU from substituting bf16 matmul passes for the f32 logits.
    logits = jnp.einsum("nth,oh->nt", batch_rep, W,
                        precision=lax.Precision.HIGHEST) + b[0]
    att = jax.nn.softmax(logits, axis=-1)[..., None]             # (N, T, 1)
    return jnp.sum(batch_rep * att, axis=1)                      # (N, H)


if __name__ == "__main__":
    key = jax.random.PRNGKey(0)

    def run_case(N, T, H, case_key, **kwargs):
        kx, kw, kb = jax.random.split(case_key, 3)
        batch_rep = jax.random.normal(kx, (N, T, H), dtype=jnp.float32)
        # Deterministic init matching nn.Linear(H, 1): weight (1, H), bias (1,)
        bound = 1.0 / (H ** 0.5)
        W = jax.random.uniform(kw, (1, H), minval=-bound, maxval=bound,
                               dtype=jnp.float32)
        b = jax.random.uniform(kb, (1,), minval=-bound, maxval=bound,
                               dtype=jnp.float32)

        out = jax.block_until_ready(
            self_attention_pooling(batch_rep, W, b, **kwargs))
        ref = _reference(batch_rep, W, b)
        assert out.shape == (N, H), f"bad output shape {out.shape}"
        err = float(jnp.max(jnp.abs(out - ref)))
        assert jnp.allclose(out, ref, atol=5e-4, rtol=5e-4), \
            f"mismatch vs reference for shape {(N, T, H)}: max abs err {err}"

    k1, k2, k3, k4 = jax.random.split(key, 4)
    run_case(16, 64, 128, k1)                        # full-T path, auto block sizing
    run_case(5, 8, 32, k2)                           # ragged N -> batch-padding path
    run_case(8, 32, 128, k3, block_t=8)              # forced T tiling (online softmax)
    run_case(8, 20, 128, k4, block_n=8, block_t=8)   # T padding + -inf masking path
    print("KERNEL_OK")
</pallas_src>

<mosaic_0001>
module attributes {stable_mosaic.version = 11 : i64} {
  func.func @kernel(%arg0: i32, %arg1: i32, %arg2: memref<16x64x128xf32, #tpu.memory_space<vmem>>, %arg3: memref<1x1x128xf32, #tpu.memory_space<vmem>>, %arg4: memref<16x128xf32, #tpu.memory_space<vmem>>, %arg5: memref<16x1x1xf32, #tpu.memory_space<vmem>>, %arg6: memref<16x1x1xf32, #tpu.memory_space<vmem>>, %arg7: memref<16x128xf32, #tpu.memory_space<vmem>>) attributes {dimension_semantics = [#tpu.dimension_semantics<parallel>, #tpu.dimension_semantics<arbitrary>], iteration_bounds = array<i64: 1, 1>, scalar_prefetch = 0 : i64, scratch_operands = 3 : i64, tpu.core_type = #tpu.core_type<tc>, window_params = [{transform_indices = @transform_0, window_bounds = array<i64: 16, 64, 128>}, {pipeline_mode = #tpu.pipeline_mode<synchronous>, transform_indices = @transform_1, window_bounds = array<i64: 1, 1, 128>}, {transform_indices = @transform_2, window_bounds = array<i64: 16, 128>}]} {
    %c0_i32 = arith.constant 0 : i32
    %0 = arith.cmpi eq, %arg1, %c0_i32 : i32
    %1 = arith.extui %0 : i1 to i32
    %c0_i32_0 = arith.constant 0 : i32
    %2 = arith.cmpi ne, %1, %c0_i32_0 : i32
    scf.if %2 {
      %cst_27 = arith.constant 0xFF800000 : f32
      %37 = vector.broadcast %cst_27 : f32 to vector<16x1x1xf32>
      %c0_28 = arith.constant 0 : index
      %c0_29 = arith.constant 0 : index
      %c0_30 = arith.constant 0 : index
      %38 = vector.load %arg5[%c0_28, %c0_29, %c0_30] : memref<16x1x1xf32, #tpu.memory_space<vmem>>, vector<16x1x1xf32>
      tpu.vector_store %arg5[%c0_28, %c0_29, %c0_30], %37 {strides = array<i32>} : memref<16x1x1xf32, #tpu.memory_space<vmem>>, vector<16x1x1xf32>,
      %cst_31 = arith.constant 0.000000e+00 : f32
      %39 = vector.broadcast %cst_31 : f32 to vector<16x1x1xf32>
      %c0_32 = arith.constant 0 : index
      %c0_33 = arith.constant 0 : index
      %c0_34 = arith.constant 0 : index
      %40 = vector.load %arg6[%c0_32, %c0_33, %c0_34] : memref<16x1x1xf32, #tpu.memory_space<vmem>>, vector<16x1x1xf32>
      tpu.vector_store %arg6[%c0_32, %c0_33, %c0_34], %39 {strides = array<i32>} : memref<16x1x1xf32, #tpu.memory_space<vmem>>, vector<16x1x1xf32>,
      %cst_35 = arith.constant 0.000000e+00 : f32
      %41 = vector.broadcast %cst_35 : f32 to vector<16x128xf32>
      %c0_36 = arith.constant 0 : index
      %c0_37 = arith.constant 0 : index
      %42 = vector.load %arg7[%c0_36, %c0_37] : memref<16x128xf32, #tpu.memory_space<vmem>>, vector<16x128xf32>
      tpu.vector_store %arg7[%c0_36, %c0_37], %41 {strides = array<i32>} : memref<16x128xf32, #tpu.memory_space<vmem>>, vector<16x128xf32>,
    } else {
    }
    %c0 = arith.constant 0 : index
    %c0_1 = arith.constant 0 : index
    %c0_2 = arith.constant 0 : index
    %3 = vector.load %arg2[%c0, %c0_1, %c0_2] : memref<16x64x128xf32, #tpu.memory_space<vmem>>, vector<16x64x128xf32>
    %c0_3 = arith.constant 0 : index
    %c0_4 = arith.constant 0 : index
    %c0_5 = arith.constant 0 : index
    %4 = vector.load %arg3[%c0_3, %c0_4, %c0_5] : memref<1x1x128xf32, #tpu.memory_space<vmem>>, vector<1x1x128xf32>
    %5 = vector.broadcast %4 : vector<1x1x128xf32> to vector<16x64x128xf32>
    %6 = arith.mulf %3, %5 : vector<16x64x128xf32>
    %cst = arith.constant dense<0.000000e+00> : vector<16x64xf32>
    %7 = vector.multi_reduction <add>, %6, %cst [2] : vector<16x64x128xf32> to vector<16x64xf32>
    %8 = vector.shape_cast %7 : vector<16x64xf32> to vector<16x64x1xf32>
    %c0_6 = arith.constant 0 : index
    %c0_7 = arith.constant 0 : index
    %c0_8 = arith.constant 0 : index
    %9 = vector.load %arg5[%c0_6, %c0_7, %c0_8] : memref<16x1x1xf32, #tpu.memory_space<vmem>>, vector<16x1x1xf32>
    %cst_9 = arith.constant dense<0xFF800000> : vector<16x1xf32>
    %10 = vector.multi_reduction <maximumf>, %8, %cst_9 [1] : vector<16x64x1xf32> to vector<16x1xf32>
    %11 = vector.shape_cast %10 : vector<16x1xf32> to vector<16x1x1xf32>
    %12 = arith.maximumf %9, %11 : vector<16x1x1xf32>
    %13 = arith.subf %9, %12 : vector<16x1x1xf32>
    %14 = math.exp %13 : vector<16x1x1xf32>
    %15 = vector.broadcast %12 : vector<16x1x1xf32> to vector<16x64x1xf32>
    %16 = arith.subf %8, %15 : vector<16x64x1xf32>
    %17 = math.exp %16 : vector<16x64x1xf32>
    %c0_10 = arith.constant 0 : index
    %c0_11 = arith.constant 0 : index
    %c0_12 = arith.constant 0 : index
    %18 = vector.load %arg6[%c0_10, %c0_11, %c0_12] : memref<16x1x1xf32, #tpu.memory_space<vmem>>, vector<16x1x1xf32>
    %19 = arith.mulf %14, %18 : vector<16x1x1xf32>
    %cst_13 = arith.constant dense<0.000000e+00> : vector<16x1xf32>
    %20 = vector.multi_reduction <add>, %17, %cst_13 [1] : vector<16x64x1xf32> to vector<16x1xf32>
    %21 = vector.shape_cast %20 : vector<16x1xf32> to vector<16x1x1xf32>
    %22 = arith.addf %19, %21 : vector<16x1x1xf32>
    %c0_14 = arith.constant 0 : index
    %c0_15 = arith.constant 0 : index
    %c0_16 = arith.constant 0 : index
    %23 = vector.load %arg6[%c0_14, %c0_15, %c0_16] : memref<16x1x1xf32, #tpu.memory_space<vmem>>, vector<16x1x1xf32>
    tpu.vector_store %arg6[%c0_14, %c0_15, %c0_16], %22 {strides = array<i32>} : memref<16x1x1xf32, #tpu.memory_space<vmem>>, vector<16x1x1xf32>,
    %24 = vector.shape_cast %14 : vector<16x1x1xf32> to vector<16x1xf32>
    %c0_17 = arith.constant 0 : index
    %c0_18 = arith.constant 0 : index
    %25 = vector.load %arg7[%c0_17, %c0_18] : memref<16x128xf32, #tpu.memory_space<vmem>>, vector<16x128xf32>
    %26 = vector.broadcast %24 : vector<16x1xf32> to vector<16x128xf32>
    %27 = arith.mulf %26, %25 : vector<16x128xf32>
    %28 = vector.broadcast %17 : vector<16x64x1xf32> to vector<16x64x128xf32>
    %29 = arith.mulf %28, %3 : vector<16x64x128xf32>
    %cst_19 = arith.constant dense<0.000000e+00> : vector<16x128xf32>
    %30 = vector.multi_reduction <add>, %29, %cst_19 [1] : vector<16x64x128xf32> to vector<16x128xf32>
    %31 = arith.addf %27, %30 : vector<16x128xf32>
    %c0_20 = arith.constant 0 : index
    %c0_21 = arith.constant 0 : index
    %32 = vector.load %arg7[%c0_20, %c0_21] : memref<16x128xf32, #tpu.memory_space<vmem>>, vector<16x128xf32>
    tpu.vector_store %arg7[%c0_20, %c0_21], %31 {strides = array<i32>} : memref<16x128xf32, #tpu.memory_space<vmem>>, vector<16x128xf32>,
    %c0_22 = arith.constant 0 : index
    %c0_23 = arith.constant 0 : index
    %c0_24 = arith.constant 0 : index
    %33 = vector.load %arg5[%c0_22, %c0_23, %c0_24] : memref<16x1x1xf32, #tpu.memory_space<vmem>>, vector<16x1x1xf32>
    tpu.vector_store %arg5[%c0_22, %c0_23, %c0_24], %12 {strides = array<i32>} : memref<16x1x1xf32, #tpu.memory_space<vmem>>, vector<16x1x1xf32>,
    %c0_i32_25 = arith.constant 0 : i32
    %34 = arith.cmpi eq, %arg1, %c0_i32_25 : i32
    %35 = arith.extui %34 : i1 to i32
    %c0_i32_26 = arith.constant 0 : i32
    %36 = arith.cmpi ne, %35, %c0_i32_26 : i32
    scf.if %36 {
      %c0_27 = arith.constant 0 : index
      %c0_28 = arith.constant 0 : index
      %37 = vector.load %arg7[%c0_27, %c0_28] : memref<16x128xf32, #tpu.memory_space<vmem>>, vector<16x128xf32>
      %c0_29 = arith.constant 0 : index
      %c0_30 = arith.constant 0 : index
      %c0_31 = arith.constant 0 : index
      %38 = vector.load %arg6[%c0_29, %c0_30, %c0_31] : memref<16x1x1xf32, #tpu.memory_space<vmem>>, vector<16x1x1xf32>
      %39 = vector.shape_cast %38 : vector<16x1x1xf32> to vector<16x1xf32>
      %40 = vector.broadcast %39 : vector<16x1xf32> to vector<16x128xf32>
      %41 = arith.divf %37, %40 : vector<16x128xf32>
      %c0_32 = arith.constant 0 : index
      %c0_33 = arith.constant 0 : index
      %42 = vector.load %arg4[%c0_32, %c0_33] : memref<16x128xf32, #tpu.memory_space<vmem>>, vector<16x128xf32>
      tpu.vector_store %arg4[%c0_32, %c0_33], %41 {strides = array<i32>} : memref<16x128xf32, #tpu.memory_space<vmem>>, vector<16x128xf32>,
    } else {
    }
    return
  }
  func.func @transform_0(%arg0: i32, %arg1: i32) -> (i32, i32, i32) {
    %c0_i32 = arith.constant 0 : i32
    %c0_i32_0 = arith.constant 0 : i32
    return %arg0, %arg1, %c0_i32 : i32, i32, i32
  }
  func.func @transform_1(%arg0: i32, %arg1: i32) -> (i32, i32, i32) {
    %c0_i32 = arith.constant 0 : i32
    %c0_i32_0 = arith.constant 0 : i32
    %c0_i32_1 = arith.constant 0 : i32
    %c0_i32_2 = arith.constant 0 : i32
    return %c0_i32, %c0_i32_0, %c0_i32_1 : i32, i32, i32
  }
  func.func @transform_2(%arg0: i32, %arg1: i32) -> (i32, i32) {
    %c0_i32 = arith.constant 0 : i32
    %c0_i32_0 = arith.constant 0 : i32
    return %arg0, %c0_i32 : i32, i32
  }
}

</mosaic_0001>

<bundles_post_ra>
// kernel: tpu_custom_call.1
= control target key start
LH: loop header
LB: loop body
LE: loop exit
PB: predicated region body
PF: predicated region fallthrough
CT: control target
= control target key end

     0   :  { %7 = vsyncpa [#allocation6], 0  ;;  %s6351_s0 = inlined_call_operand.hbm [shape: f32[16,64,128], index: 0, kind: input, shape index: {}]   ;;  %s6352_s1 = inlined_call_operand.vmem [shape: f32[1,1,128], index: 1, kind: input, shape index: {}]   ;;  %s6353_s2 = inlined_call_operand.hbm [shape: f32[16,128], index: 2, kind: output, shape index: {}]  }
   0x1   :  { %8 = vsyncpa [#allocation7], 0  ;;  %s4198_s9 = smov [#allocation5]   ;;  %s4150_s13 = scalar_lea.hbm %s6351_s0, 16384 }
   0x2   :  { %s14_s10 = sshll.u32 %s4198_s9, 4  ;;  %p4151_p0 = scmp.ne.s32.totalorder %s6351_s0, %s4150_s13  ;;  %s15_s10 = int_to_ptr.vmem [resolvable:$true] %s14_s10 }
   0x3   :  { %p4154_p1 = scmp.lt.u32.totalorder %s4150_s13, %s6351_s0 }
   0x5   :  { %p4156_p2 = pnand %p4154_p1, %p4151_p0 }
   0x7   :  { %4159 = shalt.err (!%p4156_p2)
}
   0x8   :  { %s4160_s18 = scalar_lea.vmem %s15_s10, 16384  ;;  %p4165_p4 = scmp.lt.s32.totalorder %s15_s10, %s15_s10 }
   0x9   :  { %p4161_p3 = scmp.ne.s32.totalorder %s15_s10, %s4160_s18  ;;  %p4166_p5 = scmp.lt.s32.totalorder %s4160_s18, %s4160_s18 }
   0xb   :  { %p4167_p6 = por %p4166_p5, %p4165_p4 }
   0xd   :  { %p4168_p7 = pnand %p4167_p6, %p4161_p3 }
   0xf   :  { %4171 = shalt.err (!%p4168_p7)
}
  0x10   :  { %s4199_s19 = smov 128   ;;  %s4200_s20 = smov 8  }
  0x11   :  { %20 = dma.hbm_to_vmem [thread:$0]  %s6351_s0, 16384, %s15_s10, [#allocation6], %s4199_s19, %s4199_s19, %s4200_s20  }
  0x12   :  { %4194 = dma.done.wait [#allocation6], 16384  }
  0x13   :  { %4195 = vsyncadd [#allocation6], 4294950912  ;;  %v67_v0 = vld [vmem:[#allocation5 + $0x10] sm:$0xff]  ;;  %v4239_v1 = vld [vmem:[%s6352_s1] ss:$0 sm:$0xff]  ;;  %vm30_vm0 = vcmask 0  }
  0x14   :  { %v65_v2 = vld [vmem:[#allocation5] sm:$0xff]  ;;  %v202_v3 = vmul.f32 %v4239_v1, %v67_v0  ;;  %v68_v5 = vld [vmem:[#allocation5 + $0x18] sm:$0xff]  ;;  %v66_v6 = vld [vmem:[#allocation5 + $0x8] sm:$0xff]  ;;  %v4201_v35 = vmov -inf   ;;  %v6354_v36 = vmov 0.0   ;;  %vm1384_vm1 = vcmask 7168  }
  0x15   :  { %v200_v4 = vmul.f32 %v4239_v1, %v65_v2  ;;  %v203_v7 = vmul.f32 %v4239_v1, %v68_v5  ;;  %v201_v8 = vmul.f32 %v4239_v1, %v66_v6  ;;  %v70_v9 = vld [vmem:[#allocation5 + $0x28] sm:$0xff]  ;;  %v69_v10 = vld [vmem:[#allocation5 + $0x20] sm:$0xff]  ;;  %v72_v13 = vld [vmem:[#allocation5 + $0x38] sm:$0xff]  ;;  %31 = vst.msk [vmem:[#allocation2] sm:$0x1] %vm30_vm0, %v4201_v35 }
  0x16   :  { %332 = vadd.xlane.f32.xlu1 %v202_v3  ;;  %v205_v11 = vmul.f32 %v4239_v1, %v70_v9  ;;  %v204_v12 = vmul.f32 %v4239_v1, %v69_v10  ;;  %v71_v14 = vld [vmem:[#allocation5 + $0x30] sm:$0xff]  ;;  %v207_v15 = vmul.f32 %v4239_v1, %v72_v13  ;;  %v74_v17 = vld [vmem:[#allocation5 + $0x48] sm:$0xff]  ;;  %v73_v18 = vld [vmem:[#allocation5 + $0x40] sm:$0xff]  ;;  %47 = vst.msk [vmem:[#allocation3] sm:$0x1] %vm30_vm0, %v6354_v36 }
  0x17   :  { %328 = vadd.xlane.f32.xlu0 %v200_v4  ;;  %v206_v16 = vmul.f32 %v4239_v1, %v71_v14  ;;  %v209_v19 = vmul.f32 %v4239_v1, %v74_v17  ;;  %v208_v20 = vmul.f32 %v4239_v1, %v73_v18  ;;  %v76_v21 = vld [vmem:[#allocation5 + $0x58] sm:$0xff]  ;;  %v75_v22 = vld [vmem:[#allocation5 + $0x50] sm:$0xff]  ;;  %v78_v25 = vld [vmem:[#allocation5 + $0x68] sm:$0xff]  ;;  %32 = vst.msk [vmem:[#allocation2 + $0x1] sm:$0x1] %vm30_vm0, %v4201_v35 }
  0x18   :  { %v211_v23 = vmul.f32 %v4239_v1, %v76_v21  ;;  %v210_v24 = vmul.f32 %v4239_v1, %v75_v22  ;;  %v77_v26 = vld [vmem:[#allocation5 + $0x60] sm:$0xff]  ;;  %v213_v27 = vmul.f32 %v4239_v1, %v78_v25  ;;  %v80_v29 = vld [vmem:[#allocation5 + $0x78] sm:$0xff]  ;;  %v79_v30 = vld [vmem:[#allocation5 + $0x70] sm:$0xff]  ;;  %33 = vst.msk [vmem:[#allocation2 + $0x2] sm:$0x1] %vm30_vm0, %v4201_v35 }
  0x19   :  { %v212_v28 = vmul.f32 %v4239_v1, %v77_v26  ;;  %v215_v31 = vmul.f32 %v4239_v1, %v80_v29  ;;  %v214_v32 = vmul.f32 %v4239_v1, %v79_v30  ;;  %v82_v33 = vld [vmem:[#allocation5 + $0x88] sm:$0xff]  ;;  %v81_v34 = vld [vmem:[#allocation5 + $0x80] sm:$0xff]  ;;  %34 = vst.msk [vmem:[#allocation2 + $0x3] sm:$0x1] %vm30_vm0, %v4201_v35  ;;  %35 = vst.msk [vmem:[#allocation2 + $0x4] sm:$0x1] %vm30_vm0, %v4201_v35 }
  0x1a   :  { %334 = vadd.xlane.f32.xlu1 %v203_v7  ;;  %36 = vst.msk [vmem:[#allocation2 + $0x5] sm:$0x1] %vm30_vm0, %v4201_v35  ;;  %37 = vst.msk [vmem:[#allocation2 + $0x6] sm:$0x1] %vm30_vm0, %v4201_v35  ;;  %v217_v37 = vmul.f32 %v4239_v1, %v82_v33  ;;  %v216_v38 = vmul.f32 %v4239_v1, %v81_v34  ;;  %v84_v39 = vld [vmem:[#allocation5 + $0x98] sm:$0xff]  ;;  %v83_v40 = vld [vmem:[#allocation5 + $0x90] sm:$0xff] }
  0x1b   :  { %330 = vadd.xlane.f32.xlu0 %v201_v8  ;;  %38 = vst.msk [vmem:[#allocation2 + $0x7] sm:$0x1] %vm30_vm0, %v4201_v35  ;;  %39 = vst.msk [vmem:[#allocation2 + $0x8] sm:$0x1] %vm30_vm0, %v4201_v35  ;;  %v219_v41 = vmul.f32 %v4239_v1, %v84_v39  ;;  %v218_v42 = vmul.f32 %v4239_v1, %v83_v40  ;;  %v86_v43 = vld [vmem:[#allocation5 + $0xa8] sm:$0xff]  ;;  %v85_v44 = vld [vmem:[#allocation5 + $0xa0] sm:$0xff] }
  0x1c   :  { %40 = vst.msk [vmem:[#allocation2 + $0x9] sm:$0x1] %vm30_vm0, %v4201_v35  ;;  %41 = vst.msk [vmem:[#allocation2 + $0xa] sm:$0x1] %vm30_vm0, %v4201_v35  ;;  %v221_v45 = vmul.f32 %v4239_v1, %v86_v43  ;;  %v220_v46 = vmul.f32 %v4239_v1, %v85_v44  ;;  %v88_v47 = vld [vmem:[#allocation5 + $0xb8] sm:$0xff]  ;;  %v87_v48 = vld [vmem:[#allocation5 + $0xb0] sm:$0xff] }
  0x1d   :  { %42 = vst.msk [vmem:[#allocation2 + $0xb] sm:$0x1] %vm30_vm0, %v4201_v35  ;;  %43 = vst.msk [vmem:[#allocation2 + $0xc] sm:$0x1] %vm30_vm0, %v4201_v35  ;;  %v223_v49 = vmul.f32 %v4239_v1, %v88_v47  ;;  %v222_v50 = vmul.f32 %v4239_v1, %v87_v48  ;;  %v90_v51 = vld [vmem:[#allocation5 + $0xc8] sm:$0xff]  ;;  %v89_v52 = vld [vmem:[#allocation5 + $0xc0] sm:$0xff] }
  0x1e   :  { %338 = vadd.xlane.f32.xlu1 %v205_v11  ;;  %44 = vst.msk [vmem:[#allocation2 + $0xd] sm:$0x1] %vm30_vm0, %v4201_v35  ;;  %45 = vst.msk [vmem:[#allocation2 + $0xe] sm:$0x1] %vm30_vm0, %v4201_v35  ;;  %v225_v53 = vmul.f32 %v4239_v1, %v90_v51  ;;  %v224_v54 = vmul.f32 %v4239_v1, %v89_v52  ;;  %v92_v55 = vld [vmem:[#allocation5 + $0xd8] sm:$0xff]  ;;  %v91_v56 = vld [vmem:[#allocation5 + $0xd0] sm:$0xff] }
  0x1f   :  { %336 = vadd.xlane.f32.xlu0 %v204_v12  ;;  %46 = vst.msk [vmem:[#allocation2 + $0xf] sm:$0x1] %vm30_vm0, %v4201_v35  ;;  %48 = vst.msk [vmem:[#allocation3 + $0x1] sm:$0x1] %vm30_vm0, %v6354_v36  ;;  %v227_v57 = vmul.f32 %v4239_v1, %v92_v55  ;;  %v226_v58 = vmul.f32 %v4239_v1, %v91_v56  ;;  %v94_v59 = vld [vmem:[#allocation5 + $0xe8] sm:$0xff]  ;;  %v93_v60 = vld [vmem:[#allocation5 + $0xe0] sm:$0xff] }
  0x20   :  { %49 = vst.msk [vmem:[#allocation3 + $0x2] sm:$0x1] %vm30_vm0, %v6354_v36  ;;  %50 = vst.msk [vmem:[#allocation3 + $0x3] sm:$0x1] %vm30_vm0, %v6354_v36  ;;  %v229_v61 = vmul.f32 %v4239_v1, %v94_v59  ;;  %v228_v62 = vmul.f32 %v4239_v1, %v93_v60  ;;  %v96_v63 = vld [vmem:[#allocation5 + $0xf8] sm:$0xff]  ;;  %v95_v0 = vld [vmem:[#allocation5 + $0xf0] sm:$0xff] }
  0x21   :  { %51 = vst.msk [vmem:[#allocation3 + $0x4] sm:$0x1] %vm30_vm0, %v6354_v36  ;;  %52 = vst.msk [vmem:[#allocation3 + $0x5] sm:$0x1] %vm30_vm0, %v6354_v36  ;;  %v231_v2 = vmul.f32 %v4239_v1, %v96_v63  ;;  %v230_v3 = vmul.f32 %v4239_v1, %v95_v0  ;;  %v98_v4 = vld [vmem:[#allocation5 + $0x108] sm:$0xff]  ;;  %v97_v5 = vld [vmem:[#allocation5 + $0x100] sm:$0xff] }
  0x22   :  { %342 = vadd.xlane.f32.xlu1 %v207_v15  ;;  %53 = vst.msk [vmem:[#allocation3 + $0x6] sm:$0x1] %vm30_vm0, %v6354_v36  ;;  %54 = vst.msk [vmem:[#allocation3 + $0x7] sm:$0x1] %vm30_vm0, %v6354_v36  ;;  %v233_v6 = vmul.f32 %v4239_v1, %v98_v4  ;;  %v232_v7 = vmul.f32 %v4239_v1, %v97_v5  ;;  %v100_v8 = vld [vmem:[#allocation5 + $0x118] sm:$0xff]  ;;  %v99_v9 = vld [vmem:[#allocation5 + $0x110] sm:$0xff] }
  0x23   :  { %340 = vadd.xlane.f32.xlu0 %v206_v16  ;;  %55 = vst.msk [vmem:[#allocation3 + $0x8] sm:$0x1] %vm30_vm0, %v6354_v36  ;;  %56 = vst.msk [vmem:[#allocation3 + $0x9] sm:$0x1] %vm30_vm0, %v6354_v36  ;;  %v235_v10 = vmul.f32 %v4239_v1, %v100_v8  ;;  %v234_v11 = vmul.f32 %v4239_v1, %v99_v9  ;;  %v102_v12 = vld [vmem:[#allocation5 + $0x128] sm:$0xff]  ;;  %v101_v13 = vld [vmem:[#allocation5 + $0x120] sm:$0xff] }
  0x24   :  { %57 = vst.msk [vmem:[#allocation3 + $0xa] sm:$0x1] %vm30_vm0, %v6354_v36  ;;  %58 = vst.msk [vmem:[#allocation3 + $0xb] sm:$0x1] %vm30_vm0, %v6354_v36  ;;  %v237_v14 = vmul.f32 %v4239_v1, %v102_v12  ;;  %v236_v15 = vmul.f32 %v4239_v1, %v101_v13  ;;  %v104_v16 = vld [vmem:[#allocation5 + $0x138] sm:$0xff]  ;;  %v103_v17 = vld [vmem:[#allocation5 + $0x130] sm:$0xff] }
  0x25   :  { %59 = vst.msk [vmem:[#allocation3 + $0xc] sm:$0x1] %vm30_vm0, %v6354_v36  ;;  %60 = vst.msk [vmem:[#allocation3 + $0xd] sm:$0x1] %vm30_vm0, %v6354_v36  ;;  %v239_v18 = vmul.f32 %v4239_v1, %v104_v16  ;;  %v105_v21 = vld [vmem:[#allocation5 + $0x140] sm:$0xff]  ;;  %v107_v25 = vld [vmem:[#allocation5 + $0x150] sm:$0xff] }
  0x26   :  { %346 = vadd.xlane.f32.xlu1 %v209_v19  ;;  %61 = vst.msk [vmem:[#allocation3 + $0xe] sm:$0x1] %vm30_vm0, %v6354_v36  ;;  %62 = vst.msk [vmem:[#allocation3 + $0xf] sm:$0x1] %vm30_vm0, %v6354_v36  ;;  %v238_v19 = vmul.f32 %v4239_v1, %v103_v17  ;;  %v109_v29 = vld [vmem:[#allocation5 + $0x160] sm:$0xff]  ;;  %v111_v33 = vld [vmem:[#allocation5 + $0x170] sm:$0xff] }
  0x27   :  { %344 = vadd.xlane.f32.xlu0 %v208_v20  ;;  %v106_v20 = vld [vmem:[#allocation5 + $0x148] sm:$0xff]  ;;  %v246_v35 = vmul.f32 %v4239_v1, %v111_v33 }
  0x28   :  { %v241_v22 = vmul.f32 %v4239_v1, %v106_v20 }
  0x2a   :  { %350 = vadd.xlane.f32.xlu1 %v211_v23  ;;  %v240_v23 = vmul.f32 %v4239_v1, %v105_v21 }
  0x2b   :  { %348 = vadd.xlane.f32.xlu0 %v210_v24  ;;  %v108_v24 = vld [vmem:[#allocation5 + $0x158] sm:$0xff] }
  0x2c   :  { %v243_v26 = vmul.f32 %v4239_v1, %v108_v24 }
  0x2e   :  { %354 = vadd.xlane.f32.xlu1 %v213_v27  ;;  %v242_v27 = vmul.f32 %v4239_v1, %v107_v25 }
  0x2f   :  { %352 = vadd.xlane.f32.xlu0 %v212_v28  ;;  %v110_v28 = vld [vmem:[#allocation5 + $0x168] sm:$0xff] }
  0x30   :  { %v245_v30 = vmul.f32 %v4239_v1, %v110_v28  ;;  %v140_v28 = vld [vmem:[#allocation5 + $0x258] sm:$0xff] }
  0x32   :  { %358 = vadd.xlane.f32.xlu1 %v215_v31  ;;  %v244_v31 = vmul.f32 %v4239_v1, %v109_v29  ;;  %v139_v29 = vld [vmem:[#allocation5 + $0x250] sm:$0xff] }
  0x33   :  { %356 = vadd.xlane.f32.xlu0 %v214_v32  ;;  %v112_v32 = vld [vmem:[#allocation5 + $0x178] sm:$0xff] }
  0x34   :  { %v247_v34 = vmul.f32 %v4239_v1, %v112_v32 }
  0x36   :  { %362 = vadd.xlane.f32.xlu1 %v217_v37  ;;  %v114_v37 = vld [vmem:[#allocation5 + $0x188] sm:$0xff] }
  0x37   :  { %360 = vadd.xlane.f32.xlu0 %v216_v38  ;;  %v113_v38 = vld [vmem:[#allocation5 + $0x180] sm:$0xff]  ;;  %v249_v39 = vmul.f32 %v4239_v1, %v114_v37 }
  0x38   :  { %v248_v40 = vmul.f32 %v4239_v1, %v113_v38 }
  0x3a   :  { %366 = vadd.xlane.f32.xlu1 %v219_v41  ;;  %v116_v41 = vld [vmem:[#allocation5 + $0x198] sm:$0xff] }
  0x3b   :  { %364 = vadd.xlane.f32.xlu0 %v218_v42  ;;  %v115_v42 = vld [vmem:[#allocation5 + $0x190] sm:$0xff]  ;;  %v251_v43 = vmul.f32 %v4239_v1, %v116_v41 }
  0x3c   :  { %v250_v44 = vmul.f32 %v4239_v1, %v115_v42 }
  0x3e   :  { %370 = vadd.xlane.f32.xlu1 %v221_v45  ;;  %v118_v45 = vld [vmem:[#allocation5 + $0x1a8] sm:$0xff] }
  0x3f   :  { %368 = vadd.xlane.f32.xlu0 %v220_v46  ;;  %v117_v46 = vld [vmem:[#allocation5 + $0x1a0] sm:$0xff]  ;;  %v253_v47 = vmul.f32 %v4239_v1, %v118_v45 }
  0x40   :  { %v252_v48 = vmul.f32 %v4239_v1, %v117_v46 }
  0x42   :  { %374 = vadd.xlane.f32.xlu1 %v223_v49  ;;  %v120_v49 = vld [vmem:[#allocation5 + $0x1b8] sm:$0xff] }
  0x43   :  { %372 = vadd.xlane.f32.xlu0 %v222_v50  ;;  %v119_v50 = vld [vmem:[#allocation5 + $0x1b0] sm:$0xff]  ;;  %v255_v51 = vmul.f32 %v4239_v1, %v120_v49 }
  0x44   :  { %v254_v52 = vmul.f32 %v4239_v1, %v119_v50 }
  0x46   :  { %378 = vadd.xlane.f32.xlu1 %v225_v53  ;;  %v122_v53 = vld [vmem:[#allocation5 + $0x1c8] sm:$0xff] }
  0x47   :  { %376 = vadd.xlane.f32.xlu0 %v224_v54  ;;  %v121_v54 = vld [vmem:[#allocation5 + $0x1c0] sm:$0xff]  ;;  %v257_v55 = vmul.f32 %v4239_v1, %v122_v53 }
  0x48   :  { %v256_v56 = vmul.f32 %v4239_v1, %v121_v54 }
  0x4a   :  { %382 = vadd.xlane.f32.xlu1 %v227_v57  ;;  %v124_v57 = vld [vmem:[#allocation5 + $0x1d8] sm:$0xff] }
  0x4b   :  { %380 = vadd.xlane.f32.xlu0 %v226_v58  ;;  %v123_v58 = vld [vmem:[#allocation5 + $0x1d0] sm:$0xff]  ;;  %v259_v59 = vmul.f32 %v4239_v1, %v124_v57 }
  0x4c   :  { %v258_v60 = vmul.f32 %v4239_v1, %v123_v58 }
  0x4e   :  { %386 = vadd.xlane.f32.xlu1 %v229_v61  ;;  %v126_v61 = vld [vmem:[#allocation5 + $0x1e8] sm:$0xff] }
  0x4f   :  { %384 = vadd.xlane.f32.xlu0 %v228_v62  ;;  %v125_v62 = vld [vmem:[#allocation5 + $0x1e0] sm:$0xff]  ;;  %v261_v63 = vmul.f32 %v4239_v1, %v126_v61 }
  0x50   :  { %v260_v0 = vmul.f32 %v4239_v1, %v125_v62 }
  0x52   :  { %390 = vadd.xlane.f32.xlu1 %v231_v2  ;;  %v128_v2 = vld [vmem:[#allocation5 + $0x1f8] sm:$0xff] }
  0x53   :  { %388 = vadd.xlane.f32.xlu0 %v230_v3  ;;  %v127_v3 = vld [vmem:[#allocation5 + $0x1f0] sm:$0xff]  ;;  %v263_v4 = vmul.f32 %v4239_v1, %v128_v2 }
  0x54   :  { %v262_v5 = vmul.f32 %v4239_v1, %v127_v3 }
  0x56   :  { %394 = vadd.xlane.f32.xlu1 %v233_v6  ;;  %v130_v6 = vld [vmem:[#allocation5 + $0x208] sm:$0xff] }
  0x57   :  { %392 = vadd.xlane.f32.xlu0 %v232_v7  ;;  %v129_v7 = vld [vmem:[#allocation5 + $0x200] sm:$0xff]  ;;  %v265_v8 = vmul.f32 %v4239_v1, %v130_v6 }
  0x58   :  { %v264_v9 = vmul.f32 %v4239_v1, %v129_v7  ;;  %v149_v6 = vld [vmem:[#allocation5 + $0x2a0] sm:$0xff]  ;;  %v888_v7 = vlaneseq }
  0x5a   :  { %398 = vadd.xlane.f32.xlu1 %v235_v10  ;;  %v132_v10 = vld [vmem:[#allocation5 + $0x218] sm:$0xff] }
  0x5b   :  { %396 = vadd.xlane.f32.xlu0 %v234_v11  ;;  %v131_v11 = vld [vmem:[#allocation5 + $0x210] sm:$0xff]  ;;  %v267_v12 = vmul.f32 %v4239_v1, %v132_v10 }
  0x5c   :  { %v266_v13 = vmul.f32 %v4239_v1, %v131_v11 }
  0x5e   :  { %402 = vadd.xlane.f32.xlu1 %v237_v14  ;;  %v134_v14 = vld [vmem:[#allocation5 + $0x228] sm:$0xff] }
  0x5f   :  { %400 = vadd.xlane.f32.xlu0 %v236_v15  ;;  %v133_v15 = vld [vmem:[#allocation5 + $0x220] sm:$0xff]  ;;  %v269_v16 = vmul.f32 %v4239_v1, %v134_v14 }
  0x60   :  { %v268_v17 = vmul.f32 %v4239_v1, %v133_v15 }
  0x62   :  { %406 = vadd.xlane.f32.xlu1 %v239_v18  ;;  %v136_v18 = vld [vmem:[#allocation5 + $0x238] sm:$0xff] }
  0x63   :  { %404 = vadd.xlane.f32.xlu0 %v238_v19  ;;  %v135_v19 = vld [vmem:[#allocation5 + $0x230] sm:$0xff]  ;;  %v271_v20 = vmul.f32 %v4239_v1, %v136_v18  ;;  %v4415_v18 = vshrl.u32 %v888_v7, 7 }
  0x64   :  { %v270_v21 = vmul.f32 %v4239_v1, %v135_v19 }
  0x65   :  { %6443 = vst [vmem:[#allocation11_spill] sm:$0xff] %v4415_v18 }
  0x66   :  { %410 = vadd.xlane.f32.xlu1 %v241_v22  ;;  %v138_v22 = vld [vmem:[#allocation5 + $0x248] sm:$0xff] }
  0x67   :  { %408 = vadd.xlane.f32.xlu0 %v240_v23  ;;  %v137_v23 = vld [vmem:[#allocation5 + $0x240] sm:$0xff]  ;;  %v273_v24 = vmul.f32 %v4239_v1, %v138_v22 }
  0x68   :  { %v272_v25 = vmul.f32 %v4239_v1, %v137_v23 }
  0x6a   :  { %414 = vadd.xlane.f32.xlu1 %v243_v26 }
  0x6b   :  { %412 = vadd.xlane.f32.xlu0 %v242_v27 }
  0x6e   :  { %418 = vadd.xlane.f32.xlu1 %v245_v30  ;;  %v275_v30 = vmul.f32 %v4239_v1, %v140_v28  ;;  %v4421_v28 = vld [vmem:[#allocation2] sm:$0x1] }
  0x6f   :  { %416 = vadd.xlane.f32.xlu0 %v244_v31  ;;  %v274_v31 = vmul.f32 %v4239_v1, %v139_v29 }
  0x72   :  { %422 = vadd.xlane.f32.xlu1 %v247_v34  ;;  %v142_v34 = vld [vmem:[#allocation5 + $0x268] sm:$0xff] }
  0x73   :  { %420 = vadd.xlane.f32.xlu0 %v246_v35  ;;  %v141_v35 = vld [vmem:[#allocation5 + $0x260] sm:$0xff] }
  0x76   :  { %426 = vadd.xlane.f32.xlu1 %v249_v39  ;;  %v277_v39 = vmul.f32 %v4239_v1, %v142_v34  ;;  %v4428_v34 = vsub.s32 0, %v4415_v18 }
  0x77   :  { %424 = vadd.xlane.f32.xlu0 %v248_v40  ;;  %v276_v40 = vmul.f32 %v4239_v1, %v141_v35 }
  0x7a   :  { %430 = vadd.xlane.f32.xlu1 %v251_v43  ;;  %v144_v43 = vld [vmem:[#allocation5 + $0x278] sm:$0xff] }
  0x7b   :  { %428 = vadd.xlane.f32.xlu0 %v250_v44  ;;  %v143_v44 = vld [vmem:[#allocation5 + $0x270] sm:$0xff] }
  0x7e   :  { %434 = vadd.xlane.f32.xlu1 %v253_v47  ;;  %v279_v47 = vmul.f32 %v4239_v1, %v144_v43 }
  0x7f   :  { %432 = vadd.xlane.f32.xlu0 %v252_v48  ;;  %v278_v48 = vmul.f32 %v4239_v1, %v143_v44 }
  0x82   :  { %438 = vadd.xlane.f32.xlu1 %v255_v51  ;;  %v146_v51 = vld [vmem:[#allocation5 + $0x288] sm:$0xff] }
  0x83   :  { %436 = vadd.xlane.f32.xlu0 %v254_v52  ;;  %v145_v52 = vld [vmem:[#allocation5 + $0x280] sm:$0xff] }
  0x86   :  { %442 = vadd.xlane.f32.xlu1 %v257_v55  ;;  %v281_v55 = vmul.f32 %v4239_v1, %v146_v51 }
  0x87   :  { %440 = vadd.xlane.f32.xlu0 %v256_v56  ;;  %v280_v56 = vmul.f32 %v4239_v1, %v145_v52 }
  0x8a   :  { %446 = vadd.xlane.f32.xlu1 %v259_v59  ;;  %v148_v59 = vld [vmem:[#allocation5 + $0x298] sm:$0xff] }
  0x8b   :  { %444 = vadd.xlane.f32.xlu0 %v258_v60  ;;  %v147_v60 = vld [vmem:[#allocation5 + $0x290] sm:$0xff] }
  0x8c   :  { %v282_v2 = vmul.f32 %v4239_v1, %v147_v60 }
  0x8e   :  { %450 = vadd.xlane.f32.xlu1 %v261_v63 }
  0x8f   :  { %448 = vadd.xlane.f32.xlu0 %v260_v0  ;;  %v283_v0 = vmul.f32 %v4239_v1, %v148_v59 }
  0x92   :  { %454 = vadd.xlane.f32.xlu1 %v263_v4 }
  0x93   :  { %452 = vadd.xlane.f32.xlu0 %v262_v5  ;;  %v150_v5 = vld [vmem:[#allocation5 + $0x2a8] sm:$0xff] }
  0x96   :  { %458 = vadd.xlane.f32.xlu1 %v265_v8 }
  0x97   :  { %456 = vadd.xlane.f32.xlu0 %v264_v9 }
  0x9a   :  { %462 = vadd.xlane.f32.xlu1 %v267_v12  ;;  %v285_v12 = vmul.f32 %v4239_v1, %v150_v5 }
  0x9b   :  { %460 = vadd.xlane.f32.xlu0 %v266_v13  ;;  %v284_v13 = vmul.f32 %v4239_v1, %v149_v6 }
  0x9e   :  { %466 = vadd.xlane.f32.xlu1 %v269_v16  ;;  %v152_v16 = vld [vmem:[#allocation5 + $0x2b8] sm:$0xff] }
  0x9f   :  { %464 = vadd.xlane.f32.xlu0 %v268_v17  ;;  %v151_v17 = vld [vmem:[#allocation5 + $0x2b0] sm:$0xff]  ;;  %v287_v23 = vmul.f32 %v4239_v1, %v152_v16  ;;  %v160_v16 = vld [vmem:[#allocation5 + $0x2f8] sm:$0xff] }
  0xa2   :  { %470 = vadd.xlane.f32.xlu1 %v271_v20 }
  0xa3   :  { %468 = vadd.xlane.f32.xlu0 %v270_v21  ;;  %v4363_v26 = vpop.xlane.xlu1 %332 }
  0xa4   :  { %v4365_v27 = vpop.xlane.xlu0 %328 }
  0xa6   :  { %474 = vadd.xlane.f32.xlu1 %v273_v24  ;;  %v286_v24 = vmul.f32 %v4239_v1, %v151_v17  ;;  %v159_v17 = vld [vmem:[#allocation5 + $0x2f0] sm:$0xff] }
  0xa7   :  { %472 = vadd.xlane.f32.xlu0 %v272_v25  ;;  %v4369_v32 = vpop.xlane.xlu1 %334  ;;  %v154_v25 = vld [vmem:[#allocation5 + $0x2c8] sm:$0xff] }
  0xa8   :  { %v4371_v33 = vpop.xlane.xlu0 %330 }
  0xa9   :  { %v600_v37 = vmax.f32 %v4365_v27, %v4371_v33 }
  0xaa   :  { %478 = vadd.xlane.f32.xlu1 %v275_v30 }
  0xab   :  { %v601_v38 = vmax.f32 %v600_v37, %v4363_v26  ;;  %476 = vadd.xlane.f32.xlu0 %v274_v31  ;;  %v4378_v41 = vpop.xlane.xlu1 %338  ;;  %v153_v31 = vld [vmem:[#allocation5 + $0x2c0] sm:$0xff] }
  0xac   :  { %v4380_v42 = vpop.xlane.xlu0 %336  ;;  %v288_v44 = vmul.f32 %v4239_v1, %v153_v31 }
  0xad   :  { %v602_v45 = vmax.f32 %v601_v38, %v4369_v32  ;;  %v4203_v38 = vmov 0  }
  0xae   :  { %482 = vadd.xlane.f32.xlu1 %v277_v39  ;;  %3727 = vset.pattern.permute.xlu0 %v4203_v38  ;;  %v289_v39 = vmul.f32 %v4239_v1, %v154_v25 }
  0xaf   :  { %v603_v46 = vmax.f32 %v602_v45, %v4380_v42  ;;  %480 = vadd.xlane.f32.xlu0 %v276_v40  ;;  %v4386_v49 = vpop.xlane.xlu1 %342  ;;  %3728 = vset.pattern.permute.xlu1 %v4203_v38  ;;  %v156_v45 = vld [vmem:[#allocation5 + $0x2d8] sm:$0xff]  ;;  %v161_v38 = vld [vmem:[#allocation5 + $0x300] sm:$0xff] }
  0xb0   :  { %v4388_v50 = vpop.xlane.xlu0 %340 }
  0xb1   :  { %v604_v53 = vmax.f32 %v603_v46, %v4378_v41  ;;  %v155_v46 = vld [vmem:[#allocation5 + $0x2d0] sm:$0xff] }
  0xb2   :  { %486 = vadd.xlane.f32.xlu1 %v279_v47 }
  0xb3   :  { %v605_v54 = vmax.f32 %v604_v53, %v4388_v50  ;;  %484 = vadd.xlane.f32.xlu0 %v278_v48  ;;  %v4394_v57 = vpop.xlane.xlu1 %346  ;;  %v291_v53 = vmul.f32 %v4239_v1, %v156_v45 }
  0xb4   :  { %v4396_v58 = vpop.xlane.xlu0 %344 }
  0xb5   :  { %v606_v61 = vmax.f32 %v605_v54, %v4386_v49  ;;  %v613_v63 = vmax.f32 %v4396_v58, %v4394_v57  ;;  %v290_v54 = vmul.f32 %v4239_v1, %v155_v46 }
  0xb6   :  { %490 = vadd.xlane.f32.xlu1 %v281_v55 }
  0xb7   :  { %v607_v62 = vrot.slane %v606_v61, 4  ;;  %488 = vadd.xlane.f32.xlu0 %v280_v56  ;;  %v4403_v3 = vpop.xlane.xlu1 %350 }
  0xb8   :  { %v4405_v4 = vpop.xlane.xlu0 %348 }
  0xb9   :  { %v608_v8 = vmax.f32 %v606_v61, %v607_v62  ;;  %v614_v9 = vmax.f32 %v613_v63, %v4405_v4 }
  0xba   :  { %494 = vadd.xlane.f32.xlu1 %v283_v0  ;;  %v158_v0 = vld [vmem:[#allocation5 + $0x2e8] sm:$0xff] }
  0xbb   :  { %v609_v10 = vrot.slane %v608_v8, 2  ;;  %492 = vadd.xlane.f32.xlu0 %v282_v2  ;;  %v615_v11 = vmax.f32 %v614_v9, %v4403_v3  ;;  %v4411_v14 = vpop.xlane.xlu1 %354  ;;  %v157_v2 = vld [vmem:[#allocation5 + $0x2e0] sm:$0xff] }
  0xbc   :  { %v4413_v15 = vpop.xlane.xlu0 %352  ;;  %v292_v9 = vmul.f32 %v4239_v1, %v157_v2 }
  0xbd   :  { %v610_v19 = vmax.f32 %v608_v8, %v609_v10  ;;  %v616_v20 = vmax.f32 %v615_v11, %v4413_v15 }
  0xbe   :  { %498 = vadd.xlane.f32.xlu1 %v285_v12 }
  0xbf   :  { %v611_v21 = vrot.slane %v610_v19, 1  ;;  %496 = vadd.xlane.f32.xlu0 %v284_v13  ;;  %v617_v22 = vmax.f32 %v616_v20, %v4411_v14  ;;  %v4423_v29 = vpop.xlane.xlu1 %358 }
  0xc0   :  { %v4425_v30 = vpop.xlane.xlu0 %356 }
  0xc1   :  { %v612_v35 = vmax.f32 %v610_v19, %v611_v21  ;;  %v618_v37 = vmax.f32 %v617_v22, %v4425_v30  ;;  %v295_v22 = vmul.f32 %v4239_v1, %v160_v16  ;;  %v167_v16 = vld [vmem:[#allocation5 + $0x330] sm:$0xff] }
  0xc2   :  { %502 = vadd.xlane.f32.xlu1 %v287_v23  ;;  %v294_v23 = vmul.f32 %v4239_v1, %v159_v17 }
  0xc3   :  { %v4433_v40 = vmax.f32 %v4421_v28, %v612_v35  ;;  %v619_v43 = vmax.f32 %v618_v37, %v4423_v29  ;;  %500 = vadd.xlane.f32.xlu0 %v286_v24  ;;  %v4437_v47 = vpop.xlane.xlu1 %362  ;;  %v162_v37 = vld [vmem:[#allocation5 + $0x308] sm:$0xff] }
  0xc4   :  { %v4439_v48 = vpop.xlane.xlu0 %360 }
  0xc5   :  { %v891_v51 = vrot.slane %v4433_v40, %v4428_v34  ;;  %3398 = vst.msk [vmem:[#allocation2] sm:$0x1] %vm30_vm0, %v4433_v40  ;;  %v620_v52 = vrot.slane %v619_v43, 4  ;;  %v824_v46 = vsub.f32 %v4421_v28, %v4433_v40 }
  0xc6   :  { %506 = vadd.xlane.f32.xlu1 %v289_v39  ;;  %v4476_v39 = vld [vmem:[#allocation2 + $0x1] sm:$0x1] }
  0xc7   :  { %v968_v55 = vsub.f32 %v4365_v27, %v891_v51  ;;  %v969_v56 = vsub.f32 %v4371_v33, %v891_v51  ;;  %v970_v59 = vsub.f32 %v4363_v26, %v891_v51  ;;  %504 = vadd.xlane.f32.xlu0 %v288_v44  ;;  %v971_v60 = vsub.f32 %v4369_v32, %v891_v51  ;;  %v4452_v62 = vpop.xlane.xlu1 %366 }
  0xc8   :  { %v972_v61 = vsub.f32 %v4380_v42, %v891_v51  ;;  %v4454_v63 = vpop.xlane.xlu0 %364  ;;  %v626_v27 = vmax.f32 %v4439_v48, %v4437_v47  ;;  %v973_v33 = vsub.f32 %v4378_v41, %v891_v51  ;;  %v621_v8 = vmax.f32 %v619_v43, %v620_v52 }
  0xc9   :  { %v1096_v5 = vmul.f32 1.442695, %v968_v55  ;;  %v1098_v6 = vmul.f32 1.442695, %v969_v56  ;;  %v1100_v26 = vmul.f32 1.442695, %v970_v59  ;;  %v974_v32 = vsub.f32 %v4388_v50, %v891_v51 }
  0xca   :  { %v1102_v7 = vmul.f32 1.442695, %v971_v60  ;;  %510 = vadd.xlane.f32.xlu1 %v291_v53  ;;  %v293_v42 = vmul.f32 %v4239_v1, %v158_v0  ;;  %v1104_v10 = vmul.f32 1.442695, %v972_v61  ;;  %v622_v11 = vrot.slane %v621_v8, 2  ;;  %v164_v59 = vld [vmem:[#allocation5 + $0x318] sm:$0xff] }
  0xcb   :  { %3729 = vpow2.f32 %v1096_v5  ;;  %508 = vadd.xlane.f32.xlu0 %v290_v54  ;;  %v627_v12 = vmax.f32 %v626_v27, %v4454_v63  ;;  %v4463_v13 = vpop.xlane.xlu1 %370  ;;  %v975_v50 = vsub.f32 %v4386_v49, %v891_v51  ;;  %v1106_v19 = vmul.f32 1.442695, %v973_v33  ;;  %v163_v60 = vld [vmem:[#allocation5 + $0x310] sm:$0xff] }
  0xcc   :  { %3731 = vpow2.f32 %v1098_v6  ;;  %v4465_v41 = vpop.xlane.xlu0 %368  ;;  %v623_v20 = vmax.f32 %v621_v8, %v622_v11  ;;  %v1108_v24 = vmul.f32 1.442695, %v974_v32  ;;  %v297_v51 = vmul.f32 %v4239_v1, %v162_v37  ;;  %v168_v8 = vld [vmem:[#allocation5 + $0x338] sm:$0xff] }
  0xcd   :  { %3733 = vpow2.f32 %v1100_v26  ;;  %v628_v21 = vmax.f32 %v627_v12, %v4452_v62  ;;  %v1110_v43 = vmul.f32 1.442695, %v975_v50  ;;  %v296_v52 = vmul.f32 %v4239_v1, %v161_v38  ;;  %v166_v26 = vld [vmem:[#allocation5 + $0x328] sm:$0xff] }
  0xce   :  { %3735 = vpow2.f32 %v1102_v7  ;;  %514 = vadd.xlane.f32.xlu1 %v293_v42  ;;  %v624_v25 = vrot.slane %v623_v20, 1  ;;  %v840_v5 = vmul.f32 1.442695, %v824_v46  ;;  %v299_v27 = vmul.f32 %v4239_v1, %v164_v59  ;;  %v165_v7 = vld [vmem:[#allocation5 + $0x320] sm:$0xff] }
  0xcf   :  { %512 = vadd.xlane.f32.xlu0 %v292_v9  ;;  %3737 = vpow2.f32 %v1104_v10  ;;  %v629_v31 = vmax.f32 %v628_v21, %v4465_v41  ;;  %v4472_v35 = vpop.xlane.xlu1 %374  ;;  %v298_v33 = vmul.f32 %v4239_v1, %v163_v60 }
  0xd0   :  { %v4474_v49 = vpop.xlane.xlu0 %372  ;;  %3739 = vpow2.f32 %v1106_v19  ;;  %v625_v44 = vmax.f32 %v623_v20, %v624_v25 }
  0xd1   :  { %v630_v45 = vmax.f32 %v629_v31, %v4463_v13  ;;  %3741 = vpow2.f32 %v1108_v24  ;;  %v303_v24 = vmul.f32 %v4239_v1, %v168_v8 }
  0xd2   :  { %518 = vadd.xlane.f32.xlu1 %v295_v22  ;;  %v4484_v53 = vmax.f32 %v4476_v39, %v625_v44  ;;  %3743 = vpow2.f32 %v1110_v43  ;;  %v301_v22 = vmul.f32 %v4239_v1, %v166_v26 }
  0xd3   :  { %516 = vadd.xlane.f32.xlu0 %v294_v23  ;;  %v631_v54 = vmax.f32 %v630_v45, %v4474_v49  ;;  %v4487_v55 = vpop.xlane.xlu1 %378  ;;  %v300_v23 = vmul.f32 %v4239_v1, %v165_v7  ;;  %3745 = vpow2.f32 %v840_v5 }
  0xd4   :  { %v4489_v56 = vpop.xlane.xlu0 %376  ;;  %v4499_v0 = vrot.slane %v4484_v53, %v4428_v34  ;;  %3399 = vst.msk [vmem:[#allocation2 + $0x1] sm:$0x1] %vm30_vm0, %v4484_v53 }
  0xd5   :  { %v4491_v61 = vpop.eup %3729  ;;  %v632_v10 = vmax.f32 %v631_v54, %v4472_v35 }
  0xd6   :  { %v4493_v28 = vpop.eup %3731  ;;  %v1385_v40 = vsel %vm1384_vm1, %v4491_v61, 0.0  ;;  %522 = vadd.xlane.f32.xlu1 %v297_v51  ;;  %v976_v9 = vsub.f32 %v4396_v58, %v4499_v0  ;;  %v977_v50 = vsub.f32 %v4394_v57, %v4499_v0  ;;  %v978_v19 = vsub.f32 %v4405_v4, %v4499_v0 }
  0xd7   :  { %6444 = vst [vmem:[#allocation12_spill] sm:$0xff] %v4493_v28  ;;  %v4503_v2 = vpop.eup %3733  ;;  %v1386_v6 = vsel %vm1384_vm1, %v4493_v28, 0.0  ;;  %520 = vadd.xlane.f32.xlu0 %v296_v52  ;;  %v4514_v11 = vpop.xlane.xlu1 %382  ;;  %v979_v20 = vsub.f32 %v4403_v3, %v4499_v0  ;;  %v980_v57 = vsub.f32 %v4413_v15, %v4499_v0  ;;  %v302_v3 = vmul.f32 %v4239_v1, %v167_v16 }
  0xd8   :  { %v4509_v32 = vpop.eup %3735  ;;  %v1387_v42 = vadd.f32 %v1386_v6, %v1385_v40  ;;  %v4516_v12 = vpop.xlane.xlu0 %380  ;;  %v1388_v17 = vsel %vm1384_vm1, %v4503_v2, 0.0  ;;  %v981_v37 = vsub.f32 %v4411_v14, %v4499_v0  ;;  %v1112_v38 = vmul.f32 1.442695, %v976_v9  ;;  %v169_v9 = vld [vmem:[#allocation5 + $0x340] sm:$0xff] }
  0xd9   :  { %6445 = vst [vmem:[#allocation13_spill] sm:$0xff] %v4509_v32  ;;  %v4526_v58 = vpop.eup %3737  ;;  %v1390_v25 = vsel %vm1384_vm1, %v4509_v32, 0.0  ;;  %v1114_v43 = vmul.f32 1.442695, %v977_v50  ;;  %v1116_v15 = vmul.f32 1.442695, %v978_v19  ;;  %v982_v60 = vsub.f32 %v4425_v30, %v4499_v0 }
  0xda   :  { %v1389_v21 = vadd.f32 %v1388_v17, %v1387_v42  ;;  %526 = vadd.xlane.f32.xlu1 %v299_v27  ;;  %v4536_v4 = vpop.eup %3739  ;;  %v1392_v46 = vsel %vm1384_vm1, %v4526_v58, 0.0  ;;  %v1118_v51 = vmul.f32 1.442695, %v979_v20  ;;  %v633_v52 = vrot.slane %v632_v10, 4  ;;  %v170_v27 = vld [vmem:[#allocation5 + $0x348] sm:$0xff] }
  0xdb   :  { %524 = vadd.xlane.f32.xlu0 %v298_v33  ;;  %6446 = vst [vmem:[#allocation14_spill] sm:$0xff] %v4536_v4  ;;  %v4540_v44 = vpop.xlane.xlu1 %386  ;;  %v4546_v54 = vpop.eup %3741  ;;  %3747 = vpow2.f32 %v1112_v38  ;;  %v639_v14 = vmax.f32 %v4489_v56, %v4487_v55  ;;  %v1394_v40 = vsel %vm1384_vm1, %v4536_v4, 0.0  ;;  %v1120_v5 = vmul.f32 1.442695, %v980_v57 }
  0xdc   :  { %v1391_v31 = vadd.f32 %v1390_v25, %v1389_v21  ;;  %v4542_v45 = vpop.xlane.xlu0 %384  ;;  %3749 = vpow2.f32 %v1114_v43  ;;  %v634_v6 = vmax.f32 %v632_v10, %v633_v52  ;;  %v4554_v33 = vpop.eup %3743  ;;  %v1122_v7 = vmul.f32 1.442695, %v981_v37 }
  0xdd   :  { %6447 = vst [vmem:[#allocation15_spill] sm:$0xff] %v4554_v33  ;;  %3751 = vpow2.f32 %v1116_v15  ;;  %v640_v30 = vmax.f32 %v639_v14, %v4516_v12  ;;  %v1396_v16 = vsel %vm1384_vm1, %v4546_v54, 0.0  ;;  %v983_v10 = vsub.f32 %v4423_v29, %v4499_v0  ;;  %v174_v29 = vld [vmem:[#allocation5 + $0x368] sm:$0xff]  ;;  %v4575_v15 = vpop.eup %3745 }
  0xde   :  { %v1393_v59 = vadd.f32 %v1392_v46, %v1391_v31  ;;  %530 = vadd.xlane.f32.xlu1 %v301_v22  ;;  %3753 = vpow2.f32 %v1118_v51  ;;  %v635_v17 = vrot.slane %v634_v6, 2  ;;  %v1124_v19 = vmul.f32 1.442695, %v982_v60  ;;  %v172_v22 = vld [vmem:[#allocation5 + $0x358] sm:$0xff]  ;;  %v173_v46 = vld [vmem:[#allocation5 + $0x360] sm:$0xff]  ;;  %v175_v60 = vld [vmem:[#allocation5 + $0x370] sm:$0xff] }
  0xdf   :  { %528 = vadd.xlane.f32.xlu0 %v300_v23  ;;  %v4557_v8 = vpop.xlane.xlu1 %390  ;;  %v641_v20 = vmax.f32 %v640_v30, %v4514_v11  ;;  %v305_v21 = vmul.f32 %v4239_v1, %v170_v27  ;;  %v171_v23 = vld [vmem:[#allocation5 + $0x350] sm:$0xff]  ;;  %v1398_v25 = vsel %vm1384_vm1, %v4554_v33, 0.0  ;;  %3755 = vpow2.f32 %v1120_v5  ;;  %v178_v27 = vld [vmem:[#allocation5 + $0x388] sm:$0xff] }
  0xe0   :  { %v1395_v26 = vadd.f32 %v1394_v40, %v1393_v59  ;;  %v4559_v42 = vpop.xlane.xlu0 %388  ;;  %v636_v57 = vmax.f32 %v634_v6, %v635_v17  ;;  %v304_v31 = vmul.f32 %v4239_v1, %v169_v9  ;;  %3757 = vpow2.f32 %v1122_v7  ;;  %v176_v59 = vld [vmem:[#allocation5 + $0x378] sm:$0xff]  ;;  %v4584_v40 = vld [vmem:[#allocation2 + $0x2] sm:$0x1] }
  0xe1   :  { %v642_v37 = vmax.f32 %v641_v20, %v4542_v45  ;;  %v1126_v51 = vmul.f32 1.442695, %v983_v10  ;;  %3759 = vpow2.f32 %v1124_v19  ;;  %v177_v9 = vld [vmem:[#allocation5 + $0x380] sm:$0xff] }
  0xe2   :  { %v1397_v50 = vadd.f32 %v1396_v16, %v1395_v26  ;;  %534 = vadd.xlane.f32.xlu1 %v303_v24  ;;  %v637_v52 = vrot.slane %v636_v57, 1  ;;  %v4580_v24 = vld [vmem:[%s6352_s1] ss:$0 sm:$0xff]  ;;  %v825_v26 = vsub.f32 %v4476_v39, %v4484_v53  ;;  %s4205_s1 = smov [#allocation8]  }
  0xe3   :  { %532 = vadd.xlane.f32.xlu0 %v302_v3  ;;  %v4571_v38 = vpop.xlane.xlu1 %394  ;;  %v307_v1 = vmul.f32 %v4580_v24, %v172_v22  ;;  %v306_v3 = vmul.f32 %v4580_v24, %v171_v23  ;;  %v643_v5 = vmax.f32 %v642_v37, %v4540_v44  ;;  %v309_v6 = vmul.f32 %v4580_v24, %v174_v29  ;;  %s3706_s26 = sshll.u32 %s4205_s1, 4  ;;  %s3707_s26 = int_to_ptr.vmem [resolvable:$true] %s3706_s26 }
  0xe4   :  { %v1399_v0 = vadd.f32 %v1398_v25, %v1397_v50  ;;  %v4573_v43 = vpop.xlane.xlu0 %392  ;;  %v638_v7 = vmax.f32 %v636_v57, %v637_v52  ;;  %v308_v30 = vmul.f32 %v4580_v24, %v173_v46  ;;  %v4599_v20 = vmul.f32 %v4580_v24, %v176_v59  ;;  %v180_v25 = vld [vmem:[#allocation5 + $0x398] sm:$0xff]  ;;  %s4172_s27 = scalar_lea.vmem %s3707_s26, 256  ;;  %p4177_p9 = scmp.lt.s32.totalorder %s3707_s26, %s3707_s26 }
  0xe5   :  { %v4591_v16 = vpop.eup %3747  ;;  %v644_v17 = vmax.f32 %v643_v5, %v4559_v42  ;;  %v4602_v39 = vmul.f32 %v4580_v24, %v175_v60  ;;  %3761 = vpow2.f32 %v1126_v51  ;;  %v4612_v23 = vmul.f32 %v4580_v24, %v178_v27  ;;  %v179_v51 = vld [vmem:[#allocation5 + $0x390] sm:$0xff]  ;;  %p4173_p8 = scmp.ne.s32.totalorder %s3707_s26, %s4172_s27  ;;  %p4178_p10 = scmp.lt.s32.totalorder %s4172_s27, %s4172_s27 }
  0xe6   :  { %v1400_v14 = vrot.slane %v1399_v0, 4  ;;  %538 = vadd.xlane.f32.xlu1 %v305_v21  ;;  %v4604_v53 = vpop.eup %3749  ;;  %v1406_v21 = vsel %vm1384_vm1, %v4591_v16, 0.0  ;;  %v4609_v22 = vmax.f32 %v4584_v40, %v638_v7  ;;  %v652_v37 = vmax.f32 %v4573_v43, %v4571_v38 }
  0xe7   :  { %536 = vadd.xlane.f32.xlu0 %v304_v31  ;;  %v4594_v50 = vpop.xlane.xlu1 %398  ;;  %6448 = vst [vmem:[#allocation16_spill] sm:$0xff] %v4604_v53  ;;  %v4614_v57 = vpop.eup %3751  ;;  %v1352_v31 = vld [vmem:[#allocation3] sm:$0x1]  ;;  %v4621_v46 = vmul.f32 %v4580_v24, %v177_v9  ;;  %v842_v59 = vmul.f32 1.442695, %v825_v26  ;;  %v645_v5 = vmax.f32 %v644_v17, %v4557_v8  ;;  %p4179_p11 = por %p4178_p10, %p4177_p9 }
  0xe8   :  { %v1401_v10 = vadd.f32 %v1400_v14, %v1399_v0  ;;  %v4596_v19 = vpop.xlane.xlu0 %396  ;;  %v1407_v0 = vsel %vm1384_vm1, %v4604_v53, 0.0  ;;  %v4623_v52 = vpop.eup %3753  ;;  %v4627_v14 = vrot.slane %v4609_v22, %v4428_v34  ;;  %3400 = vst.msk [vmem:[#allocation2 + $0x2] sm:$0x1] %vm30_vm0, %v4609_v22  ;;  %v1409_v7 = vsel %vm1384_vm1, %v4614_v57, 0.0 }
  0xe9   :  { %6449 = vst [vmem:[#allocation17_spill] sm:$0xff] %v4623_v52  ;;  %v1408_v60 = vadd.f32 %v1407_v0, %v1406_v21  ;;  %v653_v9 = vmax.f32 %v652_v37, %v4596_v19  ;;  %v4640_v21 = vmul.f32 %v4580_v24, %v180_v25  ;;  %v4642_v0 = vpop.eup %3755  ;;  %v1368_v18 = vmul.f32 %v4575_v15, %v1352_v31  ;;  %p4180_p12 = pnand %p4179_p11, %p4173_p8 }
  0xea   :  { %v1402_v29 = vrot.slane %v1401_v10, 2  ;;  %542 = vadd.xlane.f32.xlu1 %v307_v1  ;;  %6450 = vst [vmem:[#allocation18_spill] sm:$0xff] %v4642_v0  ;;  %v984_v1 = vsub.f32 %v4439_v48, %v4627_v14  ;;  %v1411_v37 = vsel %vm1384_vm1, %v4623_v52, 0.0  ;;  %v985_v25 = vsub.f32 %v4437_v47, %v4627_v14 }
  0xeb   :  { %540 = vadd.xlane.f32.xlu0 %v306_v3  ;;  %v4635_v36 = vpop.xlane.xlu1 %402  ;;  %v1410_v17 = vadd.f32 %v1409_v7, %v1408_v60  ;;  %v4648_v3 = vmul.f32 %v4580_v24, %v179_v51  ;;  %v986_v53 = vsub.f32 %v4454_v63, %v4627_v14  ;;  %3763 = vpow2.f32 %v842_v59 }
  0xec   :  { %v1403_v27 = vadd.f32 %v1402_v29, %v1401_v10  ;;  %v4637_v26 = vpop.xlane.xlu0 %400  ;;  %v4650_v10 = vpop.eup %3757  ;;  %v987_v48 = vsub.f32 %v4452_v62, %v4627_v14  ;;  %v646_v60 = vrot.slane %v645_v5, 4  ;;  %v1413_v52 = vsel %vm1384_vm1, %v4642_v0, 0.0 }
  0xed   :  { %6451 = vst [vmem:[#allocation19_spill] sm:$0xff] %v4650_v10  ;;  %v1412_v31 = vadd.f32 %v1411_v37, %v1410_v17  ;;  %v4660_v51 = vpop.eup %3759  ;;  %v988_v47 = vsub.f32 %v4465_v41, %v4627_v14  ;;  %v654_v33 = vmax.f32 %v653_v9, %v4594_v50  ;;  %v1415_v62 = vsel %vm1384_vm1, %v4650_v10, 0.0 }
  0xee   :  { %v1404_v29 = vrot.slane %v1403_v27, 1  ;;  %546 = vadd.xlane.f32.xlu1 %v309_v6  ;;  %6452 = vst [vmem:[#allocation20_spill] sm:$0xff] %v4660_v51  ;;  %v989_v6 = vsub.f32 %v4463_v13, %v4627_v14  ;;  %v1132_v37 = vmul.f32 1.442695, %v986_v53  ;;  %v1134_v4 = vmul.f32 1.442695, %v987_v48 }
  0xef   :  { %544 = vadd.xlane.f32.xlu0 %v308_v30  ;;  %v4667_v63 = vpop.xlane.xlu1 %406  ;;  %v1414_v17 = vadd.f32 %v1413_v52, %v1412_v31  ;;  %v1128_v30 = vmul.f32 1.442695, %v984_v1  ;;  %v4675_v32 = vpop.eup %3761  ;;  %v1417_v9 = vsel %vm1384_vm1, %v4660_v51, 0.0  ;;  %v990_v52 = vsub.f32 %v4474_v49, %v4627_v14  ;;  %v182_v13 = vld [vmem:[#allocation5 + $0x3a8] sm:$0xff] }
  0xf0   :  { %v1405_v7 = vadd.f32 %v1404_v29, %v1403_v27  ;;  %v4669_v59 = vpop.xlane.xlu0 %404  ;;  %v1130_v29 = vmul.f32 1.442695, %v985_v25  ;;  %6453 = vst [vmem:[#allocation21_spill] sm:$0xff] %v4675_v32  ;;  %v1136_v53 = vmul.f32 1.442695, %v988_v47  ;;  %v647_v1 = vmax.f32 %v645_v5, %v646_v60  ;;  %v181_v60 = vld [vmem:[#allocation5 + $0x3a0] sm:$0xff] }
  0xf1   :  { %v1416_v41 = vadd.f32 %v1415_v62, %v1414_v17  ;;  %3765 = vpow2.f32 %v1128_v30  ;;  %v1138_v49 = vmul.f32 1.442695, %v989_v6  ;;  %v317_v17 = vmul.f32 %v4580_v24, %v182_v13  ;;  %v184_v47 = vld [vmem:[#allocation5 + $0x3b8] sm:$0xff] }
  0xf2   :  { %v1721_v27 = vadd.f32 %v1405_v7, %v1368_v18  ;;  %550 = vadd.xlane.f32.xlu1 %v4599_v20  ;;  %v991_v18 = vsub.f32 %v4472_v35, %v4627_v14  ;;  %3767 = vpow2.f32 %v1130_v29  ;;  %v655_v20 = vmax.f32 %v654_v33, %v4637_v26 }
  0xf3   :  { %548 = vadd.xlane.f32.xlu0 %v4602_v39  ;;  %v4686_v25 = vpop.xlane.xlu1 %410  ;;  %v1418_v48 = vadd.f32 %v1417_v9, %v1416_v41  ;;  %3769 = vpow2.f32 %v1132_v37  ;;  %v1419_v39 = vsel %vm1384_vm1, %v4675_v32, 0.0  ;;  %v648_v7 = vrot.slane %v647_v1, 2  ;;  %v183_v41 = vld [vmem:[#allocation5 + $0x3b0] sm:$0xff] }
  0xf4   :  { %1738 = vst.msk [vmem:[#allocation3] sm:$0x1] %vm30_vm0, %v1721_v27  ;;  %v4688_v31 = vpop.xlane.xlu0 %408  ;;  %3771 = vpow2.f32 %v1134_v4  ;;  %v656_v14 = vmax.f32 %v655_v20, %v4635_v36  ;;  %v1140_v33 = vmul.f32 1.442695, %v990_v52  ;;  %v1142_v62 = vmul.f32 1.442695, %v991_v18 }
  0xf5   :  { %v1420_v35 = vadd.f32 %v1419_v39, %v1418_v48  ;;  %v665_v5 = vmax.f32 %v4688_v31, %v4686_v25  ;;  %3773 = vpow2.f32 %v1136_v53  ;;  %v649_v6 = vmax.f32 %v647_v1, %v648_v7  ;;  %v4703_v27 = vpop.eup %3763  ;;  %v4711_v1 = vld [vmem:[#allocation2 + $0x3] sm:$0x1] }
  0xf6   :  { %554 = vadd.xlane.f32.xlu1 %v4612_v23  ;;  %3775 = vpow2.f32 %v1138_v49  ;;  %v657_v37 = vmax.f32 %v656_v14, %v4669_v59  ;;  %v826_v9 = vsub.f32 %v4584_v40, %v4609_v22  ;;  %v316_v13 = vmul.f32 %v4580_v24, %v181_v60  ;;  %v185_v20 = vld [vmem:[#allocation5 + $0x3c0] sm:$0xff]  ;;  %v188_v14 = vld [vmem:[#allocation5 + $0x3d8] sm:$0xff] }
  0xf7   :  { %552 = vadd.xlane.f32.xlu0 %v4621_v46  ;;  %v4699_v4 = vpop.xlane.xlu1 %414  ;;  %v1421_v29 = vrot.slane %v1420_v35, 4  ;;  %v186_v46 = vld [vmem:[#allocation5 + $0x3c8] sm:$0xff]  ;;  %v650_v52 = vrot.slane %v649_v6, 1  ;;  %v319_v18 = vmul.f32 %v4580_v24, %v184_v47  ;;  %3777 = vpow2.f32 %v1140_v33  ;;  %v187_v47 = vld [vmem:[#allocation5 + $0x3d0] sm:$0xff] }
  0xf8   :  { %v4701_v30 = vpop.xlane.xlu0 %412  ;;  %v658_v48 = vmax.f32 %v657_v37, %v4667_v63  ;;  %v318_v7 = vmul.f32 %v4580_v24, %v183_v41  ;;  %3779 = vpow2.f32 %v1142_v62  ;;  %v190_v33 = vld [vmem:[#allocation5 + $0x3e8] sm:$0xff]  ;;  %v844_v37 = vmul.f32 1.442695, %v826_v9 }
  0xf9   :  { %v666_v23 = vmax.f32 %v665_v5, %v4701_v30  ;;  %v1422_v53 = vadd.f32 %v1421_v29, %v1420_v35  ;;  %v651_v39 = vmax.f32 %v649_v6, %v650_v52  ;;  %v4723_v35 = vmul.f32 %v4580_v24, %v186_v46  ;;  %v1353_v29 = vld [vmem:[#allocation3 + $0x1] sm:$0x1] }
  0xfa   :  { %558 = vadd.xlane.f32.xlu1 %v4640_v21  ;;  %v320_v46 = vmul.f32 %v4580_v24, %v185_v20  ;;  %v4739_v10 = vmul.f32 %v4580_v24, %v188_v14  ;;  %3781 = vpow2.f32 %v844_v37 }
  0xfb   :  { %556 = vadd.xlane.f32.xlu0 %v4648_v3  ;;  %v667_v49 = vmax.f32 %v666_v23, %v4699_v4  ;;  %v4717_v40 = vpop.xlane.xlu1 %418  ;;  %v4725_v5 = vpop.eup %3765  ;;  %v1423_v21 = vrot.slane %v1422_v53, 2  ;;  %v659_v3 = vrot.slane %v658_v48, 4  ;;  %v811_v41 = vmax.f32 %v4711_v1, %v651_v39 }
  0xfc   :  { %v4719_v22 = vpop.xlane.xlu0 %416  ;;  %6454 = vst [vmem:[#allocation22_spill] sm:$0xff] %v4725_v5  ;;  %v4728_v6 = vpop.eup %3767  ;;  %v1427_v23 = vsel %vm1384_vm1, %v4725_v5, 0.0  ;;  %v322_v39 = vmul.f32 %v4580_v24, %v187_v47 }
  0xfd   :  { %v668_v60 = vmax.f32 %v667_v49, %v4719_v22  ;;  %6455 = vst [vmem:[#allocation23_spill] sm:$0xff] %v4728_v6  ;;  %v4734_v52 = vpop.eup %3769  ;;  %v1424_v32 = vadd.f32 %v1423_v21, %v1422_v53  ;;  %v1428_v62 = vsel %vm1384_vm1, %v4728_v6, 0.0  ;;  %v660_v49 = vmax.f32 %v658_v48, %v659_v3  ;;  %3401 = vst.msk [vmem:[#allocation2 + $0x3] sm:$0x1] %vm30_vm0, %v811_v41  ;;  %v189_v3 = vld [vmem:[#allocation5 + $0x3e0] sm:$0xff] }
  0xfe   :  { %6456 = vst [vmem:[#allocation24_spill] sm:$0xff] %v4734_v52  ;;  %562 = vadd.xlane.f32.xlu1 %v317_v17  ;;  %v4741_v9 = vpop.eup %3771  ;;  %v1429_v51 = vadd.f32 %v1428_v62, %v1427_v23  ;;  %v4744_v5 = vrot.slane %v811_v41, %v4428_v34  ;;  %v4753_v17 = vmul.f32 %v4580_v24, %v190_v33  ;;  %v1430_v14 = vsel %vm1384_vm1, %v4734_v52, 0.0 }
  0xff   :  { %560 = vadd.xlane.f32.xlu0 %v316_v13  ;;  %6457 = vst [vmem:[#allocation25_spill] sm:$0xff] %v4741_v9  ;;  %v4747_v20 = vpop.xlane.xlu1 %422  ;;  %v1369_v13 = vmul.f32 %v4703_v27, %v1353_v29  ;;  %v1425_v48 = vrot.slane %v1424_v32, 1  ;;  %v669_v21 = vmax.f32 %v668_v60, %v4717_v40  ;;  %v4759_v23 = vpop.eup %3773  ;;  %v1432_v6 = vsel %vm1384_vm1, %v4741_v9, 0.0 }
 0x100   :  { %v4749_v53 = vpop.xlane.xlu0 %420  ;;  %6458 = vst [vmem:[#allocation26_spill] sm:$0xff] %v4759_v23  ;;  %v1431_v62 = vadd.f32 %v1430_v14, %v1429_v51  ;;  %v992_v47 = vsub.f32 %v4489_v56, %v4744_v5  ;;  %v4765_v33 = vpop.eup %3775  ;;  %v993_v0 = vsub.f32 %v4487_v55, %v4744_v5  ;;  %v994_v60 = vsub.f32 %v4516_v12, %v4744_v5 }
 0x101   :  { %6459 = vst [vmem:[#allocation27_spill] sm:$0xff] %v4765_v33  ;;  %v1426_v29 = vadd.f32 %v1425_v48, %v1424_v32  ;;  %v661_v52 = vrot.slane %v660_v49, 2  ;;  %v827_v51 = vsub.f32 %v4711_v1, %v811_v41  ;;  %v995_v14 = vsub.f32 %v4514_v11, %v4744_v5 }
 0x102   :  { %566 = vadd.xlane.f32.xlu1 %v319_v18  ;;  %v1433_v37 = vadd.f32 %v1432_v6, %v1431_v62  ;;  %v324_v32 = vmul.f32 %v4580_v24, %v189_v3  ;;  %v1434_v55 = vsel %vm1384_vm1, %v4759_v23, 0.0  ;;  %v996_v12 = vsub.f32 %v4542_v45, %v4744_v5 }
 0x103   :  { %564 = vadd.xlane.f32.xlu0 %v318_v7  ;;  %v4774_v9 = vpop.xlane.xlu1 %426  ;;  %v1722_v48 = vadd.f32 %v1426_v29, %v1369_v13  ;;  %v670_v18 = vmax.f32 %v669_v21, %v4749_v53  ;;  %v4784_v7 = vpop.eup %3777  ;;  %v1436_v11 = vsel %vm1384_vm1, %v4765_v33, 0.0  ;;  %v997_v6 = vsub.f32 %v4540_v44, %v4744_v5 }
 0x104   :  { %v4776_v56 = vpop.xlane.xlu0 %424  ;;  %6460 = vst [vmem:[#allocation28_spill] sm:$0xff] %v4784_v7  ;;  %v1435_v1 = vadd.f32 %v1434_v55, %v1433_v37  ;;  %v1144_v41 = vmul.f32 1.442695, %v992_v47  ;;  %v4790_v3 = vpop.eup %3779  ;;  %v1146_v13 = vmul.f32 1.442695, %v993_v0  ;;  %v662_v45 = vmax.f32 %v660_v49, %v661_v52 }
 0x105   :  { %6461 = vst [vmem:[#allocation29_spill] sm:$0xff] %v4790_v3  ;;  %1739 = vst.msk [vmem:[#allocation3 + $0x1] sm:$0x1] %vm30_vm0, %v1722_v48  ;;  %v1148_v62 = vmul.f32 1.442695, %v994_v60  ;;  %v998_v55 = vsub.f32 %v4559_v42, %v4744_v5  ;;  %v1438_v47 = vsel %vm1384_vm1, %v4784_v7, 0.0  ;;  %v671_v42 = vmax.f32 %v670_v18, %v4747_v20 }
 0x106   :  { %v1150_v29 = vmul.f32 1.442695, %v995_v14  ;;  %570 = vadd.xlane.f32.xlu1 %v4723_v35  ;;  %v1437_v21 = vadd.f32 %v1436_v11, %v1435_v1  ;;  %v846_v37 = vmul.f32 1.442695, %v827_v51  ;;  %3783 = vpow2.f32 %v1144_v41  ;;  %v192_v48 = vld [vmem:[#allocation5 + $0x3f8] sm:$0xff] }
 0x107   :  { %568 = vadd.xlane.f32.xlu0 %v320_v46  ;;  %v4796_v33 = vpop.xlane.xlu1 %430  ;;  %3785 = vpow2.f32 %v1146_v13  ;;  %v1152_v0 = vmul.f32 1.442695, %v996_v12  ;;  %v663_v60 = vrot.slane %v662_v45, 1  ;;  %v1440_v35 = vsel %vm1384_vm1, %v4790_v3, 0.0  ;;  %v4804_v46 = vld [vmem:[#allocation2 + $0x4] sm:$0x1]  ;;  %v4810_v12 = vpop.eup %3781 }
 0x108   :  { %v4798_v44 = vpop.xlane.xlu0 %428  ;;  %v1439_v52 = vadd.f32 %v1438_v47, %v1437_v21  ;;  %3787 = vpow2.f32 %v1148_v62  ;;  %v999_v49 = vsub.f32 %v4557_v8, %v4744_v5  ;;  %v1154_v51 = vmul.f32 1.442695, %v997_v6  ;;  %v191_v62 = vld [vmem:[#allocation5 + $0x3f0] sm:$0xff] }
 0x109   :  { %3789 = vpow2.f32 %v1150_v29  ;;  %v664_v14 = vmax.f32 %v662_v45, %v663_v60  ;;  %v1156_v11 = vmul.f32 1.442695, %v998_v55  ;;  %v678_v41 = vmax.f32 %v4776_v56, %v4774_v9  ;;  %v1354_v8 = vld [vmem:[#allocation3 + $0x2] sm:$0x1] }
 0x10a   :  { %574 = vadd.xlane.f32.xlu1 %v4739_v10  ;;  %v1441_v1 = vadd.f32 %v1440_v35, %v1439_v52  ;;  %3791 = vpow2.f32 %v1152_v0  ;;  %v672_v10 = vrot.slane %v671_v42, 4  ;;  %v327_v29 = vmul.f32 %v4580_v24, %v192_v48 }
 0x10b   :  { %572 = vadd.xlane.f32.xlu0 %v322_v39  ;;  %v4814_v13 = vpop.xlane.xlu1 %434  ;;  %v4819_v5 = vmax.f32 %v4804_v46, %v664_v14  ;;  %3793 = vpow2.f32 %v846_v37  ;;  %v679_v6 = vmax.f32 %v678_v41, %v4798_v44  ;;  %v1158_v45 = vmul.f32 1.442695, %v999_v49 }
 0x10c   :  { %v4816_v18 = vpop.xlane.xlu0 %432  ;;  %v1442_v39 = vrot.slane %v1441_v1, 4  ;;  %3795 = vpow2.f32 %v1154_v51  ;;  %v326_v55 = vmul.f32 %v4580_v24, %v191_v62  ;;  %v1370_v37 = vmul.f32 %v4810_v12, %v1354_v8 }
 0x10d   :  { %v4825_v21 = vrot.slane %v4819_v5, %v4428_v34  ;;  %3402 = vst.msk [vmem:[#allocation2 + $0x4] sm:$0x1] %vm30_vm0, %v4819_v5  ;;  %3797 = vpow2.f32 %v1156_v11  ;;  %v680_v48 = vmax.f32 %v679_v6, %v4796_v33 }
 0x10e   :  { %578 = vadd.xlane.f32.xlu1 %v4753_v17  ;;  %v1443_v47 = vadd.f32 %v1442_v39, %v1441_v1  ;;  %3799 = vpow2.f32 %v1158_v45 }
 0x10f   :  { %576 = vadd.xlane.f32.xlu0 %v324_v32  ;;  %v4832_v0 = vpop.xlane.xlu1 %438  ;;  %v1000_v52 = vsub.f32 %v4573_v43, %v4825_v21  ;;  %v1001_v35 = vsub.f32 %v4571_v38, %v4825_v21  ;;  %v1002_v17 = vsub.f32 %v4596_v19, %v4825_v21  ;;  %v673_v32 = vmax.f32 %v671_v42, %v672_v10 }
 0x110   :  { %v4834_v60 = vpop.xlane.xlu0 %436  ;;  %v4842_v49 = vpop.eup %3783  ;;  %v1444_v24 = vrot.slane %v1443_v47, 2  ;;  %v1003_v51 = vsub.f32 %v4594_v50, %v4825_v21  ;;  %v1004_v14 = vsub.f32 %v4637_v26, %v4825_v21  ;;  %v1005_v43 = vsub.f32 %v4635_v36, %v4825_v21 }
 0x111   :  { %6462 = vst [vmem:[#allocation30_spill] sm:$0xff] %v4842_v49  ;;  %v4849_v1 = vpop.eup %3785  ;;  %v1448_v38 = vsel %vm1384_vm1, %v4842_v49, 0.0  ;;  %v1006_v19 = vsub.f32 %v4669_v59, %v4825_v21  ;;  %v1160_v11 = vmul.f32 1.442695, %v1000_v52  ;;  %v1162_v41 = vmul.f32 1.442695, %v1001_v35 }
 0x112   :  { %6463 = vst [vmem:[#allocation31_spill] sm:$0xff] %v4849_v1  ;;  %582 = vadd.xlane.f32.xlu1 %v327_v29  ;;  %v4857_v50 = vpop.eup %3787  ;;  %v1445_v42 = vadd.f32 %v1444_v24, %v1443_v47  ;;  %v1449_v26 = vsel %vm1384_vm1, %v4849_v1, 0.0  ;;  %v1164_v39 = vmul.f32 1.442695, %v1002_v17  ;;  %v1166_v6 = vmul.f32 1.442695, %v1003_v51 }
 0x113   :  { %580 = vadd.xlane.f32.xlu0 %v326_v55  ;;  %6464 = vst [vmem:[#allocation32_spill] sm:$0xff] %v4857_v50  ;;  %v4861_v62 = vpop.xlane.xlu1 %442  ;;  %v4865_v10 = vpop.eup %3789  ;;  %v1450_v36 = vadd.f32 %v1449_v26, %v1448_v38  ;;  %v674_v59 = vrot.slane %v673_v32, 2  ;;  %v1451_v45 = vsel %vm1384_vm1, %v4857_v50, 0.0  ;;  %3801 = vpow2.f32 %v1160_v11 }
 0x114   :  { %v4863_v8 = vpop.xlane.xlu0 %440  ;;  %6465 = vst [vmem:[#allocation33_spill] sm:$0xff] %v4865_v10  ;;  %v1446_v29 = vrot.slane %v1445_v42, 1  ;;  %v1168_v55 = vmul.f32 1.442695, %v1004_v14  ;;  %v4869_v47 = vpop.eup %3791  ;;  %3803 = vpow2.f32 %v1162_v41  ;;  %v1170_v35 = vmul.f32 1.442695, %v1005_v43 }
 0x115   :  { %6466 = vst [vmem:[#allocation34_spill] sm:$0xff] %v4869_v47  ;;  %v1452_v52 = vadd.f32 %v1451_v45, %v1450_v36  ;;  %v681_v24 = vmax.f32 %v680_v48, %v4816_v18  ;;  %v4872_v1 = vpop.eup %3793  ;;  %v1453_v17 = vsel %vm1384_vm1, %v4865_v10, 0.0  ;;  %3805 = vpow2.f32 %v1164_v39 }
 0x116   :  { %v1447_v3 = vadd.f32 %v1446_v29, %v1445_v42  ;;  %v1172_v51 = vmul.f32 1.442695, %v1006_v19  ;;  %v4880_v14 = vpop.eup %3795  ;;  %v828_v43 = vsub.f32 %v4804_v46, %v4819_v5  ;;  %v1007_v48 = vsub.f32 %v4667_v63, %v4825_v21 }
 0x117   :  { %v4876_v38 = vpop.xlane.xlu1 %446  ;;  %6467 = vst [vmem:[#allocation35_spill] sm:$0xff] %v4880_v14  ;;  %v1454_v11 = vadd.f32 %v1453_v17, %v1452_v52  ;;  %3807 = vpow2.f32 %v1166_v6  ;;  %v4886_v42 = vpop.eup %3797  ;;  %v1455_v19 = vsel %vm1384_vm1, %v4869_v47, 0.0  ;;  %v675_v36 = vmax.f32 %v673_v32, %v674_v59  ;;  %v589_v6 = vld [vmem:[#allocation2 + $0x5] sm:$0x1] }
 0x118   :  { %v4878_v26 = vpop.xlane.xlu0 %444  ;;  %6468 = vst [vmem:[#allocation36_spill] sm:$0xff] %v4886_v42  ;;  %v1723_v41 = vadd.f32 %v1447_v3, %v1370_v37  ;;  %3809 = vpow2.f32 %v1168_v55  ;;  %v682_v29 = vmax.f32 %v681_v24, %v4814_v13  ;;  %v691_v45 = vmax.f32 %v4863_v8, %v4861_v62  ;;  %v4900_v21 = vpop.eup %3799  ;;  %v1355_v24 = vld [vmem:[#allocation3 + $0x3] sm:$0x1] }
 0x119   :  { %v1456_v39 = vadd.f32 %v1455_v19, %v1454_v11  ;;  %3811 = vpow2.f32 %v1170_v35  ;;  %v1457_v63 = vsel %vm1384_vm1, %v4880_v14, 0.0  ;;  %v676_v46 = vrot.slane %v675_v36, 1  ;;  %6469 = vst [vmem:[#allocation37_spill] sm:$0xff] %v4900_v21 }
 0x11a   :  { %1740 = vst.msk [vmem:[#allocation3 + $0x2] sm:$0x1] %vm30_vm0, %v1723_v41  ;;  %3813 = vpow2.f32 %v1172_v51  ;;  %v1174_v32 = vmul.f32 1.442695, %v1007_v48  ;;  %v683_v59 = vmax.f32 %v682_v29, %v4834_v60  ;;  %v692_v55 = vmax.f32 %v691_v45, %v4878_v26 }
 0x11b   :  { %v4896_v3 = vpop.xlane.xlu1 %450  ;;  %v1458_v37 = vadd.f32 %v1457_v63, %v1456_v39  ;;  %v1459_v52 = vsel %vm1384_vm1, %v4886_v42, 0.0  ;;  %v677_v35 = vmax.f32 %v675_v36, %v676_v46  ;;  %v848_v51 = vmul.f32 1.442695, %v828_v43 }
 0x11c   :  { %v4898_v5 = vpop.xlane.xlu0 %448  ;;  %v684_v11 = vmax.f32 %v683_v59, %v4832_v0  ;;  %v693_v41 = vmax.f32 %v692_v55, %v4876_v38  ;;  %v1461_v48 = vsel %vm1384_vm1, %v4900_v21, 0.0  ;;  %3815 = vpow2.f32 %v1174_v32 }
 0x11d   :  { %v1460_v17 = vadd.f32 %v1459_v52, %v1458_v37  ;;  %v4908_v19 = vpop.eup %3801  ;;  %v813_v39 = vmax.f32 %v589_v6, %v677_v35  ;;  %v4923_v59 = vmul.f32 %v4872_v1, %v1355_v24  ;;  %3817 = vpow2.f32 %v848_v51 }
 0x11e   :  { %6470 = vst [vmem:[#allocation38_spill] sm:$0xff] %v4908_v19  ;;  %v4916_v63 = vpop.eup %3803  ;;  %v1469_v43 = vsel %vm1384_vm1, %v4908_v19, 0.0  ;;  %v685_v46 = vrot.slane %v684_v11, 4  ;;  %v694_v21 = vmax.f32 %v693_v41, %v4898_v5 }
 0x11f   :  { %v4912_v29 = vpop.xlane.xlu1 %454  ;;  %6471 = vst [vmem:[#allocation39_spill] sm:$0xff] %v4916_v63  ;;  %v1462_v36 = vadd.f32 %v1461_v48, %v1460_v17  ;;  %v4920_v37 = vpop.eup %3805  ;;  %v1470_v55 = vsel %vm1384_vm1, %v4916_v63, 0.0  ;;  %v829_v52 = vsub.f32 %v589_v6, %v813_v39  ;;  %v4928_v35 = vrot.slane %v813_v39, %v4428_v34  ;;  %3403 = vst.msk [vmem:[#allocation2 + $0x5] sm:$0x1] %vm30_vm0, %v813_v39 }
 0x120   :  { %v4914_v45 = vpop.xlane.xlu0 %452  ;;  %6472 = vst [vmem:[#allocation40_spill] sm:$0xff] %v4920_v37  ;;  %v1471_v48 = vadd.f32 %v1470_v55, %v1469_v43  ;;  %v1472_v24 = vsel %vm1384_vm1, %v4920_v37, 0.0  ;;  %v686_v63 = vmax.f32 %v684_v11, %v685_v46 }
 0x121   :  { %v4931_v17 = vpop.eup %3807  ;;  %v1463_v32 = vrot.slane %v1462_v36, 4  ;;  %v850_v10 = vmul.f32 1.442695, %v829_v52  ;;  %v1008_v6 = vsub.f32 %v4688_v31, %v4928_v35  ;;  %v1009_v55 = vsub.f32 %v4686_v25, %v4928_v35 }
 0x122   :  { %6473 = vst [vmem:[#allocation41_spill] sm:$0xff] %v4931_v17  ;;  %v4934_v14 = vpop.eup %3809  ;;  %v1473_v41 = vadd.f32 %v1472_v24, %v1471_v48  ;;  %v1010_v52 = vsub.f32 %v4701_v30, %v4928_v35  ;;  %v1474_v31 = vsel %vm1384_vm1, %v4931_v17, 0.0  ;;  %v1013_v30 = vsub.f32 %v4717_v40, %v4928_v35 }
 0x123   :  { %6474 = vst [vmem:[#allocation42_spill] sm:$0xff] %v4934_v14  ;;  %v4940_v19 = vpop.xlane.xlu1 %458  ;;  %1767 = vperm.xlu1 %3728, %v4703_v27   ;;  %v4945_v51 = vpop.eup %3811  ;;  %v1464_v43 = vadd.f32 %v1463_v32, %v1462_v36  ;;  %v1476_v11 = vsel %vm1384_vm1, %v4934_v14, 0.0  ;;  %v1011_v27 = vsub.f32 %v4699_v4, %v4928_v35  ;;  %v1012_v36 = vsub.f32 %v4719_v22, %v4928_v35 }
 0x124   :  { %v4942_v39 = vpop.xlane.xlu0 %456  ;;  %6475 = vst [vmem:[#allocation43_spill] sm:$0xff] %v4945_v51  ;;  %v4951_v37 = vpop.eup %3813  ;;  %v1475_v32 = vadd.f32 %v1474_v31, %v1473_v41  ;;  %v1478_v25 = vsel %vm1384_vm1, %v4945_v51, 0.0  ;;  %3819 = vpow2.f32 %v850_v10  ;;  %v1014_v24 = vsub.f32 %v4749_v53, %v4928_v35 }
 0x125   :  { %6476 = vst [vmem:[#allocation44_spill] sm:$0xff] %v4951_v37  ;;  %v1465_v46 = vrot.slane %v1464_v43, 2  ;;  %v1480_v48 = vsel %vm1384_vm1, %v4951_v37, 0.0  ;;  %v1176_v17 = vmul.f32 1.442695, %v1008_v6  ;;  %v1015_v40 = vsub.f32 %v4747_v20, %v4928_v35 }
 0x126   :  { %v1477_v41 = vadd.f32 %v1476_v11, %v1475_v32  ;;  %v1178_v31 = vmul.f32 1.442695, %v1009_v55  ;;  %v1180_v51 = vmul.f32 1.442695, %v1010_v52  ;;  %v1182_v10 = vmul.f32 1.442695, %v1011_v27  ;;  %v4977_v53 = vpop.eup %3815 }
 0x127   :  { %v4969_v4 = vpop.xlane.xlu1 %462  ;;  %1776 = vperm.xlu1 %3728, %v4810_v12   ;;  %v1466_v22 = vadd.f32 %v1465_v46, %v1464_v43  ;;  %3821 = vpow2.f32 %v1176_v17  ;;  %v1184_v37 = vmul.f32 1.442695, %v1012_v36  ;;  %6477 = vst [vmem:[#allocation45_spill] sm:$0xff] %v4977_v53  ;;  %v1186_v47 = vmul.f32 1.442695, %v1013_v30  ;;  %v3818_v20 = vpop.eup %3817 }
 0x128   :  { %v4971_v14 = vpop.xlane.xlu0 %460  ;;  %v1479_v42 = vadd.f32 %v1478_v25, %v1477_v41  ;;  %3823 = vpow2.f32 %v1178_v31  ;;  %v1188_v12 = vmul.f32 1.442695, %v1014_v24  ;;  %v687_v43 = vrot.slane %v686_v63, 2 }
 0x129   :  { %1758 = vperm.xlu0 %3727, %v4575_v15   ;;  %v1467_v6 = vrot.slane %v1466_v22, 1  ;;  %3825 = vpow2.f32 %v1180_v51  ;;  %v695_v55 = vmax.f32 %v694_v21, %v4896_v3  ;;  %v704_v11 = vmax.f32 %v4942_v39, %v4940_v19 }
 0x12a   :  { %v1481_v17 = vadd.f32 %v1480_v48, %v1479_v42  ;;  %3827 = vpow2.f32 %v1182_v10  ;;  %v1482_v51 = vsel %vm1384_vm1, %v4977_v53, 0.0  ;;  %v688_v27 = vmax.f32 %v686_v63, %v687_v43 }
 0x12b   :  { %v4980_v52 = vpop.xlane.xlu1 %466  ;;  %1785 = vperm.xlu1 %3728, %v4872_v1   ;;  %v1468_v35 = vadd.f32 %v1467_v6, %v1466_v22  ;;  %3829 = vpow2.f32 %v1184_v37  ;;  %v696_v21 = vmax.f32 %v695_v55, %v4914_v45  ;;  %v705_v1 = vmax.f32 %v704_v11, %v4971_v14  ;;  %v590_v37 = vld [vmem:[#allocation2 + $0x6] sm:$0x1]  ;;  %v1356_v22 = vld [vmem:[#allocation3 + $0x4] sm:$0x1] }
 0x12c   :  { %v4982_v15 = vpop.xlane.xlu0 %464  ;;  %v1483_v46 = vadd.f32 %v1482_v51, %v1481_v17  ;;  %3831 = vpow2.f32 %v1186_v47  ;;  %v1190_v32 = vmul.f32 1.442695, %v1015_v40  ;;  %v689_v25 = vrot.slane %v688_v27, 1 }
 0x12d   :  { %v1724_v36 = vadd.f32 %v1468_v35, %v4923_v59  ;;  %v697_v42 = vmax.f32 %v696_v21, %v4912_v29  ;;  %3833 = vpow2.f32 %v1188_v12  ;;  %v706_v59 = vmax.f32 %v705_v1, %v4969_v4 }
 0x12e   :  { %v1484_v63 = vrot.slane %v1483_v46, 4  ;;  %v4999_v24 = vpop.eup %3819  ;;  %v690_v47 = vmax.f32 %v688_v27, %v689_v25  ;;  %3835 = vpow2.f32 %v1190_v32  ;;  %v1372_v51 = vmul.f32 %v3818_v20, %v1356_v22 }
 0x12f   :  { %v4993_v30 = vpop.xlane.xlu1 %470  ;;  %1794 = vperm.xlu1 %3728, %v3818_v20   ;;  %1741 = vst.msk [vmem:[#allocation3 + $0x3] sm:$0x1] %vm30_vm0, %v1724_v36  ;;  %v698_v31 = vrot.slane %v697_v42, 4  ;;  %v707_v40 = vmax.f32 %v706_v59, %v4982_v15 }
 0x130   :  { %v4995_v48 = vpop.xlane.xlu0 %468  ;;  %v1485_v41 = vadd.f32 %v1484_v63, %v1483_v46  ;;  %v814_v6 = vmax.f32 %v590_v37, %v690_v47 }
 0x131   :  { %v5002_v10 = vpop.eup %3821  ;;  %v699_v25 = vmax.f32 %v697_v42, %v698_v31  ;;  %v708_v63 = vmax.f32 %v707_v40, %v4980_v52 }
 0x132   :  { %6478 = vst [vmem:[#allocation46_spill] sm:$0xff] %v5002_v10  ;;  %v5009_v12 = vpop.eup %3823  ;;  %v1486_v35 = vrot.slane %v1485_v41, 2  ;;  %v1490_v17 = vsel %vm1384_vm1, %v5002_v10, 0.0  ;;  %v830_v21 = vsub.f32 %v590_v37, %v814_v6  ;;  %v5018_v36 = vrot.slane %v814_v6, %v4428_v34  ;;  %3404 = vst.msk [vmem:[#allocation2 + $0x6] sm:$0x1] %vm30_vm0, %v814_v6 }
 0x133   :  { %v5004_v43 = vpop.xlane.xlu1 %474  ;;  %1803 = vperm.xlu1 %3728, %v4999_v24   ;;  %6479 = vst [vmem:[#allocation47_spill] sm:$0xff] %v5009_v12  ;;  %v5013_v11 = vpop.eup %3825  ;;  %v1491_v27 = vsel %vm1384_vm1, %v5009_v12, 0.0 }
 0x134   :  { %v5006_v55 = vpop.xlane.xlu0 %472  ;;  %6480 = vst [vmem:[#allocation48_spill] sm:$0xff] %v5013_v11  ;;  %v5021_v46 = vpop.eup %3827  ;;  %v1487_v1 = vadd.f32 %v1486_v35, %v1485_v41  ;;  %v1492_v32 = vadd.f32 %v1491_v27, %v1490_v17  ;;  %v1493_v20 = vsel %vm1384_vm1, %v5013_v11, 0.0  ;;  %v852_v47 = vmul.f32 1.442695, %v830_v21 }
 0x135   :  { %6481 = vst [vmem:[#allocation49_spill] sm:$0xff] %v5021_v46  ;;  %v5024_v59 = vpop.eup %3829  ;;  %v1016_v37 = vsub.f32 %v4776_v56, %v5018_v36  ;;  %v717_v22 = vmax.f32 %v5006_v55, %v5004_v43  ;;  %v1017_v40 = vsub.f32 %v4774_v9, %v5018_v36  ;;  %v1018_v35 = vsub.f32 %v4798_v44, %v5018_v36 }
 0x136   :  { %6482 = vst [vmem:[#allocation50_spill] sm:$0xff] %v5024_v59  ;;  %v5036_v41 = vpop.eup %3831  ;;  %v1488_v42 = vrot.slane %v1487_v1, 1  ;;  %v1494_v31 = vadd.f32 %v1493_v20, %v1492_v32  ;;  %v1495_v56 = vsel %vm1384_vm1, %v5021_v46, 0.0  ;;  %3837 = vpow2.f32 %v852_v47 }
 0x137   :  { %v5032_v6 = vpop.xlane.xlu1 %478  ;;  %6483 = vst [vmem:[#allocation51_spill] sm:$0xff] %v5036_v41  ;;  %v1019_v17 = vsub.f32 %v4796_v33, %v5018_v36  ;;  %v1020_v27 = vsub.f32 %v4816_v18, %v5018_v36  ;;  %v5048_v21 = vpop.eup %3833  ;;  %v1021_v9 = vsub.f32 %v4814_v13, %v5018_v36  ;;  %v700_v20 = vrot.slane %v699_v25, 2 }
 0x138   :  { %v5034_v12 = vpop.xlane.xlu0 %476  ;;  %6484 = vst [vmem:[#allocation52_spill] sm:$0xff] %v5048_v21  ;;  %v1489_v53 = vadd.f32 %v1488_v42, %v1487_v1  ;;  %v1496_v32 = vadd.f32 %v1495_v56, %v1494_v31  ;;  %v1497_v44 = vsel %vm1384_vm1, %v5024_v59, 0.0  ;;  %v1499_v47 = vsel %vm1384_vm1, %v5036_v41, 0.0  ;;  %v5061_v56 = vpop.eup %3835 }
 0x139   :  { %v1192_v46 = vmul.f32 1.442695, %v1016_v37  ;;  %v709_v33 = vmax.f32 %v708_v63, %v4995_v48  ;;  %v1194_v42 = vmul.f32 1.442695, %v1017_v40  ;;  %v1196_v31 = vmul.f32 1.442695, %v1018_v35 }
 0x13a   :  { %v1725_v10 = vadd.f32 %v1489_v53, %v1372_v51  ;;  %v1498_v1 = vadd.f32 %v1497_v44, %v1496_v32  ;;  %6485 = vst [vmem:[#allocation53_spill] sm:$0xff] %v5061_v56  ;;  %v1501_v13 = vsel %vm1384_vm1, %v5048_v21, 0.0  ;;  %v1198_v59 = vmul.f32 1.442695, %v1019_v17 }
 0x13b   :  { %v5057_v11 = vpop.xlane.xlu1 %482  ;;  %3839 = vpow2.f32 %v1192_v46  ;;  %v1200_v50 = vmul.f32 1.442695, %v1020_v27  ;;  %v1022_v63 = vsub.f32 %v4834_v60, %v5018_v36  ;;  %v1202_v41 = vmul.f32 1.442695, %v1021_v9 }
 0x13c   :  { %v5059_v18 = vpop.xlane.xlu0 %480  ;;  %1742 = vst.msk [vmem:[#allocation3 + $0x4] sm:$0x1] %vm30_vm0, %v1725_v10  ;;  %v1500_v37 = vadd.f32 %v1499_v47, %v1498_v1  ;;  %3841 = vpow2.f32 %v1194_v42  ;;  %v701_v53 = vmax.f32 %v699_v25, %v700_v20  ;;  %v710_v51 = vmax.f32 %v709_v33, %v4993_v30  ;;  %v591_v20 = vld [vmem:[#allocation2 + $0x7] sm:$0x1] }
 0x13d   :  { %3843 = vpow2.f32 %v1196_v31  ;;  %v718_v40 = vmax.f32 %v717_v22, %v5034_v12  ;;  %v1503_v10 = vsel %vm1384_vm1, %v5061_v56, 0.0  ;;  %v1023_v17 = vsub.f32 %v4832_v0, %v5018_v36  ;;  %v1357_v0 = vld [vmem:[#allocation3 + $0x5] sm:$0x1] }
 0x13e   :  { %v1502_v46 = vadd.f32 %v1501_v13, %v1500_v37  ;;  %3845 = vpow2.f32 %v1198_v59  ;;  %v702_v60 = vrot.slane %v701_v53, 1  ;;  %v711_v27 = vrot.slane %v710_v51, 4 }
 0x13f   :  { %v5070_v35 = vpop.xlane.xlu1 %486  ;;  %3847 = vpow2.f32 %v1200_v50  ;;  %v719_v25 = vmax.f32 %v718_v40, %v5032_v6  ;;  %v1204_v22 = vmul.f32 1.442695, %v1022_v63  ;;  %v1206_v36 = vmul.f32 1.442695, %v1023_v17 }
 0x140   :  { %v5072_v32 = vpop.xlane.xlu0 %484  ;;  %v1504_v9 = vadd.f32 %v1503_v10, %v1502_v46  ;;  %3849 = vpow2.f32 %v1202_v41  ;;  %v5079_v44 = vpop.eup %3837  ;;  %v703_v47 = vmax.f32 %v701_v53, %v702_v60  ;;  %v712_v33 = vmax.f32 %v710_v51, %v711_v27 }
 0x141   :  { %v720_v1 = vmax.f32 %v719_v25, %v5059_v18  ;;  %1812 = vperm.xlu1 %3728, %v5079_v44   ;;  %3851 = vpow2.f32 %v1204_v22  ;;  %v1373_v53 = vmul.f32 %v4999_v24, %v1357_v0 }
 0x142   :  { %v1505_v50 = vrot.slane %v1504_v9, 4  ;;  %v815_v59 = vmax.f32 %v591_v20, %v703_v47  ;;  %v713_v13 = vrot.slane %v712_v33, 2  ;;  %3853 = vpow2.f32 %v1206_v36 }
 0x143   :  { %v5082_v42 = vpop.xlane.xlu1 %490  ;;  %v721_v37 = vmax.f32 %v720_v1, %v5057_v11 }
 0x144   :  { %v5084_v31 = vpop.xlane.xlu0 %488  ;;  %v1506_v41 = vadd.f32 %v1505_v50, %v1504_v9  ;;  %v831_v51 = vsub.f32 %v591_v20, %v815_v59  ;;  %v5092_v40 = vrot.slane %v815_v59, %v4428_v34  ;;  %3405 = vst.msk [vmem:[#allocation2 + $0x7] sm:$0x1] %vm30_vm0, %v815_v59  ;;  %v714_v47 = vmax.f32 %v712_v33, %v713_v13 }
 0x145   :  { %v5088_v63 = vpop.eup %3839  ;;  %v730_v24 = vmax.f32 %v5084_v31, %v5082_v42  ;;  %v722_v59 = vmax.f32 %v721_v37, %v5072_v32 }
 0x146   :  { %6486 = vst [vmem:[#allocation54_spill] sm:$0xff] %v5088_v63  ;;  %v5099_v17 = vpop.eup %3841  ;;  %v1507_v60 = vrot.slane %v1506_v41, 2  ;;  %v1511_v27 = vsel %vm1384_vm1, %v5088_v63, 0.0  ;;  %v854_v22 = vmul.f32 1.442695, %v831_v51  ;;  %v1024_v20 = vsub.f32 %v4863_v8, %v5092_v40 }
 0x147   :  { %v5095_v46 = vpop.xlane.xlu1 %494  ;;  %6487 = vst [vmem:[#allocation55_spill] sm:$0xff] %v5099_v17  ;;  %v5105_v25 = vpop.eup %3843  ;;  %v1512_v9 = vsel %vm1384_vm1, %v5099_v17, 0.0  ;;  %v1025_v36 = vsub.f32 %v4861_v62, %v5092_v40  ;;  %v1026_v51 = vsub.f32 %v4878_v26, %v5092_v40  ;;  %v1027_v8 = vsub.f32 %v4876_v38, %v5092_v40 }
 0x148   :  { %v5097_v10 = vpop.xlane.xlu0 %492  ;;  %6488 = vst [vmem:[#allocation56_spill] sm:$0xff] %v5105_v25  ;;  %v5111_v1 = vpop.eup %3845  ;;  %v1508_v0 = vadd.f32 %v1507_v60, %v1506_v41  ;;  %v1513_v50 = vadd.f32 %v1512_v9, %v1511_v27  ;;  %v1514_v63 = vsel %vm1384_vm1, %v5105_v25, 0.0  ;;  %3855 = vpow2.f32 %v854_v22 }
 0x149   :  { %6489 = vst [vmem:[#allocation57_spill] sm:$0xff] %v5111_v1  ;;  %v5116_v56 = vpop.eup %3847  ;;  %v1028_v60 = vsub.f32 %v4898_v5, %v5092_v40  ;;  %v731_v27 = vmax.f32 %v730_v24, %v5097_v10  ;;  %v1516_v9 = vsel %vm1384_vm1, %v5111_v1, 0.0  ;;  %v1029_v26 = vsub.f32 %v4896_v3, %v5092_v40 }
 0x14a   :  { %6490 = vst [vmem:[#allocation58_spill] sm:$0xff] %v5116_v56  ;;  %v5128_v41 = vpop.eup %3849  ;;  %v1509_v62 = vrot.slane %v1508_v0, 1  ;;  %v1515_v37 = vadd.f32 %v1514_v63, %v1513_v50  ;;  %v1030_v38 = vsub.f32 %v4914_v45, %v5092_v40  ;;  %v1208_v22 = vmul.f32 1.442695, %v1024_v20 }
 0x14b   :  { %v5124_v33 = vpop.xlane.xlu1 %498  ;;  %6491 = vst [vmem:[#allocation59_spill] sm:$0xff] %v5128_v41  ;;  %v1518_v63 = vsel %vm1384_vm1, %v5116_v56, 0.0  ;;  %v1210_v50 = vmul.f32 1.442695, %v1025_v36  ;;  %v1520_v5 = vsel %vm1384_vm1, %v5128_v41, 0.0  ;;  %v5147_v3 = vpop.eup %3851 }
 0x14c   :  { %v5126_v13 = vpop.xlane.xlu0 %496  ;;  %v1510_v17 = vadd.f32 %v1509_v62, %v1508_v0  ;;  %v1517_v25 = vadd.f32 %v1516_v9, %v1515_v37  ;;  %3857 = vpow2.f32 %v1208_v22  ;;  %v1212_v24 = vmul.f32 1.442695, %v1026_v51  ;;  %6492 = vst [vmem:[#allocation60_spill] sm:$0xff] %v5147_v3  ;;  %v5151_v9 = vpop.eup %3853 }
 0x14d   :  { %v1214_v21 = vmul.f32 1.442695, %v1027_v8  ;;  %3859 = vpow2.f32 %v1210_v50  ;;  %v1216_v0 = vmul.f32 1.442695, %v1028_v60  ;;  %v1031_v62 = vsub.f32 %v4912_v29, %v5092_v40  ;;  %6493 = vst [vmem:[#allocation61_spill] sm:$0xff] %v5151_v9 }
 0x14e   :  { %v1726_v45 = vadd.f32 %v1510_v17, %v1373_v53  ;;  %v1519_v20 = vadd.f32 %v1518_v63, %v1517_v25  ;;  %3861 = vpow2.f32 %v1212_v24  ;;  %v1218_v36 = vmul.f32 1.442695, %v1029_v26  ;;  %v592_v17 = vld [vmem:[#allocation2 + $0x8] sm:$0x1] }
 0x14f   :  { %v5143_v1 = vpop.xlane.xlu1 %502  ;;  %v1220_v37 = vmul.f32 1.442695, %v1030_v38  ;;  %3863 = vpow2.f32 %v1214_v21  ;;  %v715_v8 = vrot.slane %v714_v47, 1  ;;  %v723_v22 = vmax.f32 %v722_v59, %v5070_v35 }
 0x150   :  { %v5145_v49 = vpop.xlane.xlu0 %500  ;;  %1743 = vst.msk [vmem:[#allocation3 + $0x5] sm:$0x1] %vm30_vm0, %v1726_v45  ;;  %v1521_v51 = vadd.f32 %v1520_v5, %v1519_v20  ;;  %v1522_v53 = vsel %vm1384_vm1, %v5147_v3, 0.0  ;;  %3865 = vpow2.f32 %v1216_v0  ;;  %v732_v25 = vmax.f32 %v731_v27, %v5095_v46  ;;  %v1358_v5 = vld [vmem:[#allocation3 + $0x6] sm:$0x1] }
 0x151   :  { %v716_v26 = vmax.f32 %v714_v47, %v715_v8  ;;  %v724_v38 = vrot.slane %v723_v22, 4  ;;  %v1524_v21 = vsel %vm1384_vm1, %v5151_v9, 0.0  ;;  %3867 = vpow2.f32 %v1218_v36 }
 0x152   :  { %v1523_v60 = vadd.f32 %v1522_v53, %v1521_v51  ;;  %v5162_v63 = vpop.eup %3855  ;;  %v1222_v59 = vmul.f32 1.442695, %v1031_v62  ;;  %v733_v50 = vmax.f32 %v732_v25, %v5126_v13  ;;  %3869 = vpow2.f32 %v1220_v37 }
 0x153   :  { %v5158_v29 = vpop.xlane.xlu1 %506  ;;  %v816_v27 = vmax.f32 %v592_v17, %v716_v26  ;;  %1821 = vperm.xlu1 %3728, %v5162_v63   ;;  %v725_v45 = vmax.f32 %v723_v22, %v724_v38  ;;  %v1374_v37 = vmul.f32 %v5079_v44, %v1358_v5 }
 0x154   :  { %v5160_v40 = vpop.xlane.xlu0 %504  ;;  %v1525_v24 = vadd.f32 %v1524_v21, %v1523_v60  ;;  %3871 = vpow2.f32 %v1222_v59  ;;  %v734_v22 = vmax.f32 %v733_v50, %v5124_v33 }
 0x155   :  { %v832_v51 = vsub.f32 %v592_v17, %v816_v27  ;;  %v5173_v8 = vrot.slane %v816_v27, %v4428_v34  ;;  %3406 = vst.msk [vmem:[#allocation2 + $0x8] sm:$0x1] %vm30_vm0, %v816_v27  ;;  %v743_v62 = vmax.f32 %v5160_v40, %v5158_v29  ;;  %v726_v50 = vrot.slane %v725_v45, 2 }
 0x156   :  { %v1526_v0 = vrot.slane %v1525_v24, 4  ;;  %v5178_v36 = vpop.eup %3857  ;;  %v735_v41 = vmax.f32 %v734_v22, %v5145_v49 }
 0x157   :  { %v5168_v20 = vpop.xlane.xlu1 %510  ;;  %6494 = vst [vmem:[#allocation62_spill] sm:$0xff] %v5178_v36  ;;  %v5182_v53 = vpop.eup %3859  ;;  %v1532_v17 = vsel %vm1384_vm1, %v5178_v36, 0.0  ;;  %v856_v60 = vmul.f32 1.442695, %v832_v51  ;;  %v1032_v44 = vsub.f32 %v4942_v39, %v5173_v8  ;;  %v1033_v59 = vsub.f32 %v4940_v19, %v5173_v8 }
 0x158   :  { %v5170_v47 = vpop.xlane.xlu0 %508  ;;  %6495 = vst [vmem:[#allocation63_spill] sm:$0xff] %v5182_v53  ;;  %v1527_v25 = vadd.f32 %v1526_v0, %v1525_v24  ;;  %v5189_v38 = vpop.eup %3861  ;;  %v1533_v21 = vsel %vm1384_vm1, %v5182_v53, 0.0  ;;  %v1035_v19 = vsub.f32 %v4969_v4, %v5173_v8  ;;  %v1036_v9 = vsub.f32 %v4982_v15, %v5173_v8 }
 0x159   :  { %v5187_v26 = vmax.f32 %v743_v62, %v5170_v47  ;;  %6496 = vst [vmem:[#allocation64_spill] sm:$0xff] %v5189_v38  ;;  %v5201_v27 = vpop.eup %3863  ;;  %v1534_v51 = vadd.f32 %v1533_v21, %v1532_v17  ;;  %3873 = vpow2.f32 %v856_v60  ;;  %v1034_v62 = vsub.f32 %v4971_v14, %v5173_v8 }
 0x15a   :  { %6497 = vst [vmem:[#allocation65_spill] sm:$0xff] %v5201_v27  ;;  %v1528_v0 = vrot.slane %v1527_v25, 2  ;;  %v5205_v53 = vpop.eup %3865  ;;  %v1535_v39 = vsel %vm1384_vm1, %v5189_v38, 0.0  ;;  %v1537_v17 = vsel %vm1384_vm1, %v5201_v27, 0.0  ;;  %v1037_v14 = vsub.f32 %v4980_v52, %v5173_v8 }
 0x15b   :  { %v5197_v5 = vpop.xlane.xlu1 %514  ;;  %6498 = vst [vmem:[#allocation66_spill] sm:$0xff] %v5205_v53  ;;  %v1536_v3 = vadd.f32 %v1535_v39, %v1534_v51  ;;  %v5218_v60 = vpop.eup %3867  ;;  %v1038_v21 = vsub.f32 %v4995_v48, %v5173_v8  ;;  %v1224_v38 = vmul.f32 1.442695, %v1032_v44  ;;  %v1226_v4 = vmul.f32 1.442695, %v1033_v59 }
 0x15c   :  { %v5199_v24 = vpop.xlane.xlu0 %512  ;;  %v1529_v36 = vadd.f32 %v1528_v0, %v1527_v25  ;;  %6499 = vst [vmem:[#allocation67_spill] sm:$0xff] %v5218_v60  ;;  %v727_v56 = vmax.f32 %v725_v45, %v726_v50  ;;  %v5226_v22 = vpop.eup %3869  ;;  %v1539_v51 = vsel %vm1384_vm1, %v5205_v53, 0.0  ;;  %v1228_v52 = vmul.f32 1.442695, %v1034_v62 }
 0x15d   :  { %6500 = vst [vmem:[#allocation68_spill] sm:$0xff] %v5226_v22  ;;  %v1538_v0 = vadd.f32 %v1537_v17, %v1536_v3  ;;  %v1039_v39 = vsub.f32 %v4993_v30, %v5173_v8  ;;  %3875 = vpow2.f32 %v1224_v38  ;;  %v1230_v48 = vmul.f32 1.442695, %v1035_v19 }
 0x15e   :  { %v1530_v25 = vrot.slane %v1529_v36, 1  ;;  %v1232_v44 = vmul.f32 1.442695, %v1036_v9  ;;  %3877 = vpow2.f32 %v1226_v4  ;;  %v1234_v50 = vmul.f32 1.442695, %v1037_v14  ;;  %v5232_v27 = vpop.eup %3871 }
 0x15f   :  { %v5222_v7 = vpop.xlane.xlu1 %518  ;;  %v1540_v45 = vadd.f32 %v1539_v51, %v1538_v0  ;;  %6501 = vst [vmem:[#allocation69_spill] sm:$0xff] %v5232_v27  ;;  %v1541_v23 = vsel %vm1384_vm1, %v5218_v60, 0.0  ;;  %v1543_v3 = vsel %vm1384_vm1, %v5226_v22, 0.0  ;;  %3879 = vpow2.f32 %v1228_v52 }
 0x160   :  { %v5224_v15 = vpop.xlane.xlu0 %516  ;;  %v1531_v59 = vadd.f32 %v1530_v25, %v1529_v36  ;;  %v728_v62 = vrot.slane %v727_v56, 1  ;;  %3881 = vpow2.f32 %v1230_v48  ;;  %v593_v36 = vld [vmem:[#allocation2 + $0x9] sm:$0x1]  ;;  %v736_v38 = vmax.f32 %v735_v41, %v5143_v1 }
 0x161   :  { %v1542_v9 = vadd.f32 %v1541_v23, %v1540_v45  ;;  %3883 = vpow2.f32 %v1232_v44  ;;  %v1236_v19 = vmul.f32 1.442695, %v1038_v21  ;;  %v745_v4 = vmax.f32 %v5187_v26, %v5168_v20 }
 0x162   :  { %v1727_v8 = vadd.f32 %v1531_v59, %v1374_v37  ;;  %v729_v14 = vmax.f32 %v727_v56, %v728_v62  ;;  %3885 = vpow2.f32 %v1234_v50  ;;  %v1238_v51 = vmul.f32 1.442695, %v1039_v39  ;;  %v1359_v37 = vld [vmem:[#allocation3 + $0x7] sm:$0x1] }
 0x163   :  { %v5238_v17 = vpop.xlane.xlu1 %522  ;;  %v5245_v25 = vpop.eup %3873  ;;  %v1544_v0 = vadd.f32 %v1543_v3, %v1542_v9  ;;  %v737_v52 = vrot.slane %v736_v38, 4  ;;  %v1545_v23 = vsel %vm1384_vm1, %v5232_v27, 0.0  ;;  %v5252_v56 = vmax.f32 %v745_v4, %v5199_v24 }
 0x164   :  { %v5240_v30 = vpop.xlane.xlu0 %520  ;;  %1744 = vst.msk [vmem:[#allocation3 + $0x6] sm:$0x1] %vm30_vm0, %v1727_v8  ;;  %v817_v48 = vmax.f32 %v593_v36, %v729_v14  ;;  %1830 = vperm.xlu1 %3728, %v5245_v25   ;;  %3887 = vpow2.f32 %v1236_v19  ;;  %v1375_v50 = vmul.f32 %v5162_v63, %v1359_v37 }
 0x165   :  { %v1546_v21 = vadd.f32 %v1545_v23, %v1544_v0  ;;  %v738_v44 = vmax.f32 %v736_v38, %v737_v52  ;;  %v756_v39 = vmax.f32 %v5240_v30, %v5238_v17  ;;  %3889 = vpow2.f32 %v1238_v51 }
 0x166   :  { %v833_v59 = vsub.f32 %v593_v36, %v817_v48  ;;  %v5261_v45 = vrot.slane %v817_v48, %v4428_v34  ;;  %3407 = vst.msk [vmem:[#allocation2 + $0x9] sm:$0x1] %vm30_vm0, %v817_v48  ;;  %v747_v19 = vmax.f32 %v5252_v56, %v5197_v5 }
 0x167   :  { %v5254_v41 = vpop.xlane.xlu1 %526  ;;  %v1547_v3 = vrot.slane %v1546_v21, 4  ;;  %v5266_v8 = vpop.eup %3875 }
 0x168   :  { %v5256_v26 = vpop.xlane.xlu0 %524  ;;  %6502 = vst [vmem:[#allocation70_spill] sm:$0xff] %v5266_v8  ;;  %v858_v9 = vmul.f32 1.442695, %v833_v59  ;;  %v1040_v38 = vsub.f32 %v5006_v55, %v5261_v45  ;;  %v1041_v36 = vsub.f32 %v5004_v43, %v5261_v45  ;;  %v5278_v63 = vpop.eup %3877  ;;  %v1553_v51 = vsel %vm1384_vm1, %v5266_v8, 0.0 }
 0x169   :  { %v757_v62 = vmax.f32 %v756_v39, %v5256_v26  ;;  %6503 = vst [vmem:[#allocation71_spill] sm:$0xff] %v5278_v63  ;;  %v1548_v0 = vadd.f32 %v1547_v3, %v1546_v21  ;;  %v1042_v52 = vsub.f32 %v5034_v12, %v5261_v45  ;;  %v739_v55 = vrot.slane %v738_v44, 2  ;;  %v5284_v37 = vpop.eup %3879 }
 0x16a   :  { %6504 = vst [vmem:[#allocation72_spill] sm:$0xff] %v5284_v37  ;;  %v1554_v43 = vsel %vm1384_vm1, %v5278_v63, 0.0  ;;  %3891 = vpow2.f32 %v858_v9  ;;  %v1043_v23 = vsub.f32 %v5032_v6, %v5261_v45  ;;  %v1044_v48 = vsub.f32 %v5059_v18, %v5261_v45  ;;  %v5292_v56 = vpop.eup %3881 }
 0x16b   :  { %v5274_v14 = vpop.xlane.xlu1 %530  ;;  %6505 = vst [vmem:[#allocation73_spill] sm:$0xff] %v5292_v56  ;;  %v1549_v21 = vrot.slane %v1548_v0, 2  ;;  %v1555_v39 = vadd.f32 %v1554_v43, %v1553_v51  ;;  %v1045_v12 = vsub.f32 %v5057_v11, %v5261_v45  ;;  %v758_v59 = vmax.f32 %v757_v62, %v5254_v41  ;;  %v5297_v3 = vpop.eup %3883 }
 0x16c   :  { %v5276_v4 = vpop.xlane.xlu0 %528  ;;  %6506 = vst [vmem:[#allocation74_spill] sm:$0xff] %v5297_v3  ;;  %v1556_v9 = vsel %vm1384_vm1, %v5284_v37, 0.0  ;;  %v1046_v6 = vsub.f32 %v5072_v32, %v5261_v45  ;;  %v1240_v63 = vmul.f32 1.442695, %v1040_v38  ;;  %v1242_v27 = vmul.f32 1.442695, %v1041_v36  ;;  %v5307_v51 = vpop.eup %3885 }
 0x16d   :  { %6507 = vst [vmem:[#allocation75_spill] sm:$0xff] %v5307_v51  ;;  %v1550_v43 = vadd.f32 %v1549_v21, %v1548_v0  ;;  %v1557_v11 = vadd.f32 %v1556_v9, %v1555_v39  ;;  %v1558_v62 = vsel %vm1384_vm1, %v5292_v56, 0.0  ;;  %v1244_v8 = vmul.f32 1.442695, %v1042_v52 }
 0x16e   :  { %3893 = vpow2.f32 %v1240_v63  ;;  %v1246_v22 = vmul.f32 1.442695, %v1043_v23  ;;  %v1248_v37 = vmul.f32 1.442695, %v1044_v48  ;;  %v740_v53 = vmax.f32 %v738_v44, %v739_v55  ;;  %v5313_v36 = vpop.eup %3887 }
 0x16f   :  { %v5303_v18 = vpop.xlane.xlu1 %534  ;;  %v1551_v28 = vrot.slane %v1550_v43, 1  ;;  %v1559_v32 = vadd.f32 %v1558_v62, %v1557_v11  ;;  %v1047_v38 = vsub.f32 %v5070_v35, %v5261_v45  ;;  %3895 = vpow2.f32 %v1242_v27  ;;  %6508 = vst [vmem:[#allocation76_spill] sm:$0xff] %v5313_v36  ;;  %v5323_v44 = vpop.eup %3889 }
 0x170   :  { %v5305_v60 = vpop.xlane.xlu0 %532  ;;  %v1560_v0 = vsel %vm1384_vm1, %v5297_v3, 0.0  ;;  %v1562_v21 = vsel %vm1384_vm1, %v5307_v51, 0.0  ;;  %3897 = vpow2.f32 %v1244_v8  ;;  %v1250_v52 = vmul.f32 1.442695, %v1045_v12  ;;  %6509 = vst [vmem:[#allocation77_spill] sm:$0xff] %v5323_v44 }
 0x171   :  { %v1552_v55 = vadd.f32 %v1551_v28, %v1550_v43  ;;  %v1561_v48 = vadd.f32 %v1560_v0, %v1559_v32  ;;  %3899 = vpow2.f32 %v1246_v22  ;;  %v1252_v35 = vmul.f32 1.442695, %v1046_v6  ;;  %v594_v8 = vld [vmem:[#allocation2 + $0xa] sm:$0x1] }
 0x172   :  { %3901 = vpow2.f32 %v1248_v37  ;;  %v741_v27 = vrot.slane %v740_v53, 1  ;;  %v748_v45 = vmax.f32 %v747_v19, %v5224_v15  ;;  %v759_v39 = vmax.f32 %v758_v59, %v5276_v4 }
 0x173   :  { %v5319_v63 = vpop.xlane.xlu1 %538  ;;  %v1728_v9 = vadd.f32 %v1552_v55, %v1375_v50  ;;  %v1563_v11 = vadd.f32 %v1562_v21, %v1561_v48  ;;  %3903 = vpow2.f32 %v1250_v52  ;;  %v1564_v28 = vsel %vm1384_vm1, %v5313_v36, 0.0  ;;  %v1360_v50 = vld [vmem:[#allocation3 + $0x8] sm:$0x1] }
 0x174   :  { %v5321_v23 = vpop.xlane.xlu0 %536  ;;  %v5329_v62 = vpop.eup %3891  ;;  %v742_v22 = vmax.f32 %v740_v53, %v741_v27  ;;  %v749_v37 = vmax.f32 %v748_v45, %v5222_v7  ;;  %v760_v6 = vmax.f32 %v759_v39, %v5274_v14  ;;  %3905 = vpow2.f32 %v1252_v35 }
 0x175   :  { %v769_v12 = vmax.f32 %v5321_v23, %v5319_v63  ;;  %1745 = vst.msk [vmem:[#allocation3 + $0x7] sm:$0x1] %vm30_vm0, %v1728_v9  ;;  %v1565_v43 = vadd.f32 %v1564_v28, %v1563_v11  ;;  %v1254_v32 = vmul.f32 1.442695, %v1047_v38  ;;  %1839 = vperm.xlu0 %3727, %v5329_v62   ;;  %v1566_v53 = vsel %vm1384_vm1, %v5323_v44, 0.0 }
 0x176   :  { %v818_v21 = vmax.f32 %v594_v8, %v742_v22  ;;  %v750_v52 = vrot.slane %v749_v37, 4  ;;  %v761_v55 = vmax.f32 %v760_v6, %v5305_v60  ;;  %v5349_v39 = vmul.f32 %v5245_v25, %v1360_v50 }
 0x177   :  { %v5335_v19 = vpop.xlane.xlu1 %542  ;;  %v1567_v48 = vadd.f32 %v1566_v53, %v1565_v43  ;;  %3907 = vpow2.f32 %v1254_v32 }
 0x178   :  { %v5337_v59 = vpop.xlane.xlu0 %540  ;;  %v5346_v45 = vpop.eup %3893  ;;  %v834_v38 = vsub.f32 %v594_v8, %v818_v21  ;;  %v5352_v35 = vrot.slane %v818_v21, %v4428_v34  ;;  %3408 = vst.msk [vmem:[#allocation2 + $0xa] sm:$0x1] %vm30_vm0, %v818_v21  ;;  %v751_v6 = vmax.f32 %v749_v37, %v750_v52 }
 0x179   :  { %v770_v0 = vmax.f32 %v769_v12, %v5337_v59  ;;  %6510 = vst [vmem:[#allocation78_spill] sm:$0xff] %v5346_v45  ;;  %v5359_v12 = vpop.eup %3895  ;;  %v1568_v28 = vrot.slane %v1567_v48, 4  ;;  %v1574_v22 = vsel %vm1384_vm1, %v5346_v45, 0.0 }
 0x17a   :  { %6511 = vst [vmem:[#allocation79_spill] sm:$0xff] %v5359_v12  ;;  %v5363_v25 = vpop.eup %3897  ;;  %v1575_v8 = vsel %vm1384_vm1, %v5359_v12, 0.0  ;;  %v860_v50 = vmul.f32 1.442695, %v834_v38  ;;  %v1048_v43 = vsub.f32 %v5084_v31, %v5352_v35  ;;  %v1049_v32 = vsub.f32 %v5082_v42, %v5352_v35 }
 0x17b   :  { %v771_v27 = vmax.f32 %v770_v0, %v5335_v19  ;;  %v5355_v9 = vpop.xlane.xlu1 %546  ;;  %6512 = vst [vmem:[#allocation80_spill] sm:$0xff] %v5363_v25  ;;  %v762_v0 = vmax.f32 %v761_v55, %v5303_v18  ;;  %v5370_v53 = vpop.eup %3899  ;;  %v1569_v21 = vadd.f32 %v1568_v28, %v1567_v48  ;;  %v1576_v44 = vadd.f32 %v1575_v8, %v1574_v22 }
 0x17c   :  { %v5357_v11 = vpop.xlane.xlu0 %544  ;;  %6513 = vst [vmem:[#allocation81_spill] sm:$0xff] %v5370_v53  ;;  %v5375_v52 = vpop.eup %3901  ;;  %v1577_v12 = vsel %vm1384_vm1, %v5363_v25, 0.0  ;;  %3909 = vpow2.f32 %v860_v50  ;;  %v1050_v31 = vsub.f32 %v5097_v10, %v5352_v35  ;;  %v1051_v55 = vsub.f32 %v5095_v46, %v5352_v35 }
 0x17d   :  { %v772_v37 = vmax.f32 %v771_v27, %v5357_v11  ;;  %6514 = vst [vmem:[#allocation82_spill] sm:$0xff] %v5375_v52  ;;  %v5387_v28 = vpop.eup %3903  ;;  %v1570_v42 = vrot.slane %v1569_v21, 2  ;;  %v1578_v27 = vadd.f32 %v1577_v12, %v1576_v44  ;;  %v1579_v22 = vsel %vm1384_vm1, %v5370_v53, 0.0 }
 0x17e   :  { %6515 = vst [vmem:[#allocation83_spill] sm:$0xff] %v5387_v28  ;;  %v1052_v8 = vsub.f32 %v5126_v13, %v5352_v35  ;;  %v1581_v10 = vsel %vm1384_vm1, %v5375_v52, 0.0  ;;  %v1053_v46 = vsub.f32 %v5124_v33, %v5352_v35  ;;  %v1054_v50 = vsub.f32 %v5145_v49, %v5352_v35  ;;  %v5399_v56 = vpop.eup %3905 }
 0x17f   :  { %v5383_v38 = vpop.xlane.xlu1 %550  ;;  %v1256_v51 = vmul.f32 1.442695, %v1048_v43  ;;  %6516 = vst [vmem:[#allocation84_spill] sm:$0xff] %v5399_v56  ;;  %v1571_v25 = vadd.f32 %v1570_v42, %v1569_v21  ;;  %v1580_v44 = vadd.f32 %v1579_v22, %v1578_v27  ;;  %v1583_v12 = vsel %vm1384_vm1, %v5387_v28, 0.0 }
 0x180   :  { %v5385_v48 = vpop.xlane.xlu0 %548  ;;  %v1258_v53 = vmul.f32 1.442695, %v1049_v32  ;;  %v1055_v13 = vsub.f32 %v5143_v1, %v5352_v35  ;;  %v1260_v52 = vmul.f32 1.442695, %v1050_v31  ;;  %v1262_v45 = vmul.f32 1.442695, %v1051_v55 }
 0x181   :  { %3911 = vpow2.f32 %v1256_v51  ;;  %v1572_v33 = vrot.slane %v1571_v25, 1  ;;  %v1582_v3 = vadd.f32 %v1581_v10, %v1580_v44  ;;  %v1264_v49 = vmul.f32 1.442695, %v1052_v8  ;;  %v5411_v27 = vpop.eup %3907 }
 0x182   :  { %3913 = vpow2.f32 %v1258_v53  ;;  %v1585_v21 = vsel %vm1384_vm1, %v5399_v56, 0.0  ;;  %v1266_v42 = vmul.f32 1.442695, %v1053_v46  ;;  %v1268_v32 = vmul.f32 1.442695, %v1054_v50  ;;  %6517 = vst [vmem:[#allocation85_spill] sm:$0xff] %v5411_v27 }
 0x183   :  { %v5407_v43 = vpop.xlane.xlu1 %554  ;;  %3915 = vpow2.f32 %v1260_v52  ;;  %v1573_v1 = vadd.f32 %v1572_v33, %v1571_v25  ;;  %v1584_v51 = vadd.f32 %v1583_v12, %v1582_v3  ;;  %v752_v35 = vrot.slane %v751_v6, 2 }
 0x184   :  { %v5405_v36 = vpop.xlane.xlu0 %552  ;;  %3917 = vpow2.f32 %v1262_v45  ;;  %v763_v31 = vrot.slane %v762_v0, 4  ;;  %v773_v55 = vmax.f32 %v772_v37, %v5355_v9  ;;  %v1587_v3 = vsel %vm1384_vm1, %v5411_v27, 0.0  ;;  %v596_v27 = vld [vmem:[#allocation2 + $0xc] sm:$0x1] }
 0x185   :  { %3919 = vpow2.f32 %v1264_v49  ;;  %v782_v53 = vmax.f32 %v5405_v36, %v5407_v43  ;;  %v1729_v8 = vadd.f32 %v1573_v1, %v5349_v39  ;;  %v1586_v52 = vadd.f32 %v1585_v21, %v1584_v51 }
 0x186   :  { %3921 = vpow2.f32 %v1266_v42  ;;  %v753_v10 = vmax.f32 %v751_v6, %v752_v35  ;;  %v5419_v46 = vpop.eup %3909  ;;  %v764_v45 = vmax.f32 %v762_v0, %v763_v31  ;;  %v774_v25 = vmax.f32 %v773_v55, %v5385_v48  ;;  %v595_v6 = vld [vmem:[#allocation2 + $0xb] sm:$0x1]  ;;  %v1361_v35 = vld [vmem:[#allocation3 + $0x9] sm:$0x1] }
 0x187   :  { %1746 = vst.msk [vmem:[#allocation3 + $0x8] sm:$0x1] %vm30_vm0, %v1729_v8  ;;  %v1588_v50 = vadd.f32 %v1587_v3, %v1586_v52  ;;  %v1270_v44 = vmul.f32 1.442695, %v1055_v13  ;;  %1848 = vperm.xlu1 %3728, %v5419_v46   ;;  %v5427_v39 = vpop.xlane.xlu1 %558  ;;  %3923 = vpow2.f32 %v1268_v32 }
 0x188   :  { %v5416_v22 = vpop.xlane.xlu0 %556  ;;  %v754_v12 = vrot.slane %v753_v10, 1  ;;  %v765_v33 = vrot.slane %v764_v45, 2  ;;  %v775_v49 = vmax.f32 %v774_v25, %v5383_v38 }
 0x189   :  { %v783_v37 = vmax.f32 %v782_v53, %v5416_v22  ;;  %v1589_v42 = vrot.slane %v1588_v50, 4  ;;  %3925 = vpow2.f32 %v1270_v44 }
 0x18a   :  { %v755_v1 = vmax.f32 %v753_v10, %v754_v12  ;;  %v766_v13 = vmax.f32 %v764_v45, %v765_v33  ;;  %v776_v31 = vrot.slane %v775_v49, 4  ;;  %v1377_v45 = vmul.f32 %v5329_v62, %v1361_v35 }
 0x18b   :  { %v784_v21 = vmax.f32 %v783_v37, %v5427_v39  ;;  %v5433_v51 = vpop.eup %3911  ;;  %v1590_v8 = vadd.f32 %v1589_v42, %v1588_v50  ;;  %v5450_v50 = vpop.xlane.xlu1 %562 }
 0x18c   :  { %v5431_v0 = vpop.xlane.xlu0 %560  ;;  %6518 = vst [vmem:[#allocation86_spill] sm:$0xff] %v5433_v51  ;;  %v5438_v53 = vpop.eup %3913  ;;  %v1595_v52 = vsel %vm1384_vm1, %v5433_v51, 0.0  ;;  %v819_v3 = vmax.f32 %v595_v6, %v755_v1  ;;  %v767_v10 = vrot.slane %v766_v13, 1 }
 0x18d   :  { %v5436_v55 = vmax.f32 %v784_v21, %v5431_v0  ;;  %6519 = vst [vmem:[#allocation87_spill] sm:$0xff] %v5438_v53  ;;  %v5442_v25 = vpop.eup %3915  ;;  %v1596_v32 = vsel %vm1384_vm1, %v5438_v53, 0.0  ;;  %v1591_v12 = vrot.slane %v1590_v8, 2  ;;  %v777_v53 = vmax.f32 %v775_v49, %v776_v31 }
 0x18e   :  { %6520 = vst [vmem:[#allocation88_spill] sm:$0xff] %v5442_v25  ;;  %v5446_v37 = vpop.eup %3917  ;;  %v1597_v33 = vadd.f32 %v1596_v32, %v1595_v52  ;;  %v835_v21 = vsub.f32 %v595_v6, %v819_v3  ;;  %3409 = vst.msk [vmem:[#allocation2 + $0xb] sm:$0x1] %vm30_vm0, %v819_v3  ;;  %v1598_v42 = vsel %vm1384_vm1, %v5442_v25, 0.0  ;;  %v935_v1 = vrot.slane %v819_v3, %v4428_v34 }
 0x18f   :  { %6521 = vst [vmem:[#allocation89_spill] sm:$0xff] %v5446_v37  ;;  %v5452_v44 = vpop.eup %3919  ;;  %v1592_v62 = vadd.f32 %v1591_v12, %v1590_v8  ;;  %v1600_v6 = vsel %vm1384_vm1, %v5446_v37, 0.0  ;;  %v768_v56 = vmax.f32 %v766_v13, %v767_v10 }
 0x190   :  { %6522 = vst [vmem:[#allocation90_spill] sm:$0xff] %v5452_v44  ;;  %v5459_v28 = vpop.eup %3921  ;;  %v1599_v35 = vadd.f32 %v1598_v42, %v1597_v33  ;;  %v862_v52 = vmul.f32 1.442695, %v835_v21  ;;  %v1056_v32 = vsub.f32 %v5160_v40, %v935_v1  ;;  %v1057_v51 = vsub.f32 %v5158_v29, %v935_v1 }
 0x191   :  { %6523 = vst [vmem:[#allocation91_spill] sm:$0xff] %v5459_v28  ;;  %v1058_v25 = vsub.f32 %v5170_v47, %v935_v1  ;;  %v1593_v3 = vrot.slane %v1592_v62, 1  ;;  %v1602_v31 = vsel %vm1384_vm1, %v5452_v44, 0.0  ;;  %v1604_v8 = vsel %vm1384_vm1, %v5459_v28, 0.0  ;;  %v5473_v29 = vpop.eup %3923 }
 0x192   :  { %v1601_v49 = vadd.f32 %v1600_v6, %v1599_v35  ;;  %3927 = vpow2.f32 %v862_v52  ;;  %v1059_v12 = vsub.f32 %v5168_v20, %v935_v1  ;;  %v1060_v33 = vsub.f32 %v5199_v24, %v935_v1 }
 0x193   :  { %v1061_v40 = vsub.f32 %v5197_v5, %v935_v1  ;;  %v1594_v47 = vadd.f32 %v1593_v3, %v1592_v62  ;;  %v1062_v10 = vsub.f32 %v5224_v15, %v935_v1  ;;  %v1063_v21 = vsub.f32 %v5222_v7, %v935_v1  ;;  %v5477_v37 = vpop.eup %3925  ;;  %v5482_v15 = vpop.xlane.xlu0 %564 }
 0x194   :  { %v1603_v13 = vadd.f32 %v1602_v31, %v1601_v49  ;;  %v1272_v42 = vmul.f32 1.442695, %v1056_v32  ;;  %v1274_v35 = vmul.f32 1.442695, %v1057_v51  ;;  %v1276_v6 = vmul.f32 1.442695, %v1058_v25 }
 0x195   :  { %v820_v52 = vmax.f32 %v596_v27, %v768_v56  ;;  %v1730_v28 = vadd.f32 %v1594_v47, %v1377_v45  ;;  %v1278_v44 = vmul.f32 1.442695, %v1059_v12  ;;  %v778_v24 = vrot.slane %v777_v53, 2  ;;  %v5498_v12 = vpop.xlane.xlu1 %566 }
 0x196   :  { %v1605_v20 = vadd.f32 %v1604_v8, %v1603_v13  ;;  %v1606_v5 = vsel %vm1384_vm1, %v5473_v29, 0.0  ;;  %3929 = vpow2.f32 %v1272_v42  ;;  %v1280_v62 = vmul.f32 1.442695, %v1060_v33 }
 0x197   :  { %v1282_v3 = vmul.f32 1.442695, %v1061_v40  ;;  %3410 = vst.msk [vmem:[#allocation2 + $0xc] sm:$0x1] %vm30_vm0, %v820_v52  ;;  %1747 = vst.msk [vmem:[#allocation3 + $0x9] sm:$0x1] %vm30_vm0, %v1730_v28  ;;  %3931 = vpow2.f32 %v1274_v35  ;;  %v836_v56 = vsub.f32 %v596_v27, %v820_v52  ;;  %v5486_v51 = vrot.slane %v820_v52, %v4428_v34  ;;  %v5511_v13 = vpop.xlane.xlu0 %568 }
 0x198   :  { %v1607_v7 = vadd.f32 %v1606_v5, %v1605_v20  ;;  %v1608_v25 = vsel %vm1384_vm1, %v5477_v37, 0.0  ;;  %3933 = vpow2.f32 %v1276_v6  ;;  %v1284_v45 = vmul.f32 1.442695, %v1062_v10  ;;  %v1362_v40 = vld [vmem:[#allocation3 + $0xa] sm:$0x1] }
 0x199   :  { %v1286_v1 = vmul.f32 1.442695, %v1063_v21  ;;  %3935 = vpow2.f32 %v1278_v44  ;;  %v864_v49 = vmul.f32 1.442695, %v836_v56  ;;  %v1064_v31 = vsub.f32 %v5240_v30, %v5486_v51  ;;  %v597_v56 = vld [vmem:[#allocation2 + $0xd] sm:$0x1] }
 0x19a   :  { %v1609_v32 = vadd.f32 %v1608_v25, %v1607_v7  ;;  %3937 = vpow2.f32 %v1280_v62  ;;  %v1065_v28 = vsub.f32 %v5238_v17, %v5486_v51  ;;  %v1066_v27 = vsub.f32 %v5256_v26, %v5486_v51  ;;  %v5521_v62 = vpop.xlane.xlu1 %570 }
 0x19b   :  { %v1067_v8 = vsub.f32 %v5254_v41, %v5486_v51  ;;  %3939 = vpow2.f32 %v1282_v3  ;;  %v779_v47 = vmax.f32 %v777_v53, %v778_v24  ;;  %v1068_v30 = vsub.f32 %v5276_v4, %v5486_v51 }
 0x19c   :  { %v5500_v33 = vpop.eup %3927  ;;  %v1610_v44 = vrot.slane %v1609_v32, 4  ;;  %3941 = vpow2.f32 %v1284_v45  ;;  %v1069_v17 = vsub.f32 %v5274_v14, %v5486_v51  ;;  %v6524_v41 = vmax.f32 %v5436_v55, %v5450_v50 }
 0x19d   :  { %1857 = vperm.xlu0 %3727, %v5500_v33   ;;  %3943 = vpow2.f32 %v1286_v1  ;;  %v1288_v21 = vmul.f32 1.442695, %v1064_v31  ;;  %v1290_v53 = vmul.f32 1.442695, %v1065_v28  ;;  %v1378_v42 = vmul.f32 %v5419_v46, %v1362_v40  ;;  %v5531_v1 = vpop.xlane.xlu0 %572 }
 0x19e   :  { %v787_v26 = vmax.f32 %v6524_v41, %v5482_v15  ;;  %v1611_v10 = vadd.f32 %v1610_v44, %v1609_v32  ;;  %3945 = vpow2.f32 %v864_v49  ;;  %v1292_v4 = vmul.f32 1.442695, %v1066_v27 }
 0x19f   :  { %v1294_v35 = vmul.f32 1.442695, %v1067_v8  ;;  %v1070_v14 = vsub.f32 %v5305_v60, %v5486_v51  ;;  %v1071_v52 = vsub.f32 %v5303_v18, %v5486_v51  ;;  %3947 = vpow2.f32 %v1288_v21 }
 0x1a0   :  { %v1612_v6 = vrot.slane %v1611_v10, 2  ;;  %v5518_v55 = vpop.eup %3929  ;;  %3949 = vpow2.f32 %v1290_v53  ;;  %v1296_v20 = vmul.f32 1.442695, %v1068_v30  ;;  %v780_v24 = vrot.slane %v779_v47, 1 }
 0x1a1   :  { %v788_v5 = vmax.f32 %v787_v26, %v5498_v12  ;;  %v5523_v46 = vpop.eup %3931  ;;  %v1616_v7 = vsel %vm1384_vm1, %v5518_v55, 0.0  ;;  %3951 = vpow2.f32 %v1292_v4  ;;  %v1298_v60 = vmul.f32 1.442695, %v1069_v17 }
 0x1a2   :  { %v1613_v3 = vadd.f32 %v1612_v6, %v1611_v10  ;;  %v5527_v18 = vpop.eup %3933  ;;  %v1617_v51 = vsel %vm1384_vm1, %v5523_v46, 0.0  ;;  %3953 = vpow2.f32 %v1294_v35  ;;  %v781_v25 = vmax.f32 %v779_v47, %v780_v24 }
 0x1a3   :  { %v789_v45 = vrot.slane %v788_v5, 4  ;;  %v5533_v32 = vpop.eup %3935  ;;  %v1618_v31 = vadd.f32 %v1617_v51, %v1616_v7  ;;  %v1300_v28 = vmul.f32 1.442695, %v1070_v14  ;;  %v795_v27 = vmax.f32 %v5511_v13, %v5521_v62 }
 0x1a4   :  { %v1614_v49 = vrot.slane %v1613_v3, 1  ;;  %v5537_v8 = vpop.eup %3937  ;;  %v1619_v40 = vsel %vm1384_vm1, %v5527_v18, 0.0  ;;  %3955 = vpow2.f32 %v1296_v20  ;;  %v1302_v44 = vmul.f32 1.442695, %v1071_v52 }
 0x1a5   :  { %v821_v30 = vmax.f32 %v597_v56, %v781_v25  ;;  %v5541_v47 = vpop.eup %3939  ;;  %v1620_v41 = vadd.f32 %v1619_v40, %v1618_v31  ;;  %v1621_v26 = vsel %vm1384_vm1, %v5533_v32, 0.0  ;;  %v5546_v10 = vmax.f32 %v795_v27, %v5531_v1 }
 0x1a6   :  { %v1615_v17 = vadd.f32 %v1614_v49, %v1613_v3  ;;  %v5548_v21 = vpop.eup %3941  ;;  %3957 = vpow2.f32 %v1298_v60  ;;  %v790_v35 = vmax.f32 %v788_v5, %v789_v45  ;;  %v1623_v20 = vsel %vm1384_vm1, %v5537_v8, 0.0 }
 0x1a7   :  { %v837_v53 = vsub.f32 %v597_v56, %v821_v30  ;;  %v5551_v4 = vrot.slane %v821_v30, %v4428_v34  ;;  %3411 = vst.msk [vmem:[#allocation2 + $0xd] sm:$0x1] %vm30_vm0, %v821_v30  ;;  %v5554_v6 = vpop.eup %3943  ;;  %v1622_v52 = vadd.f32 %v1621_v26, %v1620_v41  ;;  %3959 = vpow2.f32 %v1300_v28 }
 0x1a8   :  { %v1731_v14 = vadd.f32 %v1615_v17, %v1378_v42  ;;  %v5558_v24 = vpop.eup %3945  ;;  %v1625_v3 = vsel %vm1384_vm1, %v5541_v47, 0.0  ;;  %3961 = vpow2.f32 %v1302_v44  ;;  %v791_v27 = vrot.slane %v790_v35, 2 }
 0x1a9   :  { %v866_v7 = vmul.f32 1.442695, %v837_v53  ;;  %v1072_v60 = vsub.f32 %v5321_v23, %v5551_v4  ;;  %v1073_v5 = vsub.f32 %v5319_v63, %v5551_v4  ;;  %v5566_v56 = vpop.eup %3947  ;;  %v1624_v42 = vadd.f32 %v1623_v20, %v1622_v52  ;;  %1866 = vperm.xlu1 %3728, %v5558_v24  }
 0x1aa   :  { %1748 = vst.msk [vmem:[#allocation3 + $0xa] sm:$0x1] %vm30_vm0, %v1731_v14  ;;  %v1074_v51 = vsub.f32 %v5337_v59, %v5551_v4  ;;  %v1075_v25 = vsub.f32 %v5335_v19, %v5551_v4  ;;  %v5574_v45 = vpop.eup %3949  ;;  %v1627_v23 = vsel %vm1384_vm1, %v5548_v21, 0.0  ;;  %v1637_v63 = vsel %vm1384_vm1, %v5566_v56, 0.0 }
 0x1ab   :  { %6525 = vst [vmem:[#allocation92_spill] sm:$0xff] %v5574_v45  ;;  %3963 = vpow2.f32 %v866_v7  ;;  %v1076_v49 = vsub.f32 %v5357_v11, %v5551_v4  ;;  %v5582_v31 = vpop.eup %3951  ;;  %v1626_v59 = vadd.f32 %v1625_v3, %v1624_v42  ;;  %v1638_v19 = vsel %vm1384_vm1, %v5574_v45, 0.0  ;;  %v5602_v42 = vpop.xlane.xlu0 %576 }
 0x1ac   :  { %v1077_v28 = vsub.f32 %v5355_v9, %v5551_v4  ;;  %v5588_v40 = vpop.eup %3953  ;;  %v1639_v44 = vadd.f32 %v1638_v19, %v1637_v63  ;;  %v1078_v30 = vsub.f32 %v5385_v48, %v5551_v4  ;;  %v1304_v17 = vmul.f32 1.442695, %v1072_v60 }
 0x1ad   :  { %6526 = vst [vmem:[#allocation93_spill] sm:$0xff] %v5588_v40  ;;  %v1306_v41 = vmul.f32 1.442695, %v1073_v5  ;;  %v1628_v26 = vadd.f32 %v1627_v23, %v1626_v59  ;;  %v1640_v11 = vsel %vm1384_vm1, %v5582_v31, 0.0  ;;  %v1308_v53 = vmul.f32 1.442695, %v1074_v51  ;;  %v5600_v5 = vpop.xlane.xlu1 %574 }
 0x1ae   :  { %v1310_v14 = vmul.f32 1.442695, %v1075_v25  ;;  %v5594_v52 = vpop.eup %3955  ;;  %v1629_v9 = vsel %vm1384_vm1, %v5554_v6, 0.0  ;;  %v1641_v20 = vadd.f32 %v1640_v11, %v1639_v44  ;;  %3965 = vpow2.f32 %v1304_v17 }
 0x1af   :  { %v1312_v3 = vmul.f32 1.442695, %v1076_v49  ;;  %v1630_v7 = vadd.f32 %v1629_v9, %v1628_v26  ;;  %v1642_v48 = vsel %vm1384_vm1, %v5588_v40, 0.0  ;;  %3967 = vpow2.f32 %v1306_v41  ;;  %v598_v9 = vld [vmem:[#allocation2 + $0xe] sm:$0x1] }
 0x1b0   :  { %v1314_v60 = vmul.f32 1.442695, %v1077_v28  ;;  %v5604_v51 = vpop.eup %3957  ;;  %v1643_v25 = vadd.f32 %v1642_v48, %v1641_v20  ;;  %v1079_v23 = vsub.f32 %v5383_v38, %v5551_v4  ;;  %3969 = vpow2.f32 %v1308_v53  ;;  %v5625_v20 = vpop.xlane.xlu0 %580 }
 0x1b1   :  { %6527 = vst [vmem:[#allocation94_spill] sm:$0xff] %v5604_v51  ;;  %v5608_v63 = vpop.eup %3959  ;;  %v1631_v49 = vrot.slane %v1630_v7, 4  ;;  %v1644_v59 = vsel %vm1384_vm1, %v5594_v52, 0.0  ;;  %3971 = vpow2.f32 %v1310_v14  ;;  %v1316_v19 = vmul.f32 1.442695, %v1078_v30 }
 0x1b2   :  { %v1645_v28 = vadd.f32 %v1644_v59, %v1643_v25  ;;  %3973 = vpow2.f32 %v1312_v3  ;;  %v792_v44 = vmax.f32 %v790_v35, %v791_v27  ;;  %v797_v17 = vmax.f32 %v5546_v10, %v5600_v5  ;;  %v5614_v41 = vpop.eup %3961  ;;  %v5623_v10 = vpop.xlane.xlu1 %578  ;;  %v1363_v59 = vld [vmem:[#allocation3 + $0xb] sm:$0x1] }
 0x1b3   :  { %6528 = vst [vmem:[#allocation95_spill] sm:$0xff] %v5614_v41  ;;  %v1632_v26 = vadd.f32 %v1631_v49, %v1630_v7  ;;  %v1646_v38 = vsel %vm1384_vm1, %v5604_v51, 0.0  ;;  %3975 = vpow2.f32 %v1314_v60  ;;  %v1648_v35 = vsel %vm1384_vm1, %v5608_v63, 0.0 }
 0x1b4   :  { %v1647_v11 = vadd.f32 %v1646_v38, %v1645_v28  ;;  %v793_v53 = vrot.slane %v792_v44, 1  ;;  %v798_v14 = vmax.f32 %v797_v17, %v5602_v42  ;;  %v1318_v27 = vmul.f32 1.442695, %v1079_v23 }
 0x1b5   :  { %v5618_v4 = vpop.eup %3963  ;;  %v1633_v30 = vrot.slane %v1632_v26, 2  ;;  %3977 = vpow2.f32 %v1316_v19  ;;  %v1650_v25 = vsel %vm1384_vm1, %v5614_v41, 0.0 }
 0x1b6   :  { %1875 = vperm.xlu0 %3727, %v5618_v4   ;;  %v1649_v3 = vadd.f32 %v1648_v35, %v1647_v11  ;;  %v794_v7 = vmax.f32 %v792_v44, %v793_v53  ;;  %v799_v48 = vmax.f32 %v798_v14, %v5623_v10  ;;  %3979 = vpow2.f32 %v1318_v27 }
 0x1b7   :  { %v1634_v60 = vadd.f32 %v1633_v30, %v1632_v26  ;;  %v1379_v35 = vmul.f32 %v5500_v33, %v1363_v59 }
 0x1b8   :  { %v5631_v49 = vpop.eup %3965  ;;  %v1651_v23 = vadd.f32 %v1650_v25, %v1649_v3  ;;  %v822_v28 = vmax.f32 %v598_v9, %v794_v7  ;;  %v800_v17 = vmax.f32 %v799_v48, %v5625_v20  ;;  %v5649_v7 = vpop.xlane.xlu1 %582 }
 0x1b9   :  { %v5634_v38 = vpop.eup %3967  ;;  %v1635_v51 = vrot.slane %v1634_v60, 1  ;;  %v1658_v19 = vsel %vm1384_vm1, %v5631_v49, 0.0 }
 0x1ba   :  { %6529 = vst [vmem:[#allocation96_spill] sm:$0xff] %v5634_v38  ;;  %v5638_v44 = vpop.eup %3969  ;;  %v1652_v26 = vrot.slane %v1651_v23, 4  ;;  %v1659_v11 = vsel %vm1384_vm1, %v5634_v38, 0.0  ;;  %v838_v53 = vsub.f32 %v598_v9, %v822_v28  ;;  %v5643_v14 = vrot.slane %v822_v28, %v4428_v34  ;;  %3412 = vst.msk [vmem:[#allocation2 + $0xe] sm:$0x1] %vm30_vm0, %v822_v28 }
 0x1bb   :  { %v5646_v30 = vpop.eup %3971  ;;  %v1636_v27 = vadd.f32 %v1635_v51, %v1634_v60  ;;  %v1660_v3 = vadd.f32 %v1659_v11, %v1658_v19  ;;  %v1661_v38 = vsel %vm1384_vm1, %v5638_v44, 0.0  ;;  %v801_v41 = vmax.f32 %v800_v17, %v5649_v7 }
 0x1bc   :  { %v5651_v48 = vpop.eup %3973  ;;  %v1653_v25 = vadd.f32 %v1652_v26, %v1651_v23  ;;  %v868_v9 = vmul.f32 1.442695, %v838_v53  ;;  %v1080_v33 = vsub.f32 %v5405_v36, %v5643_v14  ;;  %v1081_v51 = vsub.f32 %v5407_v43, %v5643_v14  ;;  %v1364_v36 = vld [vmem:[#allocation3 + $0xc] sm:$0x1] }
 0x1bd   :  { %v5656_v40 = vpop.eup %3975  ;;  %v1732_v28 = vadd.f32 %v1636_v27, %v1379_v35  ;;  %v1662_v45 = vadd.f32 %v1661_v38, %v1660_v3  ;;  %v1663_v59 = vsel %vm1384_vm1, %v5646_v30, 0.0  ;;  %v1082_v23 = vsub.f32 %v5416_v22, %v5643_v14 }
 0x1be   :  { %6530 = vst [vmem:[#allocation97_spill] sm:$0xff] %v5656_v40  ;;  %v1654_v60 = vrot.slane %v1653_v25, 2  ;;  %3981 = vpow2.f32 %v868_v9  ;;  %v1083_v38 = vsub.f32 %v5427_v39, %v5643_v14  ;;  %v1665_v43 = vsel %vm1384_vm1, %v5651_v48, 0.0 }
 0x1bf   :  { %1749 = vst.msk [vmem:[#allocation3 + $0xb] sm:$0x1] %vm30_vm0, %v1732_v28  ;;  %v1664_v17 = vadd.f32 %v1663_v59, %v1662_v45  ;;  %v5669_v19 = vpop.eup %3977  ;;  %v1667_v11 = vsel %vm1384_vm1, %v5656_v40, 0.0  ;;  %v1084_v53 = vsub.f32 %v5431_v0, %v5643_v14  ;;  %v1085_v45 = vsub.f32 %v5450_v50, %v5643_v14 }
 0x1c0   :  { %v1655_v26 = vadd.f32 %v1654_v60, %v1653_v25  ;;  %v1320_v35 = vmul.f32 1.442695, %v1080_v33  ;;  %v1322_v27 = vmul.f32 1.442695, %v1081_v51  ;;  %v1324_v3 = vmul.f32 1.442695, %v1082_v23  ;;  %v5679_v25 = vpop.eup %3979 }
 0x1c1   :  { %v1666_v22 = vadd.f32 %v1665_v43, %v1664_v17  ;;  %v1326_v9 = vmul.f32 1.442695, %v1083_v38  ;;  %v802_v28 = vrot.slane %v801_v41, 4  ;;  %v1380_v60 = vmul.f32 %v5558_v24, %v1364_v36 }
 0x1c2   :  { %v1656_v39 = vrot.slane %v1655_v26, 1  ;;  %v1669_v40 = vsel %vm1384_vm1, %v5669_v19, 0.0  ;;  %3983 = vpow2.f32 %v1320_v35  ;;  %v1086_v17 = vsub.f32 %v5482_v15, %v5643_v14  ;;  %v599_v35 = vld [vmem:[#allocation2 + $0xf] sm:$0x1] }
 0x1c3   :  { %v1668_v59 = vadd.f32 %v1667_v11, %v1666_v22  ;;  %3985 = vpow2.f32 %v1322_v27  ;;  %v1328_v50 = vmul.f32 1.442695, %v1084_v53  ;;  %v1330_v51 = vmul.f32 1.442695, %v1085_v45 }
 0x1c4   :  { %v1657_v0 = vadd.f32 %v1656_v39, %v1655_v26  ;;  %3987 = vpow2.f32 %v1324_v3  ;;  %v803_v23 = vmax.f32 %v801_v41, %v802_v28  ;;  %v1671_v43 = vsel %vm1384_vm1, %v5679_v25, 0.0  ;;  %v1365_v28 = vld [vmem:[#allocation3 + $0xd] sm:$0x1] }
 0x1c5   :  { %v1670_v33 = vadd.f32 %v1669_v40, %v1668_v59  ;;  %v1087_v24 = vsub.f32 %v5498_v12, %v5643_v14  ;;  %3989 = vpow2.f32 %v1326_v9  ;;  %v1332_v15 = vmul.f32 1.442695, %v1086_v17 }
 0x1c6   :  { %v1733_v38 = vadd.f32 %v1657_v0, %v1380_v60  ;;  %v804_v11 = vrot.slane %v803_v23, 2  ;;  %3991 = vpow2.f32 %v1328_v50 }
 0x1c7   :  { %v1672_v36 = vadd.f32 %v1671_v43, %v1670_v33  ;;  %3993 = vpow2.f32 %v1330_v51  ;;  %v1334_v41 = vmul.f32 1.442695, %v1087_v24  ;;  %v1381_v43 = vmul.f32 %v5618_v4, %v1365_v28 }
 0x1c8   :  { %v5690_v26 = vpop.eup %3981  ;;  %1750 = vst.msk [vmem:[#allocation3 + $0xc] sm:$0x1] %vm30_vm0, %v1733_v38  ;;  %v805_v53 = vmax.f32 %v803_v23, %v804_v11  ;;  %3995 = vpow2.f32 %v1332_v15 }
 0x1c9   :  { %v1673_v40 = vrot.slane %v1672_v36, 4  ;;  %1884 = vperm.xlu1 %3728, %v5690_v26   ;;  %3997 = vpow2.f32 %v1334_v41 }
 0x1ca   :  { %v806_v45 = vrot.slane %v805_v53, 1 }
 0x1cb   :  { %v1674_v22 = vadd.f32 %v1673_v40, %v1672_v36 }
 0x1cc   :  { %v5694_v12 = vpop.eup %3983  ;;  %v807_v27 = vmax.f32 %v805_v53, %v806_v45 }
 0x1cd   :  { %v1675_v14 = vrot.slane %v1674_v22, 2  ;;  %2034 = vperm.xlu1 %3728, %v4491_v61   ;;  %v5697_v39 = vpop.eup %3985  ;;  %v1679_v3 = vsel %vm1384_vm1, %v5694_v12, 0.0 }
 0x1ce   :  { %v5701_v9 = vpop.eup %3987  ;;  %v1680_v59 = vsel %vm1384_vm1, %v5697_v39, 0.0  ;;  %v823_v0 = vmax.f32 %v599_v35, %v807_v27 }
 0x1cf   :  { %v1676_v60 = vadd.f32 %v1675_v14, %v1674_v22  ;;  %v5705_v17 = vpop.eup %3989  ;;  %v1681_v50 = vadd.f32 %v1680_v59, %v1679_v3  ;;  %v1682_v61 = vsel %vm1384_vm1, %v5701_v9, 0.0 }
 0x1d0   :  { %v839_v51 = vsub.f32 %v599_v35, %v823_v0  ;;  %v951_v23 = vrot.slane %v823_v0, %v4428_v34  ;;  %3413 = vst.msk [vmem:[#allocation2 + $0xf] sm:$0x1] %vm30_vm0, %v823_v0  ;;  %v5712_v38 = vpop.eup %3991  ;;  %v1684_v15 = vsel %vm1384_vm1, %v5705_v17, 0.0 }
 0x1d1   :  { %v1677_v33 = vrot.slane %v1676_v60, 1  ;;  %2044 = vperm.xlu1 %3728, %v4503_v2   ;;  %v1683_v24 = vadd.f32 %v1682_v61, %v1681_v50  ;;  %v5715_v36 = vpop.eup %3993  ;;  %v1686_v35 = vsel %vm1384_vm1, %v5712_v38, 0.0 }
 0x1d2   :  { %v870_v40 = vmul.f32 1.442695, %v839_v51  ;;  %v1088_v53 = vsub.f32 %v5511_v13, %v951_v23  ;;  %v1089_v22 = vsub.f32 %v5521_v62, %v951_v23  ;;  %v1090_v45 = vsub.f32 %v5531_v1, %v951_v23  ;;  %v5726_v14 = vpop.eup %3995 }
 0x1d3   :  { %v1678_v11 = vadd.f32 %v1677_v33, %v1676_v60  ;;  %v1685_v41 = vadd.f32 %v1684_v15, %v1683_v24  ;;  %v1091_v4 = vsub.f32 %v5600_v5, %v951_v23  ;;  %v1688_v13 = vsel %vm1384_vm1, %v5715_v36, 0.0  ;;  %v5732_v60 = vpop.eup %3997 }
 0x1d4   :  { %3999 = vpow2.f32 %v870_v40  ;;  %v1092_v3 = vsub.f32 %v5602_v42, %v951_v23  ;;  %v1336_v62 = vmul.f32 1.442695, %v1088_v53  ;;  %v1338_v1 = vmul.f32 1.442695, %v1089_v22 }
 0x1d5   :  { %v1734_v2 = vadd.f32 %v1678_v11, %v1381_v43  ;;  %2054 = vperm.xlu1 %3728, %v4526_v58   ;;  %v1687_v27 = vadd.f32 %v1686_v35, %v1685_v41  ;;  %v1340_v28 = vmul.f32 1.442695, %v1090_v45  ;;  %v1093_v5 = vsub.f32 %v5623_v10, %v951_v23  ;;  %v1366_v45 = vld [vmem:[#allocation3 + $0xe] sm:$0x1] }
 0x1d6   :  { %v1342_v0 = vmul.f32 1.442695, %v1091_v4  ;;  %v1690_v58 = vsel %vm1384_vm1, %v5726_v14, 0.0  ;;  %4001 = vpow2.f32 %v1336_v62  ;;  %v1094_v42 = vsub.f32 %v5625_v20, %v951_v23 }
 0x1d7   :  { %1751 = vst.msk [vmem:[#allocation3 + $0xd] sm:$0x1] %vm30_vm0, %v1734_v2  ;;  %v1689_v59 = vadd.f32 %v1688_v13, %v1687_v27  ;;  %4003 = vpow2.f32 %v1338_v1  ;;  %v1344_v33 = vmul.f32 1.442695, %v1092_v3  ;;  %v1692_v61 = vsel %vm1384_vm1, %v5732_v60, 0.0 }
 0x1d8   :  { %4005 = vpow2.f32 %v1340_v28  ;;  %v1095_v43 = vsub.f32 %v5649_v7, %v951_v23  ;;  %v1346_v10 = vmul.f32 1.442695, %v1093_v5  ;;  %v1348_v11 = vmul.f32 1.442695, %v1094_v42  ;;  %v6531_v23 = vld [vmem:[#allocation12_spill] sm:$0xff] }
 0x1d9   :  { %2064 = vperm.xlu1 %3728, %v4546_v54   ;;  %v1691_v50 = vadd.f32 %v1690_v58, %v1689_v59  ;;  %4007 = vpow2.f32 %v1342_v0  ;;  %v1382_v62 = vmul.f32 %v5690_v26, %v1366_v45  ;;  %v6533_v59 = vld [vmem:[#allocation13_spill] sm:$0xff]  ;;  %v6534_v0 = vld [vmem:[#allocation20_spill] sm:$0xff] }
 0x1da   :  { %4009 = vpow2.f32 %v1344_v33  ;;  %v1350_v20 = vmul.f32 1.442695, %v1095_v43 }
 0x1db   :  { %v1693_v51 = vadd.f32 %v1692_v61, %v1691_v50  ;;  %4011 = vpow2.f32 %v1346_v10  ;;  %v6536_v10 = vld [vmem:[#allocation22_spill] sm:$0xff] }
 0x1dc   :  { %4013 = vpow2.f32 %v1348_v11 }
 0x1dd   :  { %2074 = vperm.xlu1 %3728, %v4591_v16   ;;  %v1694_v24 = vrot.slane %v1693_v51, 4  ;;  %4015 = vpow2.f32 %v1350_v20 }
 0x1de   :  { %v4000_v54 = vpop.eup %3999 }
 0x1df   :  { %v1695_v15 = vadd.f32 %v1694_v24, %v1693_v51  ;;  %1893 = vperm.xlu0 %3727, %v4000_v54   ;;  %v6535_v51 = vld [vmem:[#allocation14_spill] sm:$0xff] }
 0x1e0   :  { %v5744_v53 = vpop.eup %4001 }
 0x1e1   :  { %2084 = vperm.xlu1 %3728, %v4614_v57   ;;  %v1696_v40 = vrot.slane %v1695_v15, 2  ;;  %v5746_v41 = vpop.eup %4003  ;;  %v1700_v16 = vsel %vm1384_vm1, %v5744_v53, 0.0  ;;  %v6532_v57 = vld [vmem:[#allocation18_spill] sm:$0xff] }
 0x1e2   :  { %v5751_v22 = vpop.eup %4005  ;;  %v1701_v2 = vsel %vm1384_vm1, %v5746_v41, 0.0 }
 0x1e3   :  { %v1697_v7 = vadd.f32 %v1696_v40, %v1695_v15  ;;  %2039 = vperm.xlu0 %3727, %v6531_v23   ;;  %v5756_v35 = vpop.eup %4007  ;;  %v1702_v27 = vadd.f32 %v1701_v2, %v1700_v16  ;;  %v1703_v13 = vsel %vm1384_vm1, %v5751_v22, 0.0  ;;  %v6537_v40 = vld [vmem:[#allocation15_spill] sm:$0xff]  ;;  %v6538_v16 = vld [vmem:[#allocation24_spill] sm:$0xff] }
 0x1e4   :  { %v5760_v3 = vpop.eup %4009  ;;  %v1705_v5 = vsel %vm1384_vm1, %v5756_v35, 0.0  ;;  %v6539_v2 = vld [vmem:[#allocation16_spill] sm:$0xff] }
 0x1e5   :  { %2094 = vperm.xlu1 %3728, %v6532_v57   ;;  %v1698_v4 = vrot.slane %v1697_v7, 1  ;;  %v1704_v28 = vadd.f32 %v1703_v13, %v1702_v27  ;;  %v5767_v58 = vpop.eup %4011  ;;  %v1707_v33 = vsel %vm1384_vm1, %v5760_v3, 0.0  ;;  %v6540_v57 = vld [vmem:[#allocation26_spill] sm:$0xff]  ;;  %v6541_v13 = vld [vmem:[#allocation17_spill] sm:$0xff] }
 0x1e6   :  { %v5771_v61 = vpop.eup %4013  ;;  %v1709_v43 = vsel %vm1384_vm1, %v5767_v58, 0.0 }
 0x1e7   :  { %v1699_v1 = vadd.f32 %v1698_v4, %v1697_v7  ;;  %2049 = vperm.xlu0 %3727, %v6533_v59   ;;  %v1706_v42 = vadd.f32 %v1705_v5, %v1704_v28  ;;  %v5778_v24 = vpop.eup %4015  ;;  %v1711_v15 = vsel %vm1384_vm1, %v5771_v61, 0.0  ;;  %v1367_v28 = vld [vmem:[#allocation3 + $0xf] sm:$0x1]  ;;  %v6543_v5 = vld [vmem:[#allocation19_spill] sm:$0xff] }
 0x1e8   :  { %v1713_v7 = vsel %vm1384_vm1, %v5778_v24, 0.0 }
 0x1e9   :  { %2104 = vperm.xlu1 %3728, %v6534_v0   ;;  %v1735_v50 = vadd.f32 %v1699_v1, %v1382_v62  ;;  %v1708_v26 = vadd.f32 %v1707_v33, %v1706_v42  ;;  %v6542_v62 = vld [vmem:[#allocation28_spill] sm:$0xff]  ;;  %v6544_v0 = vld [vmem:[#allocation30_spill] sm:$0xff] }
 0x1eb   :  { %1752 = vst.msk [vmem:[#allocation3 + $0xe] sm:$0x1] %vm30_vm0, %v1735_v50  ;;  %2059 = vperm.xlu0 %3727, %v6535_v51   ;;  %v1710_v11 = vadd.f32 %v1709_v43, %v1708_v26  ;;  %v1383_v50 = vmul.f32 %v4000_v54, %v1367_v28  ;;  %v6545_v26 = vld [vmem:[#allocation21_spill] sm:$0xff]  ;;  %v6546_v51 = vld [vmem:[#allocation32_spill] sm:$0xff]  ;;  %v6547_v43 = vld [vmem:[#allocation23_spill] sm:$0xff] }
 0x1ec   :  { %v6553_v54 = vld [vmem:[#allocation29_spill] sm:$0xff] }
 0x1ed   :  { %2114 = vperm.xlu1 %3728, %v6536_v10   ;;  %v1712_v20 = vadd.f32 %v1711_v15, %v1710_v11  ;;  %v6548_v10 = vld [vmem:[#allocation34_spill] sm:$0xff]  ;;  %v6549_v11 = vld [vmem:[#allocation25_spill] sm:$0xff]  ;;  %v6550_v15 = vld [vmem:[#allocation36_spill] sm:$0xff] }
 0x1ef   :  { %2069 = vperm.xlu0 %3727, %v6537_v40   ;;  %v1714_v23 = vadd.f32 %v1713_v7, %v1712_v20  ;;  %v6551_v20 = vld [vmem:[#allocation27_spill] sm:$0xff]  ;;  %v6552_v40 = vld [vmem:[#allocation38_spill] sm:$0xff]  ;;  %v6554_v7 = vld [vmem:[#allocation40_spill] sm:$0xff] }
 0x1f1   :  { %2124 = vperm.xlu1 %3728, %v6538_v16   ;;  %v1715_v45 = vrot.slane %v1714_v23, 4  ;;  %v6555_v16 = vld [vmem:[#allocation31_spill] sm:$0xff] }
 0x1f3   :  { %2079 = vperm.xlu0 %3727, %v6539_v2   ;;  %v1716_v4 = vadd.f32 %v1715_v45, %v1714_v23  ;;  %v6556_v23 = vld [vmem:[#allocation42_spill] sm:$0xff]  ;;  %v5805_v45 = vpop.permute.xlu1 %1767  ;;  %v6558_v2 = vld [vmem:[#allocation33_spill] sm:$0xff] }
 0x1f4   :  { %6557 = vst [vmem:[#allocation12_spill] sm:$0xff] %v5805_v45  ;;  %v6618_v45 = vld [vmem:[#allocation77_spill] sm:$0xff] }
 0x1f5   :  { %2134 = vperm.xlu1 %3728, %v6540_v57   ;;  %v1717_v27 = vrot.slane %v1716_v4, 2  ;;  %v6559_v57 = vld [vmem:[#allocation44_spill] sm:$0xff] }
 0x1f7   :  { %2089 = vperm.xlu0 %3727, %v6541_v13   ;;  %v1718_v1 = vadd.f32 %v1717_v27, %v1716_v4  ;;  %v5809_v4 = vpop.permute.xlu1 %1776  ;;  %v6561_v27 = vld [vmem:[#allocation35_spill] sm:$0xff]  ;;  %v6562_v13 = vld [vmem:[#allocation46_spill] sm:$0xff] }
 0x1f8   :  { %6560 = vst [vmem:[#allocation18_spill] sm:$0xff] %v5809_v4  ;;  %v6616_v4 = vld [vmem:[#allocation86_spill] sm:$0xff] }
 0x1f9   :  { %2144 = vperm.xlu1 %3728, %v6542_v62   ;;  %v1719_v59 = vrot.slane %v1718_v1, 1  ;;  %v6563_v62 = vld [vmem:[#allocation37_spill] sm:$0xff] }
 0x1fb   :  { %2099 = vperm.xlu0 %3727, %v6543_v5   ;;  %v1720_v42 = vadd.f32 %v1719_v59, %v1718_v1  ;;  %v6564_v1 = vld [vmem:[#allocation48_spill] sm:$0xff]  ;;  %v5815_v28 = vpop.permute.xlu1 %1785  ;;  %v6566_v59 = vld [vmem:[#allocation39_spill] sm:$0xff]  ;;  %v6567_v5 = vld [vmem:[#allocation50_spill] sm:$0xff] }
 0x1fc   :  { %6565 = vst [vmem:[#allocation13_spill] sm:$0xff] %v5815_v28  ;;  %v6614_v28 = vld [vmem:[#allocation75_spill] sm:$0xff] }
 0x1fd   :  { %2154 = vperm.xlu1 %3728, %v6544_v0   ;;  %v1736_v33 = vadd.f32 %v1720_v42, %v1383_v50  ;;  %v6568_v50 = vld [vmem:[#allocation41_spill] sm:$0xff]  ;;  %v6569_v42 = vld [vmem:[#allocation52_spill] sm:$0xff] }
 0x1ff   :  { %2109 = vperm.xlu0 %3727, %v6545_v26   ;;  %1753 = vst.msk [vmem:[#allocation3 + $0xf] sm:$0x1] %vm30_vm0, %v1736_v33  ;;  %v5819_v0 = vpop.permute.xlu1 %1794  ;;  %v6570_v33 = vld [vmem:[#allocation43_spill] sm:$0xff]  ;;  %v6571_v26 = vld [vmem:[#allocation54_spill] sm:$0xff] }
 0x201   :  { %2164 = vperm.xlu1 %3728, %v6546_v51  }
 0x203   :  { %2119 = vperm.xlu0 %3727, %v6547_v43   ;;  %v5825_v51 = vpop.permute.xlu1 %1803  ;;  %v6572_v43 = vld [vmem:[#allocation45_spill] sm:$0xff] }
 0x205   :  { %2174 = vperm.xlu1 %3728, %v6548_v10   ;;  %v6573_v10 = vld [vmem:[#allocation56_spill] sm:$0xff] }
 0x207   :  { %2129 = vperm.xlu0 %3727, %v6549_v11   ;;  %v5829_v11 = vpop.permute.xlu1 %1812 }
 0x209   :  { %2184 = vperm.xlu1 %3728, %v6550_v15   ;;  %v6574_v15 = vld [vmem:[#allocation47_spill] sm:$0xff] }
 0x20b   :  { %2139 = vperm.xlu0 %3727, %v6551_v20   ;;  %v6575_v20 = vld [vmem:[#allocation58_spill] sm:$0xff] }
 0x20d   :  { %2194 = vperm.xlu1 %3728, %v6552_v40   ;;  %v5833_v40 = vpop.permute.xlu1 %1821 }
 0x20f   :  { %2149 = vperm.xlu0 %3727, %v6553_v54   ;;  %v6576_v54 = vld [vmem:[#allocation49_spill] sm:$0xff] }
 0x211   :  { %2204 = vperm.xlu1 %3728, %v6554_v7   ;;  %v6577_v7 = vld [vmem:[#allocation60_spill] sm:$0xff] }
 0x213   :  { %2159 = vperm.xlu0 %3727, %v6555_v16   ;;  %v5837_v16 = vpop.permute.xlu1 %1830 }
 0x215   :  { %2214 = vperm.xlu1 %3728, %v6556_v23   ;;  %v6578_v23 = vld [vmem:[#allocation51_spill] sm:$0xff] }
 0x217   :  { %2169 = vperm.xlu0 %3727, %v6558_v2   ;;  %v6579_v2 = vld [vmem:[#allocation62_spill] sm:$0xff] }
 0x219   :  { %2224 = vperm.xlu1 %3728, %v6559_v57   ;;  %v5841_v57 = vpop.permute.xlu1 %1848 }
 0x21b   :  { %2179 = vperm.xlu0 %3727, %v6561_v27   ;;  %v6580_v27 = vld [vmem:[#allocation53_spill] sm:$0xff] }
 0x21d   :  { %2234 = vperm.xlu1 %3728, %v6562_v13   ;;  %v6581_v13 = vld [vmem:[#allocation64_spill] sm:$0xff] }
 0x21f   :  { %2189 = vperm.xlu0 %3727, %v6563_v62  }
 0x221   :  { %2244 = vperm.xlu1 %3728, %v6564_v1   ;;  %v6583_v1 = vld [vmem:[#allocation55_spill] sm:$0xff] }
 0x223   :  { %2199 = vperm.xlu0 %3727, %v6566_v59   ;;  %v6584_v59 = vld [vmem:[#allocation66_spill] sm:$0xff] }
 0x225   :  { %2254 = vperm.xlu1 %3728, %v6567_v5   ;;  %v6585_v5 = vld [vmem:[#allocation57_spill] sm:$0xff] }
 0x227   :  { %2209 = vperm.xlu0 %3727, %v6568_v50  }
 0x228   :  { %v5845_v62 = vpop.permute.xlu1 %1866 }
 0x229   :  { %2264 = vperm.xlu1 %3728, %v6569_v42   ;;  %6582 = vst [vmem:[#allocation20_spill] sm:$0xff] %v5845_v62  ;;  %v6587_v42 = vld [vmem:[#allocation68_spill] sm:$0xff]  ;;  %v6610_v62 = vld [vmem:[#allocation73_spill] sm:$0xff] }
 0x22b   :  { %2219 = vperm.xlu0 %3727, %v6570_v33   ;;  %v6588_v33 = vld [vmem:[#allocation59_spill] sm:$0xff] }
 0x22d   :  { %2274 = vperm.xlu1 %3728, %v6571_v26  }
 0x22f   :  { %2229 = vperm.xlu0 %3727, %v6572_v43   ;;  %v6589_v43 = vld [vmem:[#allocation70_spill] sm:$0xff] }
 0x231   :  { %2284 = vperm.xlu1 %3728, %v6573_v10   ;;  %v5857_v10 = vpop.permute.xlu0 %1758 }
 0x232   :  { %6590 = vst [vmem:[#allocation22_spill] sm:$0xff] %v5857_v10  ;;  %v6606_v10 = vld [vmem:[#allocation71_spill] sm:$0xff] }
 0x233   :  { %2239 = vperm.xlu0 %3727, %v6574_v15   ;;  %v6591_v15 = vld [vmem:[#allocation61_spill] sm:$0xff] }
 0x235   :  { %2294 = vperm.xlu1 %3728, %v6575_v20  }
 0x237   :  { %2249 = vperm.xlu0 %3727, %v6576_v54   ;;  %v6592_v54 = vld [vmem:[#allocation72_spill] sm:$0xff] }
 0x239   :  { %2304 = vperm.xlu1 %3728, %v6577_v7   ;;  %v5863_v7 = vpop.permute.xlu0 %1839 }
 0x23b   :  { %2259 = vperm.xlu0 %3727, %v6578_v23   ;;  %v6593_v23 = vld [vmem:[#allocation63_spill] sm:$0xff] }
 0x23d   :  { %2314 = vperm.xlu1 %3728, %v6579_v2  }
 0x23f   :  { %2269 = vperm.xlu0 %3727, %v6580_v27   ;;  %v6595_v27 = vld [vmem:[#allocation74_spill] sm:$0xff] }
 0x241   :  { %2324 = vperm.xlu1 %3728, %v6581_v13   ;;  %v5869_v13 = vpop.permute.xlu0 %1857 }
 0x243   :  { %2279 = vperm.xlu0 %3727, %v6583_v1   ;;  %v6596_v1 = vld [vmem:[#allocation65_spill] sm:$0xff] }
 0x245   :  { %2334 = vperm.xlu1 %3728, %v6584_v59  }
 0x247   :  { %2289 = vperm.xlu0 %3727, %v6585_v5   ;;  %v6598_v5 = vld [vmem:[#allocation76_spill] sm:$0xff] }
 0x248   :  { %v5850_v50 = vpop.permute.xlu1 %1884 }
 0x249   :  { %6586 = vst [vmem:[#allocation14_spill] sm:$0xff] %v5850_v50  ;;  %2344 = vperm.xlu1 %3728, %v6587_v42   ;;  %v5875_v42 = vpop.permute.xlu0 %1875  ;;  %v6605_v50 = vld [vmem:[#allocation80_spill] sm:$0xff] }
 0x24a   :  { %6599 = vst [vmem:[#allocation16_spill] sm:$0xff] %v5875_v42  ;;  %v6608_v42 = vld [vmem:[#allocation82_spill] sm:$0xff] }
 0x24b   :  { %2299 = vperm.xlu0 %3727, %v6588_v33   ;;  %v6600_v33 = vld [vmem:[#allocation67_spill] sm:$0xff] }
 0x24c   :  { %v5854_v26 = vpop.permute.xlu1 %2034 }
 0x24d   :  { %2354 = vperm.xlu1 %3728, %v6589_v43  }
 0x24f   :  { %2309 = vperm.xlu0 %3727, %v6591_v15   ;;  %v6601_v15 = vld [vmem:[#allocation78_spill] sm:$0xff] }
 0x250   :  { %v5860_v20 = vpop.permute.xlu1 %2044 }
 0x251   :  { %2364 = vperm.xlu1 %3728, %v6592_v54  }
 0x253   :  { %2319 = vperm.xlu0 %3727, %v6593_v23   ;;  %v6603_v23 = vld [vmem:[#allocation69_spill] sm:$0xff] }
 0x254   :  { %v5866_v2 = vpop.permute.xlu1 %2054 }
 0x255   :  { %6594 = vst [vmem:[#allocation15_spill] sm:$0xff] %v5866_v2  ;;  %2374 = vperm.xlu1 %3728, %v6595_v27  }
 0x257   :  { %2329 = vperm.xlu0 %3727, %v6596_v1  }
 0x258   :  { %v5872_v59 = vpop.permute.xlu1 %2064 }
 0x259   :  { %6597 = vst [vmem:[#allocation24_spill] sm:$0xff] %v5872_v59  ;;  %2384 = vperm.xlu1 %3728, %v6598_v5   ;;  %v6620_v59 = vld [vmem:[#allocation88_spill] sm:$0xff] }
 0x25b   :  { %2339 = vperm.xlu0 %3727, %v6600_v33  }
 0x25c   :  { %v5878_v43 = vpop.permute.xlu1 %2074 }
 0x25d   :  { %2394 = vperm.xlu1 %3728, %v6601_v15  }
 0x25e   :  { %v5881_v54 = vpop.permute.xlu0 %1893 }
 0x25f   :  { %6602 = vst [vmem:[#allocation26_spill] sm:$0xff] %v5881_v54  ;;  %2349 = vperm.xlu0 %3727, %v6603_v23   ;;  %v6612_v54 = vld [vmem:[#allocation84_spill] sm:$0xff] }
 0x260   :  { %v5884_v27 = vpop.permute.xlu1 %2084 }
 0x261   :  { %6604 = vst [vmem:[#allocation17_spill] sm:$0xff] %v5884_v27  ;;  %2404 = vperm.xlu1 %3728, %v6605_v50  }
 0x262   :  { %v5887_v1 = vpop.permute.xlu0 %2039 }
 0x263   :  { %2359 = vperm.xlu0 %3727, %v6606_v10  }
 0x264   :  { %v5890_v5 = vpop.permute.xlu1 %2094 }
 0x265   :  { %6607 = vst [vmem:[#allocation28_spill] sm:$0xff] %v5890_v5  ;;  %2414 = vperm.xlu1 %3728, %v6608_v42   ;;  %v6625_v5 = vld [vmem:[#allocation81_spill] sm:$0xff] }
 0x266   :  { %v5893_v33 = vpop.permute.xlu0 %2049 }
 0x267   :  { %6609 = vst [vmem:[#allocation19_spill] sm:$0xff] %v5893_v33  ;;  %2369 = vperm.xlu0 %3727, %v6610_v62  }
 0x268   :  { %v5896_v15 = vpop.permute.xlu1 %2104 }
 0x269   :  { %6611 = vst [vmem:[#allocation30_spill] sm:$0xff] %v5896_v15  ;;  %2424 = vperm.xlu1 %3728, %v6612_v54   ;;  %v6621_v15 = vld [vmem:[#allocation79_spill] sm:$0xff] }
 0x26a   :  { %v5899_v23 = vpop.permute.xlu0 %2059 }
 0x26b   :  { %6613 = vst [vmem:[#allocation21_spill] sm:$0xff] %v5899_v23  ;;  %2379 = vperm.xlu0 %3727, %v6614_v28   ;;  %v6623_v23 = vld [vmem:[#allocation90_spill] sm:$0xff] }
 0x26c   :  { %v5902_v50 = vpop.permute.xlu1 %2114 }
 0x26d   :  { %6615 = vst [vmem:[#allocation32_spill] sm:$0xff] %v5902_v50  ;;  %2434 = vperm.xlu1 %3728, %v6616_v4  }
 0x26e   :  { %v5905_v10 = vpop.permute.xlu0 %2069 }
 0x26f   :  { %6617 = vst [vmem:[#allocation23_spill] sm:$0xff] %v5905_v10  ;;  %2389 = vperm.xlu0 %3727, %v6618_v45   ;;  %v6628_v10 = vld [vmem:[#allocation83_spill] sm:$0xff] }
 0x270   :  { %v5908_v42 = vpop.permute.xlu1 %2124 }
 0x271   :  { %6619 = vst [vmem:[#allocation34_spill] sm:$0xff] %v5908_v42  ;;  %2444 = vperm.xlu1 %3728, %v6620_v59   ;;  %v6647_v42 = vld [vmem:[#allocation96_spill] sm:$0xff] }
 0x272   :  { %v5911_v62 = vpop.permute.xlu0 %2079 }
 0x273   :  { %2399 = vperm.xlu0 %3727, %v6621_v15  }
 0x274   :  { %v5914_v54 = vpop.permute.xlu1 %2134 }
 0x275   :  { %6622 = vst [vmem:[#allocation25_spill] sm:$0xff] %v5914_v54  ;;  %2454 = vperm.xlu1 %3728, %v6623_v23   ;;  %v6630_v54 = vld [vmem:[#allocation85_spill] sm:$0xff] }
 0x276   :  { %v5917_v28 = vpop.permute.xlu0 %2089 }
 0x277   :  { %6624 = vst [vmem:[#allocation36_spill] sm:$0xff] %v5917_v28  ;;  %2409 = vperm.xlu0 %3727, %v6625_v5  }
 0x278   :  { %v5920_v4 = vpop.permute.xlu1 %2144 }
 0x279   :  { %6626 = vst [vmem:[#allocation27_spill] sm:$0xff] %v5920_v4  ;;  %2464 = vperm.xlu1 %3728, %v5473_v29   ;;  %v6632_v4 = vld [vmem:[#allocation87_spill] sm:$0xff] }
 0x27a   :  { %v5923_v45 = vpop.permute.xlu0 %2099 }
 0x27b   :  { %6627 = vst [vmem:[#allocation38_spill] sm:$0xff] %v5923_v45  ;;  %2419 = vperm.xlu0 %3727, %v6628_v10   ;;  %v6635_v45 = vld [vmem:[#allocation89_spill] sm:$0xff] }
 0x27c   :  { %v5926_v59 = vpop.permute.xlu1 %2154 }
 0x27d   :  { %2474 = vperm.xlu1 %3728, %v5518_v55  }
 0x27e   :  { %v5929_v15 = vpop.permute.xlu0 %2109 }
 0x27f   :  { %6629 = vst [vmem:[#allocation29_spill] sm:$0xff] %v5929_v15  ;;  %2429 = vperm.xlu0 %3727, %v6630_v54   ;;  %v6638_v15 = vld [vmem:[#allocation91_spill] sm:$0xff] }
 0x280   :  { %v5932_v23 = vpop.permute.xlu1 %2164 }
 0x281   :  { %6631 = vst [vmem:[#allocation40_spill] sm:$0xff] %v5932_v23  ;;  %2484 = vperm.xlu1 %3728, %v5527_v18  }
 0x282   :  { %v5935_v5 = vpop.permute.xlu0 %2119 }
 0x283   :  { %2439 = vperm.xlu0 %3727, %v6632_v4  }
 0x284   :  { %v5938_v29 = vpop.permute.xlu1 %2174 }
 0x285   :  { %6633 = vst [vmem:[#allocation31_spill] sm:$0xff] %v5938_v29  ;;  %2494 = vperm.xlu1 %3728, %v5537_v8  }
 0x286   :  { %v5941_v10 = vpop.permute.xlu0 %2129 }
 0x287   :  { %6634 = vst [vmem:[#allocation42_spill] sm:$0xff] %v5941_v10  ;;  %2449 = vperm.xlu0 %3727, %v6635_v45   ;;  %v4024_v10 = vld [vmem:[#allocation5 + $0x140] sm:$0xff] }
 0x288   :  { %v5944_v55 = vpop.permute.xlu1 %2184 }
 0x289   :  { %6636 = vst [vmem:[#allocation33_spill] sm:$0xff] %v5944_v55  ;;  %2504 = vperm.xlu1 %3728, %v5548_v21   ;;  %v6644_v55 = vld [vmem:[#allocation93_spill] sm:$0xff] }
 0x28a   :  { %v5947_v54 = vpop.permute.xlu0 %2139 }
 0x28b   :  { %6637 = vst [vmem:[#allocation44_spill] sm:$0xff] %v5947_v54  ;;  %2459 = vperm.xlu0 %3727, %v6638_v15   ;;  %v6645_v54 = vld [vmem:[#allocation94_spill] sm:$0xff] }
 0x28c   :  { %v2195_v18 = vpop.permute.xlu1 %2194 }
 0x28d   :  { %2514 = vperm.xlu1 %3728, %v5566_v56  }
 0x28e   :  { %v5951_v4 = vpop.permute.xlu0 %2149 }
 0x28f   :  { %6639 = vst [vmem:[#allocation35_spill] sm:$0xff] %v5951_v4  ;;  %2469 = vperm.xlu0 %3727, %v5477_v37  }
 0x290   :  { %v2205_v8 = vpop.permute.xlu1 %2204 }
 0x291   :  { %2524 = vperm.xlu1 %3728, %v5582_v31  }
 0x292   :  { %v5955_v29 = vpop.permute.xlu0 %2159 }
 0x293   :  { %2479 = vperm.xlu0 %3727, %v5523_v46  }
 0x294   :  { %v5958_v45 = vpop.permute.xlu1 %2214 }
 0x295   :  { %2534 = vperm.xlu1 %3728, %v5594_v52  }
 0x296   :  { %v5961_v21 = vpop.permute.xlu0 %2169 }
 0x297   :  { %6640 = vst [vmem:[#allocation46_spill] sm:$0xff] %v5961_v21  ;;  %2489 = vperm.xlu0 %3727, %v5533_v32   ;;  %v6643_v32 = vld [vmem:[#allocation92_spill] sm:$0xff] }
 0x298   :  { %v5964_v56 = vpop.permute.xlu1 %2224 }
 0x299   :  { %2544 = vperm.xlu1 %3728, %v5608_v63  }
 0x29a   :  { %v5967_v37 = vpop.permute.xlu0 %2179 }
 0x29b   :  { %6641 = vst [vmem:[#allocation37_spill] sm:$0xff] %v5967_v37  ;;  %2499 = vperm.xlu0 %3727, %v5541_v47  }
 0x29c   :  { %v2235_v31 = vpop.permute.xlu1 %2234 }
 0x29d   :  { %2554 = vperm.xlu1 %3728, %v5631_v49   ;;  %v2712_v28 = vmul.f32 %v4024_v10, %v2235_v31 }
 0x29e   :  { %v5971_v46 = vpop.permute.xlu0 %2189 }
 0x29f   :  { %6642 = vst [vmem:[#allocation48_spill] sm:$0xff] %v5971_v46  ;;  %2509 = vperm.xlu0 %3727, %v5554_v6  }
 0x2a0   :  { %v2245_v52 = vpop.permute.xlu1 %2244 }
 0x2a1   :  { %2564 = vperm.xlu1 %3728, %v5638_v44   ;;  %v6646_v44 = vld [vmem:[#allocation95_spill] sm:$0xff] }
 0x2a2   :  { %v2200_v15 = vpop.permute.xlu0 %2199 }
 0x2a3   :  { %2519 = vperm.xlu0 %3727, %v6643_v32  }
 0x2a4   :  { %v2255_v4 = vpop.permute.xlu1 %2254 }
 0x2a5   :  { %2574 = vperm.xlu1 %3728, %v5651_v48   ;;  %v4022_v48 = vld [vmem:[#allocation5 + $0x108] sm:$0xff] }
 0x2a6   :  { %v2210_v63 = vpop.permute.xlu0 %2209  ;;  %v2705_v37 = vmul.f32 %v4022_v48, %v2200_v15  ;;  %v4027_v15 = vld [vmem:[#allocation5 + $0x110] sm:$0xff] }
 0x2a7   :  { %2529 = vperm.xlu0 %3727, %v6644_v55   ;;  %v4023_v55 = vld [vmem:[#allocation5 + $0x100] sm:$0xff]  ;;  %v2706_v48 = vmul.f32 %v4027_v15, %v2205_v8 }
 0x2a8   :  { %v2265_v47 = vpop.permute.xlu1 %2264  ;;  %v2704_v2 = vmul.f32 %v4023_v55, %v2195_v18  ;;  %v4028_v18 = vld [vmem:[#allocation5 + $0x158] sm:$0xff] }
 0x2a9   :  { %2584 = vperm.xlu1 %3728, %v5669_v19  }
 0x2aa   :  { %v2220_v49 = vpop.permute.xlu0 %2219  ;;  %v2852_v33 = vadd.f32 %v2705_v37, %v2704_v2  ;;  %v4030_v2 = vld [vmem:[#allocation5 + $0x160] sm:$0xff] }
 0x2ab   :  { %2539 = vperm.xlu0 %3727, %v6645_v54   ;;  %v4025_v54 = vld [vmem:[#allocation5 + $0x148] sm:$0xff] }
 0x2ac   :  { %v5980_v46 = vpop.permute.xlu1 %2274  ;;  %v2853_v31 = vadd.f32 %v2852_v33, %v2706_v48 }
 0x2ad   :  { %2594 = vperm.xlu1 %3728, %v5694_v12  }
 0x2ae   :  { %v5983_v6 = vpop.permute.xlu0 %2229 }
 0x2af   :  { %2549 = vperm.xlu0 %3727, %v6646_v44   ;;  %v4026_v44 = vld [vmem:[#allocation5 + $0x150] sm:$0xff] }
 0x2b0   :  { %v5986_v32 = vpop.permute.xlu1 %2284  ;;  %v2714_v27 = vmul.f32 %v4026_v44, %v2245_v52 }
 0x2b1   :  { %2604 = vperm.xlu1 %3728, %v5701_v9  }
 0x2b2   :  { %v2240_v19 = vpop.permute.xlu0 %2239 }
 0x2b3   :  { %v2713_v21 = vmul.f32 %v4025_v54, %v2240_v19  ;;  %2559 = vperm.xlu0 %3727, %v6647_v42   ;;  %v4029_v42 = vld [vmem:[#allocation5 + $0x118] sm:$0xff]  ;;  %v6648_v54 = vld [vmem:[#allocation97_spill] sm:$0xff] }
 0x2b4   :  { %v5990_v12 = vpop.permute.xlu1 %2294  ;;  %v2707_v19 = vmul.f32 %v4029_v42, %v2210_v63  ;;  %v4033_v63 = vld [vmem:[#allocation5 + $0x120] sm:$0xff] }
 0x2b5   :  { %2634 = vperm.xlu1 %3728, %v5744_v53   ;;  %v2865_v23 = vadd.f32 %v2713_v21, %v2712_v28  ;;  %v2716_v53 = vmul.f32 %v4030_v2, %v2255_v4  ;;  %v4031_v21 = vld [vmem:[#allocation5 + $0x168] sm:$0xff] }
 0x2b6   :  { %v2250_v9 = vpop.permute.xlu0 %2249  ;;  %v4037_v2 = vld [vmem:[#allocation5 + $0x188] sm:$0xff] }
 0x2b7   :  { %v2866_v50 = vadd.f32 %v2865_v23, %v2714_v27  ;;  %v2715_v55 = vmul.f32 %v4028_v18, %v2250_v9  ;;  %2569 = vperm.xlu0 %3727, %v5646_v30   ;;  %v2854_v23 = vadd.f32 %v2853_v31, %v2707_v19  ;;  %v4032_v30 = vld [vmem:[#allocation5 + $0x170] sm:$0xff] }
 0x2b8   :  { %v5994_v10 = vpop.permute.xlu1 %2304  ;;  %v2718_v33 = vmul.f32 %v4032_v30, %v2265_v47  ;;  %v4036_v47 = vld [vmem:[#allocation5 + $0x180] sm:$0xff]  ;;  %v4041_v30 = vld [vmem:[#allocation5 + $0x138] sm:$0xff] }
 0x2b9   :  { %2644 = vperm.xlu1 %3728, %v5751_v22   ;;  %v2867_v37 = vadd.f32 %v2866_v50, %v2715_v55  ;;  %v2708_v22 = vmul.f32 %v4033_v63, %v5958_v45  ;;  %v4034_v50 = vld [vmem:[#allocation5 + $0x178] sm:$0xff]  ;;  %v4035_v55 = vld [vmem:[#allocation5 + $0x128] sm:$0xff]  ;;  %v2720_v19 = vmul.f32 %v4036_v47, %v5980_v46 }
 0x2ba   :  { %v2260_v52 = vpop.permute.xlu0 %2259  ;;  %v2709_v42 = vmul.f32 %v4035_v55, %v2220_v49 }
 0x2bb   :  { %v2868_v28 = vadd.f32 %v2867_v37, %v2716_v53  ;;  %v2717_v8 = vmul.f32 %v4031_v21, %v2260_v52  ;;  %2579 = vperm.xlu0 %3727, %v6648_v54   ;;  %v2855_v18 = vadd.f32 %v2854_v23, %v2708_v22  ;;  %v4040_v54 = vld [vmem:[#allocation5 + $0x198] sm:$0xff]  ;;  %v4043_v22 = vld [vmem:[#allocation5 + $0x1a8] sm:$0xff] }
 0x2bc   :  { %v5998_v27 = vpop.permute.xlu1 %2314 }
 0x2bd   :  { %2614 = vperm.xlu1 %3728, %v5712_v38   ;;  %v2869_v44 = vadd.f32 %v2868_v28, %v2717_v8  ;;  %v2856_v37 = vadd.f32 %v2855_v18, %v2709_v42  ;;  %v4039_v28 = vld [vmem:[#allocation5 + $0x130] sm:$0xff] }
 0x2be   :  { %v2270_v15 = vpop.permute.xlu0 %2269 }
 0x2bf   :  { %v2870_v4 = vadd.f32 %v2869_v44, %v2718_v33  ;;  %v2719_v48 = vmul.f32 %v4034_v50, %v2270_v15  ;;  %2589 = vperm.xlu0 %3727, %v5679_v25   ;;  %v4038_v25 = vld [vmem:[#allocation5 + $0x190] sm:$0xff]  ;;  %v2711_v33 = vmul.f32 %v4041_v30, %v5983_v6 }
 0x2c0   :  { %v6003_v9 = vpop.permute.xlu1 %2324  ;;  %v2722_v52 = vmul.f32 %v4038_v25, %v5986_v32  ;;  %v4046_v25 = vld [vmem:[#allocation5 + $0x1c0] sm:$0xff] }
 0x2c1   :  { %2619 = vperm.xlu1 %3728, %v5715_v36   ;;  %v2871_v38 = vadd.f32 %v2870_v4, %v2719_v48  ;;  %v2710_v36 = vmul.f32 %v4039_v28, %v5964_v56  ;;  %v4044_v48 = vld [vmem:[#allocation5 + $0x1b0] sm:$0xff] }
 0x2c2   :  { %v2280_v31 = vpop.permute.xlu0 %2279  ;;  %v2726_v6 = vmul.f32 %v4044_v48, %v5994_v10 }
 0x2c3   :  { %v2721_v45 = vmul.f32 %v4037_v2, %v2280_v31  ;;  %2599 = vperm.xlu0 %3727, %v5697_v39   ;;  %v2857_v39 = vadd.f32 %v2856_v37, %v2710_v36 }
 0x2c4   :  { %v6008_v53 = vpop.permute.xlu1 %2334 }
 0x2c5   :  { %2624 = vperm.xlu1 %3728, %v5726_v14   ;;  %v2878_v49 = vadd.f32 %v2721_v45, %v2720_v19  ;;  %v4042_v14 = vld [vmem:[#allocation5 + $0x1a0] sm:$0xff]  ;;  %v2858_v50 = vadd.f32 %v2857_v39, %v2711_v33  ;;  %v3421_v19 = vld [vmem:[#allocation3 + $0x2] sm:$0x1] }
 0x2c6   :  { %v2290_v21 = vpop.permute.xlu0 %2289  ;;  %v2724_v32 = vmul.f32 %v4042_v14, %v5990_v12  ;;  %v4045_v12 = vld [vmem:[#allocation5 + $0x1b8] sm:$0xff] }
 0x2c7   :  { %v2879_v8 = vadd.f32 %v2878_v49, %v2722_v52  ;;  %v2723_v46 = vmul.f32 %v4040_v54, %v2290_v21  ;;  %2609 = vperm.xlu0 %3727, %v5705_v17   ;;  %v3419_v17 = vld [vmem:[#allocation3] sm:$0x1]  ;;  %v2728_v52 = vmul.f32 %v4046_v25, %v5998_v27  ;;  %v4047_v49 = vld [vmem:[#allocation5 + $0x1c8] sm:$0xff]  ;;  %v3423_v21 = vld [vmem:[#allocation3 + $0x4] sm:$0x1] }
 0x2c8   :  { %v6014_v23 = vpop.permute.xlu1 %2344  ;;  %v4049_v14 = vld [vmem:[#allocation5 + $0x1d8] sm:$0xff] }
 0x2c9   :  { %2629 = vperm.xlu1 %3728, %v5732_v60   ;;  %v2880_v44 = vadd.f32 %v2879_v8, %v2723_v46  ;;  %v2872_v60 = vrot.slane %v2871_v38, 4  ;;  %v4048_v8 = vld [vmem:[#allocation5 + $0x1d0] sm:$0xff] }
 0x2ca   :  { %v2300_v63 = vpop.permute.xlu0 %2299  ;;  %v2730_v54 = vmul.f32 %v4048_v8, %v6003_v9 }
 0x2cb   :  { %v2881_v56 = vadd.f32 %v2880_v44, %v2724_v32  ;;  %v2725_v15 = vmul.f32 %v4043_v22, %v2300_v63  ;;  %2639 = vperm.xlu0 %3727, %v5746_v41   ;;  %v2859_v41 = vrot.slane %v2858_v50, 4  ;;  %v2873_v45 = vadd.f32 %v2872_v60, %v2871_v38  ;;  %v4050_v22 = vld [vmem:[#allocation5 + $0x1e0] sm:$0xff] }
 0x2cc   :  { %v6020_v4 = vpop.permute.xlu1 %2354  ;;  %v4204_v44 = vmov 1966171168  }
 0x2cd   :  { %3437 = vperm.xlu1 %3728, %v3419_v17   ;;  %v2882_v18 = vadd.f32 %v2881_v56, %v2725_v15  ;;  %v2874_v39 = vrot.slane %v2873_v45, 2  ;;  %v1904_v63 = vunpack.c.l.s4 %v4204_v44  ;;  %v2732_v15 = vmul.f32 %v4050_v22, %v6008_v53 }
 0x2ce   :  { %v2310_v55 = vpop.permute.xlu0 %2309  ;;  %v6649_v53 = vmov 0.0  }
 0x2cf   :  { %v2883_v42 = vadd.f32 %v2882_v18, %v2726_v6  ;;  %v2727_v31 = vmul.f32 %v4045_v12, %v2310_v55  ;;  %2649 = vperm.xlu0 %3727, %v5756_v35   ;;  %v2860_v35 = vadd.f32 %v2859_v41, %v2858_v50  ;;  %v2875_v17 = vadd.f32 %v2874_v39, %v2873_v45  ;;  %v4051_v18 = vld [vmem:[#allocation5 + $0x1e8] sm:$0xff]  ;;  %v3427_v55 = vld [vmem:[#allocation3 + $0x8] sm:$0x1] }
 0x2d0   :  { %v6024_v47 = vpop.permute.xlu1 %2364 }
 0x2d1   :  { %3455 = vperm.xlu1 %3728, %v3421_v19   ;;  %v2884_v2 = vadd.f32 %v2883_v42, %v2727_v31  ;;  %v2861_v56 = vrot.slane %v2860_v35, 2  ;;  %v1905_v42 = vunpack.c.0.s8 %v1904_v63  ;;  %v4052_v31 = vld [vmem:[#allocation5 + $0x1f0] sm:$0xff]  ;;  %v2876_v45 = vrot.slane %v2875_v17, 1  ;;  %v3431_v63 = vld [vmem:[#allocation3 + $0xc] sm:$0x1] }
 0x2d2   :  { %v2320_v37 = vpop.permute.xlu0 %2319  ;;  %v2734_v19 = vmul.f32 %v4052_v31, %v6014_v23 }
 0x2d3   :  { %v2885_v10 = vrot.slane %v2884_v2, 4  ;;  %v2729_v28 = vmul.f32 %v4047_v49, %v2320_v37  ;;  %2654 = vperm.xlu0 %3727, %v5760_v3   ;;  %v3425_v3 = vld [vmem:[#allocation3 + $0x6] sm:$0x1]  ;;  %v2862_v12 = vadd.f32 %v2861_v56, %v2860_v35 }
 0x2d4   :  { %v6028_v36 = vpop.permute.xlu1 %2374 }
 0x2d5   :  { %3473 = vperm.xlu1 %3728, %v3423_v21   ;;  %v2891_v46 = vadd.f32 %v2729_v28, %v2728_v52  ;;  %v2886_v30 = vadd.f32 %v2885_v10, %v2884_v2  ;;  %v1902_v2 = vcombine.high %v6649_v53, %v6649_v53  ;;  %v4053_v10 = vld [vmem:[#allocation5 + $0x1f8] sm:$0xff]  ;;  %v6650_v21 = vld [vmem:[#allocation11_spill] sm:$0xff]  ;;  %v2863_v8 = vrot.slane %v2862_v12, 1 }
 0x2d6   :  { %v2330_v38 = vpop.permute.xlu0 %2329  ;;  %v3429_v28 = vld [vmem:[#allocation3 + $0xa] sm:$0x1]  ;;  %v6045_v35 = vsub.s32 %v1905_v42, %v6650_v21 }
 0x2d7   :  { %v2892_v33 = vadd.f32 %v2891_v46, %v2730_v54  ;;  %v2731_v27 = vmul.f32 %v4049_v14, %v2330_v38  ;;  %2659 = vperm.xlu0 %3727, %v5767_v58   ;;  %v2887_v48 = vrot.slane %v2886_v30, 2  ;;  %v2877_v46 = vadd.f32 %v2876_v45, %v2875_v17  ;;  %v3420_v38 = vld [vmem:[#allocation3 + $0x1] sm:$0x1]  ;;  %v4057_v42 = vld [vmem:[#allocation5 + $0x218] sm:$0xff] }
 0x2d8   :  { %v6032_v32 = vpop.permute.xlu1 %2384  ;;  %v1916_v54 = vrot.slane %v1902_v2, %v6045_v35  ;;  %v2864_v22 = vadd.f32 %v2863_v8, %v2862_v12  ;;  %v1809_v2 = vrot.slane %v5825_v51, %v4428_v34 }
 0x2d9   :  { %3491 = vperm.xlu1 %3728, %v3425_v3   ;;  %v2893_v9 = vadd.f32 %v2892_v33, %v2731_v27  ;;  %v2888_v25 = vadd.f32 %v2887_v48, %v2886_v30  ;;  %v4054_v33 = vld [vmem:[#allocation5 + $0x200] sm:$0xff]  ;;  %v3100_v48 = vrot.slane %v2877_v46, %v6045_v35 }
 0x2da   :  { %v2340_v50 = vpop.permute.xlu0 %2339  ;;  %v2736_v14 = vmul.f32 %v4054_v33, %v6020_v4  ;;  %v1918_v56 = vcombine.high %v1916_v54, %v1916_v54  ;;  %v6056_v12 = vrot.slane %v1916_v54, %v6045_v35  ;;  %v3086_v45 = vrot.slane %v2864_v22, %v6045_v35 }
 0x2db   :  { %v2894_v6 = vadd.f32 %v2893_v9, %v2732_v15  ;;  %v2733_v60 = vmul.f32 %v4051_v18, %v2340_v50  ;;  %2664 = vperm.xlu0 %3727, %v5771_v61   ;;  %v2889_v30 = vrot.slane %v2888_v25, 1  ;;  %v4056_v15 = vld [vmem:[#allocation5 + $0x210] sm:$0xff]  ;;  %v3107_v21 = vrot.slane %v3100_v48, %v6045_v35 }
 0x2dc   :  { %v6036_v58 = vpop.permute.xlu1 %2394  ;;  %v2738_v9 = vmul.f32 %v4056_v15, %v6024_v47  ;;  %v3422_v18 = vld [vmem:[#allocation3 + $0x3] sm:$0x1]  ;;  %v6059_v47 = vrot.slane %v1918_v56, %v6045_v35 }
 0x2dd   :  { %3509 = vperm.xlu1 %3728, %v3427_v55   ;;  %v2895_v41 = vadd.f32 %v2894_v6, %v2733_v60  ;;  %v2890_v4 = vadd.f32 %v2889_v30, %v2888_v25 }
 0x2de   :  { %v2350_v37 = vpop.permute.xlu0 %2349  ;;  %v2021_v30 = vmul.f32 %v6059_v47, %v1809_v2  ;;  %v6080_v33 = vcombine.high %v6059_v47, %v6059_v47 }
 0x2df   :  { %v2896_v52 = vadd.f32 %v2895_v41, %v2734_v19  ;;  %v2735_v49 = vmul.f32 %v4053_v10, %v2350_v37  ;;  %2669 = vperm.xlu0 %3727, %v5778_v24   ;;  %v4055_v24 = vld [vmem:[#allocation5 + $0x208] sm:$0xff]  ;;  %v3433_v41 = vld [vmem:[#allocation3 + $0xe] sm:$0x1]  ;;  %v4058_v37 = vld [vmem:[#allocation5 + $0x220] sm:$0xff]  ;;  %v3114_v51 = vrot.slane %v2890_v4, %v6045_v35 }
 0x2e0   :  { %v6042_v61 = vpop.permute.xlu1 %2404  ;;  %v2740_v25 = vmul.f32 %v4058_v37, %v6028_v36  ;;  %v3269_v15 = vadd.f32 %v3107_v21, %v2021_v30 }
 0x2e1   :  { %3527 = vperm.xlu1 %3728, %v3429_v28   ;;  %v2897_v23 = vadd.f32 %v2896_v52, %v2735_v49  ;;  %v1800_v49 = vrot.slane %v5819_v0, %v4428_v34  ;;  %v6069_v28 = vcombine.high %v6056_v12, %v6056_v12  ;;  %v1818_v0 = vrot.slane %v5829_v11, %v4428_v34 }
 0x2e2   :  { %v2360_v39 = vpop.permute.xlu0 %2359  ;;  %v3121_v11 = vrot.slane %v3114_v51, %v6045_v35 }
 0x2e3   :  { %v2898_v27 = vrot.slane %v2897_v23, 4  ;;  %v2737_v3 = vmul.f32 %v4055_v24, %v2360_v39  ;;  %3446 = vperm.xlu0 %3727, %v3420_v38   ;;  %v4059_v39 = vld [vmem:[#allocation5 + $0x228] sm:$0xff]  ;;  %v4060_v24 = vld [vmem:[#allocation5 + $0x230] sm:$0xff]  ;;  %v2020_v22 = vmul.f32 %v6056_v12, %v1800_v49 }
 0x2e4   :  { %v6049_v44 = vpop.permute.xlu1 %2414  ;;  %v4063_v49 = vld [vmem:[#allocation5 + $0x248] sm:$0xff] }
 0x2e5   :  { %3545 = vperm.xlu1 %3728, %v3431_v63   ;;  %v2899_v17 = vadd.f32 %v2898_v27, %v2897_v23  ;;  %v2904_v50 = vadd.f32 %v2737_v3, %v2736_v14  ;;  %v3424_v23 = vld [vmem:[#allocation3 + $0x5] sm:$0x1]  ;;  %v3093_v14 = vrot.slane %v3086_v45, %v6045_v35  ;;  %v1827_v27 = vrot.slane %v5833_v40, %v4428_v34  ;;  %v3428_v45 = vld [vmem:[#allocation3 + $0x9] sm:$0x1] }
 0x2e6   :  { %v2370_v6 = vpop.permute.xlu0 %2369  ;;  %v2742_v3 = vmul.f32 %v4060_v24, %v6032_v32  ;;  %v2022_v32 = vmul.f32 %v6069_v28, %v1818_v0 }
 0x2e7   :  { %v2900_v60 = vrot.slane %v2899_v17, 2  ;;  %v2905_v55 = vadd.f32 %v2904_v50, %v2738_v9  ;;  %v2739_v31 = vmul.f32 %v4057_v42, %v2370_v6  ;;  %3464 = vperm.xlu0 %3727, %v3422_v18   ;;  %v4061_v6 = vld [vmem:[#allocation5 + $0x238] sm:$0xff]  ;;  %v3268_v40 = vadd.f32 %v3093_v14, %v2020_v22 }
 0x2e8   :  { %v6053_v19 = vpop.permute.xlu1 %2424  ;;  %v4065_v14 = vld [vmem:[#allocation5 + $0x258] sm:$0xff] }
 0x2e9   :  { %3563 = vperm.xlu1 %3728, %v3433_v41   ;;  %v2901_v52 = vadd.f32 %v2900_v60, %v2899_v17  ;;  %v2906_v10 = vadd.f32 %v2905_v55, %v2739_v31  ;;  %v3426_v17 = vld [vmem:[#allocation3 + $0x7] sm:$0x1]  ;;  %v2023_v60 = vmul.f32 %v6080_v33, %v1827_v27  ;;  %v4062_v31 = vld [vmem:[#allocation5 + $0x240] sm:$0xff]  ;;  %v3298_v37 = vcombine.low %v3268_v40, %v3269_v15 }
 0x2ea   :  { %v2380_v8 = vpop.permute.xlu0 %2379  ;;  %v2744_v41 = vmul.f32 %v4062_v31, %v6036_v58  ;;  %v4069_v31 = vld [vmem:[#allocation5 + $0x278] sm:$0xff] }
 0x2eb   :  { %v2902_v54 = vrot.slane %v2901_v52, 1  ;;  %v2907_v46 = vadd.f32 %v2906_v10, %v2740_v25  ;;  %v2741_v38 = vmul.f32 %v4059_v39, %v2380_v8  ;;  %3482 = vperm.xlu0 %3727, %v3424_v23   ;;  %v3270_v25 = vadd.f32 %v3121_v11, %v2022_v32  ;;  %v4064_v23 = vld [vmem:[#allocation5 + $0x250] sm:$0xff] }
 0x2ec   :  { %v6073_v36 = vpop.permute.xlu1 %2434  ;;  %v2746_v51 = vmul.f32 %v4064_v23, %v6042_v61  ;;  %v6097_v30 = vrot.slane %v3298_v37, %v6045_v35 }
 0x2ed   :  { %v2903_v63 = vadd.f32 %v2902_v54, %v2901_v52  ;;  %v2908_v56 = vadd.f32 %v2907_v46, %v2741_v38  ;;  %v3430_v38 = vld [vmem:[#allocation3 + $0xb] sm:$0x1] }
 0x2ee   :  { %v2390_v9 = vpop.permute.xlu0 %2389 }
 0x2ef   :  { %v3128_v50 = vrot.slane %v2903_v63, %v6045_v35  ;;  %v2909_v48 = vadd.f32 %v2908_v56, %v2742_v3  ;;  %v2743_v18 = vmul.f32 %v4061_v6, %v2390_v9  ;;  %3500 = vperm.xlu0 %3727, %v3426_v17   ;;  %v4066_v63 = vld [vmem:[#allocation5 + $0x260] sm:$0xff]  ;;  %v3432_v9 = vld [vmem:[#allocation3 + $0xd] sm:$0x1] }
 0x2f0   :  { %v6089_v4 = vpop.permute.xlu1 %2444  ;;  %v2748_v56 = vmul.f32 %v4066_v63, %v6049_v44  ;;  %v4073_v63 = vld [vmem:[#allocation5 + $0x298] sm:$0xff] }
 0x2f1   :  { %v3135_v55 = vrot.slane %v3128_v50, %v6045_v35  ;;  %v2910_v42 = vadd.f32 %v2909_v48, %v2743_v18  ;;  %v4067_v50 = vld [vmem:[#allocation5 + $0x268] sm:$0xff]  ;;  %v4068_v18 = vld [vmem:[#allocation5 + $0x270] sm:$0xff] }
 0x2f2   :  { %v2400_v2 = vpop.permute.xlu0 %2399  ;;  %v2750_v40 = vmul.f32 %v4068_v18, %v6053_v19 }
 0x2f3   :  { %v3271_v52 = vadd.f32 %v3135_v55, %v2023_v60  ;;  %v2911_v10 = vrot.slane %v2910_v42, 4  ;;  %v2745_v21 = vmul.f32 %v4063_v49, %v2400_v2  ;;  %3518 = vperm.xlu0 %3727, %v3428_v45   ;;  %v3434_v55 = vld [vmem:[#allocation3 + $0xf] sm:$0x1] }
 0x2f4   :  { %v2455_v8 = vpop.permute.xlu1 %2454 }
 0x2f5   :  { %v2917_v54 = vadd.f32 %v2745_v21, %v2744_v41  ;;  %v3299_v46 = vcombine.low %v3270_v25, %v3271_v52  ;;  %v2912_v58 = vadd.f32 %v2911_v10, %v2910_v42  ;;  %v4070_v52 = vld [vmem:[#allocation5 + $0x280] sm:$0xff]  ;;  %v4071_v21 = vld [vmem:[#allocation5 + $0x288] sm:$0xff] }
 0x2f6   :  { %v2410_v39 = vpop.permute.xlu0 %2409  ;;  %v2752_v10 = vmul.f32 %v4070_v52, %v6073_v36 }
 0x2f7   :  { %v2918_v0 = vadd.f32 %v2917_v54, %v2746_v51  ;;  %v2747_v27 = vmul.f32 %v4065_v14, %v2410_v39  ;;  %3536 = vperm.xlu0 %3727, %v3430_v38   ;;  %v6100_v3 = vrot.slane %v3299_v46, %v6045_v35  ;;  %v2913_v17 = vrot.slane %v2912_v58, 2  ;;  %v4072_v51 = vld [vmem:[#allocation5 + $0x290] sm:$0xff] }
 0x2f8   :  { %v2465_v24 = vpop.permute.xlu1 %2464  ;;  %v2754_v54 = vmul.f32 %v4072_v51, %v6089_v4  ;;  %v1909_v38 = vrot.slane %v6649_v53, %v6045_v35 }
 0x2f9   :  { %v2919_v61 = vadd.f32 %v2918_v0, %v2747_v27  ;;  %v3329_v22 = vcombine.low %v6097_v30, %v6100_v3  ;;  %v2914_v44 = vadd.f32 %v2913_v17, %v2912_v58 }
 0x2fa   :  { %v2420_v15 = vpop.permute.xlu0 %2419 }
 0x2fb   :  { %v2920_v11 = vadd.f32 %v2919_v61, %v2748_v56  ;;  %v2749_v48 = vmul.f32 %v4067_v50, %v2420_v15  ;;  %3554 = vperm.xlu0 %3727, %v3432_v9   ;;  %v2915_v25 = vrot.slane %v2914_v44, 1  ;;  %v4074_v61 = vld [vmem:[#allocation5 + $0x2a0] sm:$0xff] }
 0x2fc   :  { %v6105_v6 = vpop.permute.xlu1 %2474  ;;  %v2756_v15 = vmul.f32 %v4074_v61, %v2455_v8 }
 0x2fd   :  { %v2921_v32 = vadd.f32 %v2920_v11, %v2749_v48  ;;  %v2916_v0 = vadd.f32 %v2915_v25, %v2914_v44  ;;  %v1917_v11 = vcombine.high %v1909_v38, %v1909_v38  ;;  %v4076_v44 = vld [vmem:[#allocation5 + $0x2b0] sm:$0xff] }
 0x2fe   :  { %v2430_v60 = vpop.permute.xlu0 %2429 }
 0x2ff   :  { %v2922_v42 = vadd.f32 %v2921_v32, %v2750_v40  ;;  %v2751_v41 = vmul.f32 %v4069_v31, %v2430_v60  ;;  %3572 = vperm.xlu0 %3727, %v3434_v55   ;;  %v3142_v4 = vrot.slane %v2916_v0, %v6045_v35  ;;  %v4075_v40 = vld [vmem:[#allocation5 + $0x2a8] sm:$0xff]  ;;  %v1836_v60 = vrot.slane %v5837_v16, %v4428_v34  ;;  %v4077_v16 = vld [vmem:[#allocation5 + $0x2b8] sm:$0xff] }
 0x300   :  { %v6108_v2 = vpop.permute.xlu1 %2484  ;;  %v1845_v55 = vrot.slane %v5863_v7, %v4428_v34 }
 0x301   :  { %v2923_v45 = vadd.f32 %v2922_v42, %v2751_v41  ;;  %v2758_v42 = vmul.f32 %v4076_v44, %v2465_v24  ;;  %v6122_v41 = vrot.slane %v1917_v11, %v6045_v35  ;;  %v3149_v25 = vrot.slane %v3142_v4, %v6045_v35 }
 0x302   :  { %v2440_v37 = vpop.permute.xlu0 %2439 }
 0x303   :  { %v2924_v49 = vrot.slane %v2923_v45, 4  ;;  %v2753_v23 = vmul.f32 %v4071_v21, %v2440_v37  ;;  %v2025_v24 = vmul.f32 %v6122_v41, %v1845_v55 }
 0x304   :  { %v6111_v19 = vpop.permute.xlu1 %2494 }
 0x305   :  { %v2925_v46 = vadd.f32 %v2924_v49, %v2923_v45  ;;  %v2930_v39 = vadd.f32 %v2753_v23, %v2752_v10  ;;  %v6125_v45 = vrot.slane %v1909_v38, %v6045_v35 }
 0x306   :  { %v2450_v58 = vpop.permute.xlu0 %2449 }
 0x307   :  { %v2926_v14 = vrot.slane %v2925_v46, 2  ;;  %v2931_v27 = vadd.f32 %v2930_v39, %v2754_v54  ;;  %v2755_v56 = vmul.f32 %v4073_v63, %v2450_v58  ;;  %v2024_v7 = vmul.f32 %v6125_v45, %v1836_v60  ;;  %v4078_v54 = vld [vmem:[#allocation5 + $0x2c0] sm:$0xff] }
 0x308   :  { %v2505_v36 = vpop.permute.xlu1 %2504 }
 0x309   :  { %v2927_v9 = vadd.f32 %v2926_v14, %v2925_v46  ;;  %v2932_v17 = vadd.f32 %v2931_v27, %v2755_v56  ;;  %v2760_v46 = vmul.f32 %v4078_v54, %v6105_v6  ;;  %v6133_v38 = vadd.f32 %v3149_v25, %v2024_v7  ;;  %v4079_v14 = vld [vmem:[#allocation5 + $0x2c8] sm:$0xff]  ;;  %v4080_v56 = vld [vmem:[#allocation5 + $0x2d0] sm:$0xff]  ;;  %v4081_v6 = vld [vmem:[#allocation5 + $0x2d8] sm:$0xff] }
 0x30a   :  { %v2460_v50 = vpop.permute.xlu0 %2459  ;;  %v2762_v61 = vmul.f32 %v4080_v56, %v6108_v2  ;;  %v4086_v54 = vld [vmem:[#allocation5 + $0x300] sm:$0xff]  ;;  %v4088_v56 = vld [vmem:[#allocation5 + $0x310] sm:$0xff] }
 0x30b   :  { %v2928_v48 = vrot.slane %v2927_v9, 1  ;;  %v2933_v18 = vadd.f32 %v2932_v17, %v2756_v15  ;;  %v2757_v32 = vmul.f32 %v4075_v40, %v2460_v50 }
 0x30c   :  { %v2515_v53 = vpop.permute.xlu1 %2514 }
 0x30d   :  { %v2929_v8 = vadd.f32 %v2928_v48, %v2927_v9  ;;  %v2934_v31 = vadd.f32 %v2933_v18, %v2757_v32  ;;  %v4082_v18 = vld [vmem:[#allocation5 + $0x2e0] sm:$0xff] }
 0x30e   :  { %v2470_v37 = vpop.permute.xlu0 %2469  ;;  %v2764_v40 = vmul.f32 %v4082_v18, %v6111_v19 }
 0x30f   :  { %v3156_v52 = vrot.slane %v2929_v8, %v6045_v35  ;;  %v2935_v10 = vadd.f32 %v2934_v31, %v2758_v42  ;;  %v2759_v49 = vmul.f32 %v4077_v16, %v2470_v37  ;;  %v4083_v42 = vld [vmem:[#allocation5 + $0x2e8] sm:$0xff]  ;;  %v4084_v31 = vld [vmem:[#allocation5 + $0x2f0] sm:$0xff] }
 0x310   :  { %v2525_v21 = vpop.permute.xlu1 %2524  ;;  %v2766_v37 = vmul.f32 %v4084_v31, %v2505_v36 }
 0x311   :  { %v3163_v23 = vrot.slane %v3156_v52, %v6045_v35  ;;  %v2936_v51 = vadd.f32 %v2935_v10, %v2759_v49  ;;  %v4085_v49 = vld [vmem:[#allocation5 + $0x2f8] sm:$0xff]  ;;  %v2770_v36 = vmul.f32 %v4088_v56, %v2525_v21  ;;  %v4091_v21 = vld [vmem:[#allocation5 + $0x328] sm:$0xff] }
 0x312   :  { %v2480_v39 = vpop.permute.xlu0 %2479  ;;  %v4094_v56 = vld [vmem:[#allocation5 + $0x8] sm:$0xff] }
 0x313   :  { %v6135_v58 = vadd.f32 %v3163_v23, %v2025_v24  ;;  %v2937_v0 = vrot.slane %v2936_v51, 4  ;;  %v2761_v27 = vmul.f32 %v4079_v14, %v2480_v39 }
 0x314   :  { %v2535_v63 = vpop.permute.xlu1 %2534 }
 0x315   :  { %v2943_v15 = vadd.f32 %v2761_v27, %v2760_v46  ;;  %v3345_v9 = vcombine.low %v6133_v38, %v6135_v58  ;;  %v2938_v11 = vadd.f32 %v2937_v0, %v2936_v51  ;;  %v2768_v46 = vmul.f32 %v4086_v54, %v2515_v53  ;;  %v4087_v0 = vld [vmem:[#allocation5 + $0x308] sm:$0xff]  ;;  %v4110_v38 = vld [vmem:[#allocation5 + $0x90] sm:$0xff] }
 0x316   :  { %v2490_v17 = vpop.permute.xlu0 %2489  ;;  %v6655_v58 = vld [vmem:[#allocation34_spill] sm:$0xff] }
 0x317   :  { %v2944_v50 = vadd.f32 %v2943_v15, %v2762_v61  ;;  %v2763_v4 = vmul.f32 %v4081_v6, %v2490_v17  ;;  %v2939_v55 = vrot.slane %v2938_v11, 2 }
 0x318   :  { %v2545_v48 = vpop.permute.xlu1 %2544 }
 0x319   :  { %v2945_v32 = vadd.f32 %v2944_v50, %v2763_v4  ;;  %v2940_v10 = vadd.f32 %v2939_v55, %v2938_v11  ;;  %v4089_v4 = vld [vmem:[#allocation5 + $0x318] sm:$0xff] }
 0x31a   :  { %v2500_v60 = vpop.permute.xlu0 %2499 }
 0x31b   :  { %v2946_v44 = vadd.f32 %v2945_v32, %v2764_v40  ;;  %v2765_v8 = vmul.f32 %v4083_v42, %v2500_v60  ;;  %v2941_v51 = vrot.slane %v2940_v10, 1  ;;  %v4090_v32 = vld [vmem:[#allocation5 + $0x320] sm:$0xff] }
 0x31c   :  { %v6141_v2 = vpop.permute.xlu1 %2554  ;;  %v2772_v60 = vmul.f32 %v4090_v32, %v2535_v63 }
 0x31d   :  { %v2947_v25 = vadd.f32 %v2946_v44, %v2765_v8  ;;  %v2942_v11 = vadd.f32 %v2941_v51, %v2940_v10  ;;  %v1863_v10 = vrot.slane %v5869_v13, %v4428_v34 }
 0x31e   :  { %v2510_v52 = vpop.permute.xlu0 %2509 }
 0x31f   :  { %v2948_v16 = vadd.f32 %v2947_v25, %v2766_v37  ;;  %v2767_v7 = vmul.f32 %v4085_v49, %v2510_v52  ;;  %v3170_v42 = vrot.slane %v2942_v11, %v6045_v35  ;;  %v1854_v52 = vrot.slane %v5841_v57, %v4428_v34 }
 0x320   :  { %v6143_v24 = vpop.permute.xlu1 %2564 }
 0x321   :  { %v2949_v23 = vadd.f32 %v2948_v16, %v2767_v7  ;;  %v4092_v16 = vld [vmem:[#allocation5 + $0x330] sm:$0xff]  ;;  %v3177_v54 = vrot.slane %v3170_v42, %v6045_v35 }
 0x322   :  { %v2520_v19 = vpop.permute.xlu0 %2519  ;;  %v2774_v49 = vmul.f32 %v4092_v16, %v2545_v48 }
 0x323   :  { %v2950_v39 = vrot.slane %v2949_v23, 4  ;;  %v2769_v14 = vmul.f32 %v4087_v0, %v2520_v19  ;;  %v6162_v19 = vcombine.high %v6122_v41, %v6122_v41 }
 0x324   :  { %v6145_v27 = vpop.permute.xlu1 %2574 }
 0x325   :  { %v2951_v61 = vadd.f32 %v2950_v39, %v2949_v23  ;;  %v2956_v15 = vadd.f32 %v2769_v14, %v2768_v46  ;;  %v6158_v23 = vcombine.high %v6125_v45, %v6125_v45  ;;  %v4093_v39 = vld [vmem:[#allocation5 + $0x338] sm:$0xff]  ;;  %v2027_v14 = vmul.f32 %v6162_v19, %v1863_v10  ;;  %v4103_v10 = vld [vmem:[#allocation5 + $0x350] sm:$0xff] }
 0x326   :  { %v2530_v17 = vpop.permute.xlu0 %2529  ;;  %v2778_v16 = vmul.f32 %v4103_v10, %v6143_v24  ;;  %v4113_v10 = vld [vmem:[#allocation5 + $0x98] sm:$0xff] }
 0x327   :  { %v2952_v50 = vrot.slane %v2951_v61, 2  ;;  %v2957_v6 = vadd.f32 %v2956_v15, %v2770_v36  ;;  %v2771_v18 = vmul.f32 %v4089_v4, %v2530_v17  ;;  %v2026_v48 = vmul.f32 %v6158_v23, %v1854_v52  ;;  %v4095_v17 = vld [vmem:[#allocation5] sm:$0xff]  ;;  %v4097_v4 = vld [vmem:[#allocation5 + $0xc8] sm:$0xff] }
 0x328   :  { %v6147_v40 = vpop.permute.xlu1 %2584  ;;  %v2673_v36 = vmul.f32 %v4094_v56, %v5887_v1  ;;  %v2672_v11 = vmul.f32 %v4095_v17, %v5854_v26  ;;  %v4099_v1 = vld [vmem:[#allocation5 + $0x348] sm:$0xff]  ;;  %v4101_v26 = vld [vmem:[#allocation5 + $0xc0] sm:$0xff]  ;;  %v4107_v56 = vld [vmem:[#allocation5 + $0xd0] sm:$0xff] }
 0x329   :  { %v2953_v53 = vadd.f32 %v2952_v50, %v2951_v61  ;;  %v2958_v55 = vadd.f32 %v2957_v6, %v2771_v18  ;;  %v4096_v50 = vld [vmem:[#allocation5 + $0x48] sm:$0xff]  ;;  %v2697_v18 = vmul.f32 %v4097_v4, %v5955_v29  ;;  %v4108_v17 = vld [vmem:[#allocation5 + $0x50] sm:$0xff]  ;;  %v4109_v4 = vld [vmem:[#allocation5 + $0x18] sm:$0xff] }
 0x32a   :  { %v2540_v44 = vpop.permute.xlu0 %2539  ;;  %v2681_v6 = vmul.f32 %v4096_v50, %v5911_v62  ;;  %v4102_v62 = vld [vmem:[#allocation5 + $0x88] sm:$0xff]  ;;  %v2800_v29 = vadd.f32 %v2673_v36, %v2672_v11  ;;  %v6652_v36 = vld [vmem:[#allocation40_spill] sm:$0xff]  ;;  %v6653_v11 = vld [vmem:[#allocation17_spill] sm:$0xff] }
 0x32b   :  { %v2954_v8 = vrot.slane %v2953_v53, 1  ;;  %v2959_v31 = vadd.f32 %v2958_v55, %v2772_v60  ;;  %v2773_v37 = vmul.f32 %v4091_v21, %v2540_v44  ;;  %v3274_v60 = vadd.f32 %v3177_v54, %v2026_v48  ;;  %v4098_v55 = vld [vmem:[#allocation5 + $0x340] sm:$0xff]  ;;  %v6651_v54 = vld [vmem:[#allocation32_spill] sm:$0xff] }
 0x32c   :  { %v6150_v25 = vpop.permute.xlu1 %2594  ;;  %v2776_v44 = vmul.f32 %v4098_v55, %v6141_v2  ;;  %v2689_v52 = vmul.f32 %v4102_v62, %v5935_v5  ;;  %v4104_v2 = vld [vmem:[#allocation5 + $0x10] sm:$0xff]  ;;  %v6192_v5 = vrot.slane %v3345_v9, %v6045_v35  ;;  %v2682_v50 = vmul.f32 %v4108_v17, %v6653_v11  ;;  %v4111_v55 = vld [vmem:[#allocation5 + $0xd8] sm:$0xff]  ;;  %v4118_v11 = vld [vmem:[#allocation5 + $0x60] sm:$0xff] }
 0x32d   :  { %v2955_v63 = vadd.f32 %v2954_v8, %v2953_v53  ;;  %v2960_v7 = vadd.f32 %v2959_v31, %v2773_v37  ;;  %v4100_v31 = vld [vmem:[#allocation5 + $0x40] sm:$0xff]  ;;  %v2696_v37 = vmul.f32 %v4101_v26, %v5926_v59  ;;  %v4106_v59 = vld [vmem:[#allocation5 + $0x358] sm:$0xff]  ;;  %v2690_v9 = vmul.f32 %v4110_v38, %v6655_v58  ;;  %v4120_v58 = vld [vmem:[#allocation5 + $0xe8] sm:$0xff] }
 0x32e   :  { %v2550_v51 = vpop.permute.xlu0 %2549  ;;  %v2680_v21 = vmul.f32 %v4100_v31, %v5878_v43  ;;  %v4112_v26 = vld [vmem:[#allocation5 + $0x58] sm:$0xff] }
 0x32f   :  { %v3184_v57 = vrot.slane %v2955_v63, %v6045_v35  ;;  %v2961_v46 = vadd.f32 %v2960_v7, %v2774_v49  ;;  %v2775_v13 = vmul.f32 %v4093_v39, %v2550_v51  ;;  %v2674_v7 = vmul.f32 %v4104_v2, %v5860_v20  ;;  %v4105_v51 = vld [vmem:[#allocation5 + $0x80] sm:$0xff] }
 0x330   :  { %v6166_v0 = vpop.permute.xlu1 %2604  ;;  %v2839_v43 = vadd.f32 %v2697_v18, %v2696_v37  ;;  %v6654_v18 = vld [vmem:[#allocation19_spill] sm:$0xff]  ;;  %v6657_v37 = vld [vmem:[#allocation36_spill] sm:$0xff] }
 0x331   :  { %v3191_v61 = vrot.slane %v3184_v57, %v6045_v35  ;;  %v6172_v15 = vadd.f32 %v2961_v46, %v2775_v13  ;;  %v2688_v57 = vmul.f32 %v4105_v51, %v6651_v54  ;;  %v2813_v46 = vadd.f32 %v2681_v6, %v2680_v21 }
 0x332   :  { %v2560_v32 = vpop.permute.xlu0 %2559  ;;  %v2801_v6 = vadd.f32 %v2800_v29, %v2674_v7  ;;  %v2683_v62 = vmul.f32 %v4112_v26, %v6657_v37  ;;  %v4122_v26 = vld [vmem:[#allocation5 + $0x380] sm:$0xff] }
 0x333   :  { %v3275_v53 = vadd.f32 %v3191_v61, %v2027_v14  ;;  %v2777_v42 = vmul.f32 %v4099_v1, %v2560_v32  ;;  %v2826_v20 = vadd.f32 %v2689_v52, %v2688_v57  ;;  %v2698_v61 = vmul.f32 %v4107_v56, %v6652_v36  ;;  %v4115_v57 = vld [vmem:[#allocation5 + $0x368] sm:$0xff] }
 0x334   :  { %v6178_v8 = vpop.permute.xlu1 %2634  ;;  %v2675_v32 = vmul.f32 %v4109_v4, %v6654_v18  ;;  %v2814_v21 = vadd.f32 %v2813_v46, %v2682_v50  ;;  %v6659_v46 = vld [vmem:[#allocation15_spill] sm:$0xff]  ;;  %v6661_v50 = vld [vmem:[#allocation28_spill] sm:$0xff]  ;;  %v6662_v18 = vld [vmem:[#allocation25_spill] sm:$0xff]  ;;  %v2784_v37 = vmul.f32 %v4122_v26, %v6150_v25 }
 0x335   :  { %v2969_v49 = vadd.f32 %v2777_v42, %v2776_v44  ;;  %v3346_v63 = vcombine.low %v3274_v60, %v3275_v53  ;;  %v2840_v53 = vadd.f32 %v2839_v43, %v2698_v61  ;;  %v6656_v44 = vld [vmem:[#allocation46_spill] sm:$0xff]  ;;  %v2827_v29 = vadd.f32 %v2826_v20, %v2690_v9  ;;  %v4117_v20 = vld [vmem:[#allocation5 + $0xe0] sm:$0xff]  ;;  %v6660_v61 = vld [vmem:[#allocation31_spill] sm:$0xff] }
 0x336   :  { %v2570_v39 = vpop.permute.xlu0 %2569  ;;  %v2699_v1 = vmul.f32 %v4111_v55, %v6656_v44  ;;  %v2802_v7 = vadd.f32 %v2801_v6, %v2675_v32  ;;  %v2700_v17 = vmul.f32 %v4117_v20, %v6660_v61  ;;  %v2684_v4 = vmul.f32 %v4118_v11, %v6661_v50  ;;  %v4119_v6 = vld [vmem:[#allocation5 + $0xa0] sm:$0xff]  ;;  %v4128_v25 = vld [vmem:[#allocation5 + $0x378] sm:$0xff] }
 0x337   :  { %v2970_v13 = vadd.f32 %v2969_v49, %v2778_v16  ;;  %v2779_v48 = vmul.f32 %v4106_v59, %v2570_v39  ;;  %v6195_v24 = vrot.slane %v3346_v63, %v6045_v35  ;;  %v6658_v16 = vld [vmem:[#allocation42_spill] sm:$0xff]  ;;  %v4114_v63 = vld [vmem:[#allocation5 + $0x360] sm:$0xff]  ;;  %v2692_v32 = vmul.f32 %v4119_v6, %v6662_v18 }
 0x338   :  { %v6186_v14 = vpop.permute.xlu1 %2644  ;;  %v2691_v49 = vmul.f32 %v4113_v10, %v6658_v16  ;;  %v2780_v2 = vmul.f32 %v4114_v63, %v6145_v27  ;;  %v2841_v51 = vadd.f32 %v2840_v53, %v2699_v1  ;;  %v6663_v9 = vld [vmem:[#allocation37_spill] sm:$0xff]  ;;  %v4121_v1 = vld [vmem:[#allocation5 + $0x28] sm:$0xff] }
 0x339   :  { %v3377_v60 = vcombine.low %v6192_v5, %v6195_v24  ;;  %v2971_v42 = vadd.f32 %v2970_v13, %v2779_v48  ;;  %v4116_v13 = vld [vmem:[#allocation5 + $0x20] sm:$0xff]  ;;  %v2815_v48 = vadd.f32 %v2814_v21, %v2683_v62  ;;  %v2701_v53 = vmul.f32 %v4120_v58, %v6663_v9  ;;  %v4123_v62 = vld [vmem:[#allocation5 + $0x388] sm:$0xff] }
 0x33a   :  { %v2580_v31 = vpop.permute.xlu0 %2579  ;;  %v2676_v59 = vmul.f32 %v4116_v13, %v6659_v46  ;;  %v2828_v36 = vadd.f32 %v2827_v29, %v2691_v49  ;;  %v2842_v38 = vadd.f32 %v2841_v51, %v2700_v17  ;;  %v4124_v10 = vld [vmem:[#allocation5 + $0x68] sm:$0xff]  ;;  %v4127_v13 = vld [vmem:[#allocation5 + $0x390] sm:$0xff]  ;;  %v6667_v58 = vld [vmem:[#allocation33_spill] sm:$0xff] }
 0x33b   :  { %v2972_v54 = vadd.f32 %v2971_v42, %v2780_v2  ;;  %v2781_v43 = vmul.f32 %v4115_v57, %v2580_v31  ;;  %v6664_v42 = vld [vmem:[#allocation21_spill] sm:$0xff]  ;;  %v2816_v21 = vadd.f32 %v2815_v48, %v2684_v4  ;;  %v6665_v16 = vld [vmem:[#allocation38_spill] sm:$0xff]  ;;  %v4126_v57 = vld [vmem:[#allocation5 + $0x370] sm:$0xff]  ;;  %v2786_v46 = vmul.f32 %v4127_v13, %v6166_v0 }
 0x33c   :  { %v6205_v52 = vpop.permute.xlu1 %2614  ;;  %v2803_v27 = vadd.f32 %v2802_v7, %v2676_v59  ;;  %v2677_v31 = vmul.f32 %v4121_v1, %v6664_v42  ;;  %v2685_v49 = vmul.f32 %v4124_v10, %v6665_v16  ;;  %v2829_v63 = vadd.f32 %v2828_v36, %v2692_v32  ;;  %v4125_v2 = vld [vmem:[#allocation5 + $0xa8] sm:$0xff]  ;;  %v6666_v7 = vld [vmem:[#allocation44_spill] sm:$0xff]  ;;  %v4130_v32 = vld [vmem:[#allocation5 + $0xf0] sm:$0xff] }
 0x33d   :  { %v2973_v55 = vadd.f32 %v2972_v54, %v2781_v43  ;;  %v2693_v51 = vmul.f32 %v4125_v2, %v6666_v7  ;;  %v2782_v54 = vmul.f32 %v4126_v57, %v6147_v40  ;;  %v2843_v48 = vadd.f32 %v2842_v38, %v2701_v53  ;;  %v4129_v4 = vld [vmem:[#allocation5 + $0x398] sm:$0xff]  ;;  %v4131_v40 = vld [vmem:[#allocation5 + $0x30] sm:$0xff]  ;;  %v6669_v0 = vld [vmem:[#allocation30_spill] sm:$0xff] }
 0x33e   :  { %v2590_v39 = vpop.permute.xlu0 %2589  ;;  %v2804_v11 = vadd.f32 %v2803_v27, %v2677_v31  ;;  %v2817_v6 = vadd.f32 %v2816_v21, %v2685_v49  ;;  %v2702_v9 = vmul.f32 %v4130_v32, %v6667_v58  ;;  %v4132_v42 = vld [vmem:[#allocation5 + $0x70] sm:$0xff]  ;;  %v4133_v38 = vld [vmem:[#allocation5 + $0x3a0] sm:$0xff]  ;;  %v6671_v21 = vld [vmem:[#allocation48_spill] sm:$0xff] }
 0x33f   :  { %v2974_v20 = vadd.f32 %v2973_v55, %v2782_v54  ;;  %v2783_v61 = vmul.f32 %v4128_v25, %v2590_v39  ;;  %v2830_v18 = vadd.f32 %v2829_v63, %v2693_v51  ;;  %v2686_v26 = vmul.f32 %v4132_v42, %v6669_v0  ;;  %v4134_v55 = vld [vmem:[#allocation5 + $0xb0] sm:$0xff]  ;;  %v4136_v2 = vld [vmem:[#allocation5 + $0x38] sm:$0xff]  ;;  %v4137_v57 = vld [vmem:[#allocation5 + $0x3a8] sm:$0xff] }
 0x340   :  { %v6210_v56 = vpop.permute.xlu1 %2619  ;;  %v2788_v53 = vmul.f32 %v4133_v38, %v6205_v52  ;;  %v6670_v27 = vld [vmem:[#allocation27_spill] sm:$0xff]  ;;  %v4141_v32 = vld [vmem:[#allocation5 + $0x3c8] sm:$0xff]  ;;  %v4142_v58 = vld [vmem:[#allocation5 + $0x3b8] sm:$0xff] }
 0x341   :  { %v2694_v31 = vmul.f32 %v4134_v55, %v6670_v27  ;;  %v2975_v10 = vadd.f32 %v2974_v20, %v2783_v61  ;;  %v6672_v7 = vld [vmem:[#allocation23_spill] sm:$0xff]  ;;  %v2789_v54 = vmul.f32 %v4137_v57, %v6210_v56  ;;  %v2818_v52 = vadd.f32 %v2817_v6, %v2686_v26  ;;  %v4143_v56 = vld [vmem:[#allocation5 + $0x3c0] sm:$0xff] }
 0x342   :  { %v2600_v44 = vpop.permute.xlu0 %2599  ;;  %v2679_v51 = vmul.f32 %v4136_v2, %v6672_v7  ;;  %v2792_v6 = vmul.f32 %v4143_v56, %v6178_v8  ;;  %v4145_v7 = vld [vmem:[#allocation5 + $0x3d8] sm:$0xff] }
 0x343   :  { %v2785_v29 = vmul.f32 %v4123_v62, %v2600_v44  ;;  %v6668_v44 = vld [vmem:[#allocation24_spill] sm:$0xff] }
 0x344   :  { %v2625_v43 = vpop.permute.xlu1 %2624  ;;  %v2678_v1 = vmul.f32 %v4131_v40, %v6668_v44  ;;  %v4135_v62 = vld [vmem:[#allocation5 + $0xf8] sm:$0xff]  ;;  %v2976_v44 = vrot.slane %v2975_v10, 4 }
 0x345   :  { %v2982_v59 = vadd.f32 %v2785_v29, %v2784_v37  ;;  %v2844_v37 = vadd.f32 %v2843_v48, %v2702_v9  ;;  %v2703_v29 = vmul.f32 %v4135_v62, %v6671_v21  ;;  %v4139_v48 = vld [vmem:[#allocation5 + $0xb8] sm:$0xff]  ;;  %v4144_v62 = vld [vmem:[#allocation5 + $0x3d0] sm:$0xff] }
 0x346   :  { %v2610_v17 = vpop.permute.xlu0 %2609  ;;  %v2805_v63 = vadd.f32 %v2804_v11, %v2678_v1  ;;  %v2977_v55 = vadd.f32 %v2976_v44, %v2975_v10  ;;  %v4146_v10 = vld [vmem:[#allocation5 + $0x3e0] sm:$0xff] }
 0x347   :  { %v2983_v50 = vadd.f32 %v2982_v59, %v2786_v46  ;;  %v2787_v36 = vmul.f32 %v4129_v4, %v2610_v17  ;;  %v4138_v46 = vld [vmem:[#allocation5 + $0x78] sm:$0xff]  ;;  %v6673_v59 = vld [vmem:[#allocation29_spill] sm:$0xff]  ;;  %v2831_v17 = vadd.f32 %v2830_v18, %v2694_v31  ;;  %v2845_v40 = vadd.f32 %v2844_v37, %v2703_v29 }
 0x348   :  { %v2630_v49 = vpop.permute.xlu1 %2629  ;;  %v2687_v25 = vmul.f32 %v4138_v46, %v6673_v59  ;;  %v2963_v18 = vrot.slane %v6172_v15, 4  ;;  %v2806_v38 = vadd.f32 %v2805_v63, %v2679_v51  ;;  %v2794_v37 = vmul.f32 %v4144_v62, %v6186_v14  ;;  %v6675_v62 = vld [vmem:[#allocation12_spill] sm:$0xff] }
 0x349   :  { %v2984_v39 = vadd.f32 %v2983_v50, %v2787_v36  ;;  %v6674_v50 = vld [vmem:[#allocation35_spill] sm:$0xff]  ;;  %v2791_v9 = vmul.f32 %v4142_v58, %v2630_v49  ;;  %v2978_v51 = vrot.slane %v2977_v55, 2 }
 0x34a   :  { %v2640_v16 = vpop.permute.xlu0 %2639  ;;  %v2695_v4 = vmul.f32 %v4139_v48, %v6674_v50  ;;  %v4140_v36 = vld [vmem:[#allocation5 + $0x3b0] sm:$0xff]  ;;  %v2819_v0 = vadd.f32 %v2818_v52, %v2687_v25  ;;  %v2964_v8 = vadd.f32 %v2963_v18, %v6172_v15  ;;  %v2807_v49 = vrot.slane %v2806_v38, 4  ;;  %v4147_v50 = vld [vmem:[#allocation5 + $0x3e8] sm:$0xff] }
 0x34b   :  { %v2985_v13 = vadd.f32 %v2984_v39, %v2788_v53  ;;  %v2790_v20 = vmul.f32 %v4140_v36, %v2625_v43  ;;  %v2793_v11 = vmul.f32 %v4141_v32, %v2640_v16  ;;  %v2846_v43 = vrot.slane %v2845_v40, 4 }
 0x34c   :  { %v2832_v26 = vadd.f32 %v2831_v17, %v2695_v4  ;;  %v6234_v31 = vpop.permute.xlu1 %3437  ;;  %v2820_v29 = vrot.slane %v2819_v0, 4  ;;  %v2965_v25 = vrot.slane %v2964_v8, 2  ;;  %v2808_v14 = vadd.f32 %v2807_v49, %v2806_v38 }
 0x34d   :  { %v2986_v61 = vadd.f32 %v2985_v13, %v2789_v54  ;;  %v2995_v53 = vadd.f32 %v2793_v11, %v2792_v6  ;;  %v2847_v63 = vadd.f32 %v2846_v43, %v2845_v40  ;;  %v2979_v36 = vadd.f32 %v2978_v51, %v2977_v55  ;;  %v4148_v11 = vld [vmem:[#allocation5 + $0x3f0] sm:$0xff] }
 0x34e   :  { %v2650_v1 = vpop.permute.xlu0 %2649  ;;  %v2833_v16 = vrot.slane %v2832_v26, 4  ;;  %v2821_v46 = vadd.f32 %v2820_v29, %v2819_v0  ;;  %v2966_v44 = vadd.f32 %v2965_v25, %v2964_v8 }
 0x34f   :  { %v2987_v42 = vadd.f32 %v2986_v61, %v2790_v20  ;;  %v2996_v2 = vadd.f32 %v2995_v53, %v2794_v37  ;;  %v2795_v57 = vmul.f32 %v4145_v7, %v2650_v1  ;;  %v2848_v15 = vrot.slane %v2847_v63, 2  ;;  %v4149_v53 = vld [vmem:[#allocation5 + $0x3f8] sm:$0xff] }
 0x350   :  { %v2834_v59 = vadd.f32 %v2833_v16, %v2832_v26  ;;  %v6238_v17 = vpop.permute.xlu1 %3455  ;;  %v2809_v1 = vrot.slane %v2808_v14, 2  ;;  %v1773_v37 = vrot.slane %v6675_v62, %v4428_v34  ;;  %v3443_v62 = vrot.slane %v6234_v31, %v4428_v34 }
 0x351   :  { %v2988_v39 = vadd.f32 %v2987_v42, %v2791_v9  ;;  %v2997_v48 = vadd.f32 %v2996_v2, %v2795_v57  ;;  %v2822_v9 = vrot.slane %v2821_v46, 2  ;;  %v2849_v6 = vadd.f32 %v2848_v15, %v2847_v63  ;;  %v6677_v63 = vld [vmem:[#allocation13_spill] sm:$0xff] }
 0x352   :  { %v2655_v27 = vpop.permute.xlu0 %2654  ;;  %v2835_v40 = vrot.slane %v2834_v59, 2  ;;  %v2980_v42 = vrot.slane %v2979_v36, 1  ;;  %v2810_v16 = vadd.f32 %v2809_v1, %v2808_v14  ;;  %v1791_v51 = vrot.slane %v6677_v63, %v4428_v34 }
 0x353   :  { %v2989_v21 = vrot.slane %v2988_v39, 4  ;;  %v2796_v52 = vmul.f32 %v4146_v10, %v2655_v27  ;;  %v2823_v43 = vadd.f32 %v2822_v9, %v2821_v46  ;;  %v2967_v27 = vrot.slane %v2966_v44, 1 }
 0x354   :  { %v6240_v26 = vpop.permute.xlu1 %3473  ;;  %v2836_v55 = vadd.f32 %v2835_v40, %v2834_v59  ;;  %v2850_v49 = vrot.slane %v2849_v6, 1  ;;  %v2981_v2 = vadd.f32 %v2980_v42, %v2979_v36  ;;  %v6253_v14 = vmul.f32 %v6122_v41, %v1773_v37 }
 0x355   :  { %v2990_v54 = vadd.f32 %v2989_v21, %v2988_v39  ;;  %v2998_v32 = vadd.f32 %v2997_v48, %v2796_v52  ;;  %v6676_v21 = vld [vmem:[#allocation18_spill] sm:$0xff]  ;;  %v6679_v52 = vld [vmem:[#allocation16_spill] sm:$0xff]  ;;  %v2824_v59 = vrot.slane %v2823_v43, 1  ;;  %v2968_v48 = vadd.f32 %v2967_v27, %v2966_v44 }
 0x356   :  { %v2660_v13 = vpop.permute.xlu0 %2659  ;;  %v1782_v29 = vrot.slane %v6676_v21, %v4428_v34  ;;  %v1881_v46 = vrot.slane %v6679_v52, %v4428_v34  ;;  %v2837_v25 = vrot.slane %v2836_v55, 1  ;;  %v2811_v15 = vrot.slane %v2810_v16, 1 }
 0x357   :  { %v2797_v4 = vmul.f32 %v4147_v50, %v2660_v13  ;;  %v2991_v20 = vrot.slane %v2990_v54, 2  ;;  %v2019_v40 = vmul.f32 %v6162_v19, %v1791_v51  ;;  %v6681_v19 = vld [vmem:[#allocation14_spill] sm:$0xff] }
 0x358   :  { %v3492_v50 = vpop.permute.xlu1 %3491  ;;  %v2838_v42 = vadd.f32 %v2837_v25, %v2836_v55 }
 0x359   :  { %v2999_v56 = vadd.f32 %v2998_v32, %v2797_v4  ;;  %v2992_v0 = vadd.f32 %v2991_v20, %v2990_v54  ;;  %v6678_v54 = vld [vmem:[#allocation20_spill] sm:$0xff]  ;;  %v6256_v4 = vmul.f32 %v6158_v23, %v1782_v29  ;;  %v6680_v20 = vld [vmem:[#allocation22_spill] sm:$0xff]  ;;  %v2851_v32 = vadd.f32 %v2850_v49, %v2849_v6 }
 0x35a   :  { %v2665_v61 = vpop.permute.xlu0 %2664  ;;  %v1872_v13 = vrot.slane %v6678_v54, %v4428_v34  ;;  %v2029_v23 = vmul.f32 %v6059_v47, %v1881_v46  ;;  %v3461_v6 = vrot.slane %v6238_v17, %v4428_v34  ;;  %v6682_v29 = vld [vmem:[#allocation26_spill] sm:$0xff]  ;;  %v3058_v49 = vrot.slane %v2838_v42, %v6045_v35 }
 0x35b   :  { %v2798_v58 = vmul.f32 %v4148_v11, %v2665_v61  ;;  %v2993_v7 = vrot.slane %v2992_v0, 1  ;;  %v1764_v61 = vrot.slane %v6680_v20, %v4428_v34  ;;  %v3212_v11 = vrot.slane %v2981_v2, %v6045_v35 }
 0x35c   :  { %v2028_v44 = vmul.f32 %v6056_v12, %v1872_v13  ;;  %v3072_v12 = vrot.slane %v2851_v32, %v6045_v35 }
 0x35d   :  { %v3000_v38 = vadd.f32 %v2999_v56, %v2798_v58  ;;  %v2994_v58 = vadd.f32 %v2993_v7, %v2992_v0  ;;  %v2825_v56 = vadd.f32 %v2824_v59, %v2823_v43  ;;  %v3219_v27 = vrot.slane %v3212_v11, %v6045_v35  ;;  %v6274_v43 = vpop.permute.xlu1 %3509 }
 0x35e   :  { %v2670_v18 = vpop.permute.xlu0 %2669  ;;  %v3079_v51 = vrot.slane %v3072_v12, %v6045_v35 }
 0x35f   :  { %v2799_v39 = vmul.f32 %v4149_v53, %v2670_v18  ;;  %v3198_v18 = vrot.slane %v2968_v48, %v6045_v35  ;;  %v3226_v47 = vrot.slane %v2994_v58, %v6045_v35  ;;  %v3277_v54 = vadd.f32 %v3219_v27, %v2029_v23 }
 0x361   :  { %v3001_v8 = vadd.f32 %v3000_v38, %v2799_v39  ;;  %v2812_v38 = vadd.f32 %v2811_v15, %v2810_v16  ;;  %v1890_v39 = vrot.slane %v6681_v19, %v4428_v34  ;;  %v1899_v16 = vrot.slane %v6682_v29, %v4428_v34  ;;  %v3528_v32 = vpop.permute.xlu1 %3527 }
 0x362   :  { %v3447_v57 = vpop.permute.xlu0 %3446  ;;  %v3205_v2 = vrot.slane %v3198_v18, %v6045_v35  ;;  %v3233_v13 = vrot.slane %v3226_v47, %v6045_v35  ;;  %v3515_v29 = vrot.slane %v6274_v43, %v4428_v34 }
 0x363   :  { %v3002_v10 = vrot.slane %v3001_v8, 4  ;;  %v3452_v0 = vrot.slane %v3447_v57, %v4428_v34  ;;  %v3030_v7 = vrot.slane %v2812_v38, %v6045_v35  ;;  %v3479_v57 = vrot.slane %v6240_v26, %v4428_v34 }
 0x364   :  { %v2030_v15 = vmul.f32 %v6069_v28, %v1890_v39  ;;  %v3276_v20 = vadd.f32 %v3205_v2, %v2028_v44  ;;  %v2031_v11 = vmul.f32 %v6080_v33, %v1899_v16 }
 0x365   :  { %v3003_v36 = vadd.f32 %v3002_v10, %v3001_v8  ;;  %v3044_v8 = vrot.slane %v2825_v56, %v6045_v35  ;;  %v3595_v31 = vcombine.low %v3443_v62, %v3452_v0  ;;  %v3497_v10 = vrot.slane %v3492_v50, %v4428_v34  ;;  %v3546_v12 = vpop.permute.xlu1 %3545 }
 0x366   :  { %v3465_v9 = vpop.permute.xlu0 %3464  ;;  %v3278_v23 = vadd.f32 %v3233_v13, %v2030_v15  ;;  %v3347_v42 = vcombine.low %v3276_v20, %v3277_v54 }
 0x367   :  { %v3004_v1 = vrot.slane %v3003_v36, 2  ;;  %v3470_v41 = vrot.slane %v3465_v9, %v4428_v34  ;;  %v3051_v26 = vrot.slane %v3044_v8, %v6045_v35  ;;  %v3605_v58 = vrot.slane %v3595_v31, %v6045_v35 }
 0x368   :  { %v3369_v47 = vrot.slane %v3347_v42, %v6045_v35 }
 0x369   :  { %v3005_v53 = vadd.f32 %v3004_v1, %v3003_v36  ;;  %v3596_v17 = vcombine.low %v3461_v6, %v3470_v41  ;;  %v3065_v36 = vrot.slane %v3058_v49, %v6045_v35  ;;  %v3037_v1 = vrot.slane %v3030_v7, %v6045_v35 }
 0x36a   :  { %v3483_v55 = vpop.permute.xlu0 %3482  ;;  %v3267_v41 = vadd.f32 %v3079_v51, %v2019_v40  ;;  %v2016_v6 = vmul.f32 %v6125_v45, %v1764_v61  ;;  %v3265_v33 = vadd.f32 %v3051_v26, %v6253_v14  ;;  %v3533_v14 = vrot.slane %v3528_v32, %v4428_v34 }
 0x36b   :  { %v3006_v37 = vrot.slane %v3005_v53, 1  ;;  %v3488_v21 = vrot.slane %v3483_v55, %v4428_v34  ;;  %v3612_v59 = vrot.slane %v3596_v17, %v6045_v35  ;;  %v3385_v49 = vrot.slane %v3377_v60, %v6045_v35 }
 0x36c   :  { %v3264_v39 = vadd.f32 %v3037_v1, %v2016_v6  ;;  %v3551_v51 = vrot.slane %v3546_v12, %v4428_v34 }
 0x36d   :  { %v3007_v63 = vadd.f32 %v3006_v37, %v3005_v53  ;;  %v3597_v25 = vcombine.low %v3479_v57, %v3488_v21  ;;  %v3627_v18 = vcombine.low %v3605_v58, %v3612_v59  ;;  %v3266_v53 = vadd.f32 %v3065_v36, %v6256_v4 }
 0x36e   :  { %v3501_v52 = vpop.permute.xlu0 %3500  ;;  %v3296_v61 = vcombine.low %v3264_v39, %v3265_v33 }
 0x36f   :  { %v3240_v46 = vrot.slane %v3007_v63, %v6045_v35  ;;  %v3506_v48 = vrot.slane %v3501_v52, %v4428_v34  ;;  %v3619_v38 = vrot.slane %v3597_v25, %v6045_v35  ;;  %v3297_v27 = vcombine.low %v3266_v53, %v3267_v41  ;;  %v3564_v63 = vpop.permute.xlu1 %3563 }
 0x370   :  { %v3635_v55 = vrot.slane %v3627_v18, %v6045_v35  ;;  %v3306_v31 = vrot.slane %v3296_v61, %v6045_v35  ;;  %v3569_v52 = vrot.slane %v3564_v63, %v4428_v34 }
 0x371   :  { %v3247_v50 = vrot.slane %v3240_v46, %v6045_v35  ;;  %v3598_v9 = vcombine.low %v3497_v10, %v3506_v48  ;;  %v3313_v8 = vrot.slane %v3297_v27, %v6045_v35  ;;  %v3343_v46 = vrot.slane %v3329_v22, %v6045_v35 }
 0x372   :  { %v3519_v56 = vpop.permute.xlu0 %3518 }
 0x373   :  { %v3279_v28 = vadd.f32 %v3247_v50, %v2031_v11  ;;  %v3626_v44 = vrot.slane %v3598_v9, %v6045_v35  ;;  %v3524_v17 = vrot.slane %v3519_v56, %v4428_v34  ;;  %v3328_v10 = vcombine.low %v3306_v31, %v3313_v8 }
 0x375   :  { %v3628_v0 = vcombine.low %v3619_v38, %v3626_v44  ;;  %v3348_v19 = vcombine.low %v3278_v23, %v3279_v28  ;;  %v3644_v43 = vcombine.low %v3515_v29, %v3524_v17  ;;  %v3336_v48 = vrot.slane %v3328_v10, %v6045_v35 }
 0x376   :  { %v3537_v40 = vpop.permute.xlu0 %3536 }
 0x377   :  { %v3642_v62 = vrot.slane %v3628_v0, %v6045_v35  ;;  %v3542_v37 = vrot.slane %v3537_v40, %v4428_v34  ;;  %v3376_v45 = vrot.slane %v3348_v19, %v6045_v35  ;;  %v3654_v59 = vrot.slane %v3644_v43, %v6045_v35 }
 0x378   :  { %v3344_v20 = vcombine.low %v3336_v48, %v3343_v46 }
 0x379   :  { %v3643_v4 = vcombine.low %v3635_v55, %v3642_v62  ;;  %v3378_v21 = vcombine.low %v3369_v47, %v3376_v45  ;;  %v3645_v2 = vcombine.low %v3533_v14, %v3542_v37 }
 0x37a   :  { %v3555_v16 = vpop.permute.xlu0 %3554 }
 0x37b   :  { %4017 = vrcp.f32 %v3643_v4  ;;  %v3560_v7 = vrot.slane %v3555_v16, %v4428_v34  ;;  %v3392_v57 = vrot.slane %v3378_v21, %v6045_v35  ;;  %v3661_v5 = vrot.slane %v3645_v2, %v6045_v35 }
 0x37d   :  { %v3393_v54 = vcombine.low %v3385_v49, %v3392_v57  ;;  %v3646_v24 = vcombine.low %v3551_v51, %v3560_v7  ;;  %v3676_v15 = vcombine.low %v3654_v59, %v3661_v5 }
 0x37e   :  { %v3573_v13 = vpop.permute.xlu0 %3572 }
 0x37f   :  { %v3578_v60 = vrot.slane %v3573_v13, %v4428_v34  ;;  %v3668_v26 = vrot.slane %v3646_v24, %v6045_v35  ;;  %v3684_v34 = vrot.slane %v3676_v15, %v6045_v35 }
 0x381   :  { %v3647_v25 = vcombine.low %v3569_v52, %v3578_v60 }
 0x383   :  { %v3675_v36 = vrot.slane %v3647_v25, %v6045_v35 }
 0x385   :  { %v4018_v32 = vpop.eup %4017  ;;  %v3677_v11 = vcombine.low %v3668_v26, %v3675_v36 }
 0x386   :  { %v3696_v50 = vmul.f32 %v4018_v32, %v3344_v20 }
 0x387   :  { %v3691_v58 = vrot.slane %v3677_v11, %v6045_v35 }
 0x388   :  { %3699 = vst [vmem:[#allocation8] sm:$0xff] %v3696_v50 }
 0x389   :  { %v3692_v30 = vcombine.low %v3684_v34, %v3691_v58 }
 0x38b   :  { %4019 = vrcp.f32 %v3692_v30 }
 0x395   :  { %v4020_v3 = vpop.eup %4019 }
 0x396   :  { %v3698_v22 = vmul.f32 %v4020_v3, %v3393_v54 }
 0x398   :  { %3700 = vst [vmem:[#allocation8 + $0x8] sm:$0xff] %v3698_v22 }
 0x399   :  { %4183 = shalt.err (!%p4180_p12)
}
 0x39a   :  { %s4184_s30 = scalar_lea.hbm %s6353_s2, 256 }
 0x39b   :  { %p4185_p13 = scmp.ne.s32.totalorder %s6353_s2, %s4184_s30  ;;  %p4188_p0 = scmp.lt.u32.totalorder %s4184_s30, %s6353_s2 }
 0x39d   :  { %p4190_p1 = pnand %p4188_p0, %p4185_p13 }
 0x39f   :  { %4193 = shalt.err (!%p4190_p1)
}
 0x3a0   :  { %3712 = dma.vmem_to_hbm [thread:$0]  %s3707_s26, 256, %s6353_s2, [#allocation7], %s4199_s19, %s4199_s19, %s4200_s20  }
 0x3a1   :  { %4196 = dma.done.wait [#allocation7], 256  }
 0x3a2   :  { %4197 = vsyncadd [#allocation7], 4294967040 }
 0x3a3   :  { %3716 = vsyncpa [#allocation6], 1 }
 0x3a4   :  { %3717 = vsyncpa [#allocation7], 1 }

</bundles_post_ra>
